<compile_context>
chip_gen: v6e
topology: v6e:2x2x1
jax: 0.10.0
libtpu: 0.0.40
codegen_flags: <defaults>
</compile_context>

<pallas_src>
import math

import jax
import jax.numpy as jnp
from jax.experimental import pallas as pl
from jax.experimental.pallas import tpu as pltpu


def _vmem_spec():
    return pl.BlockSpec(memory_space=pltpu.MemorySpace.VMEM)


# ----------------------------------------------------------------------------
# Fused encoder kernel (single pallas_call, no grid — everything VMEM-resident)
# ----------------------------------------------------------------------------
def _make_encoder_kernel(num_layers, T, B, H, V):
    """Kernel args (all full-array VMEM refs):

      tok_ref : (T*B, 1) int32  time-major flattened token ids (row = t*B + b)
      emb_ref : (V, E)   f32    embedding table (V padded to a sublane mult.)
      per layer l:
        wih_l : (D_in, 6H) f32  input weights, lanes [r_f r_b z_f z_b n_f n_b]
        b_l   : (1, 6H)    f32  b_ih (+ b_hh pre-folded for the r/z gates)
        whh_l : (2H, 6H)   f32  block-diagonal recurrent weights
        bhn_l : (1, 2H)    f32  b_hn for [fwd | bwd] (kept separate: * r)
      mean_ref: (B, 2H)  f32 output   mean over time of the last layer
      ip_ref  : (T*B, 6H) f32 scratch hoisted input projection (reused/layer)
      seq_ref : (T*B, 2H) f32 scratch inter-layer sequence (never hits HBM)
    """
    H2, H3, H4 = 2 * H, 3 * H, 4 * H

    def kernel(*args):
        tok_ref, emb_ref = args[0], args[1]
        layer_refs = args[2:2 + 4 * num_layers]
        mean_ref = args[2 + 4 * num_layers]
        ip_ref = args[3 + 4 * num_layers]
        seq_ref = args[4 + 4 * num_layers]

        # ---- Hoisted lane masks selecting the backward-direction gate lanes
        # of the interleaved layout ([H,2H) and [3H,4H) of rz; [H,2H) of n).
        lane4 = jax.lax.broadcasted_iota(jnp.int32, (B, H4), 1)
        bwd4 = ((lane4 >= H) & (lane4 < H2)) | (lane4 >= H3)
        lane2 = jax.lax.broadcasted_iota(jnp.int32, (B, H2), 1)
        bwd2 = lane2 >= H

        # ---- Embedding gather as a one-hot MXU matmul (table VMEM-resident).
        tok = tok_ref[...]                                         # (T*B, 1)
        vocab_iota = jax.lax.broadcasted_iota(jnp.int32, (T * B, V), 1)
        onehot = (tok == vocab_iota).astype(jnp.float32)           # (T*B, V)
        x = jnp.dot(onehot, emb_ref[...],
                    preferred_element_type=jnp.float32)            # (T*B, E)

        for layer in range(num_layers):
            wih_ref, b_ref, whh_ref, bhn_ref = layer_refs[4 * layer:4 * layer + 4]
            last = layer == num_layers - 1

            # -- Hoisted fused input projection (both directions, one GEMM) --
            src = x if layer == 0 else seq_ref[...]
            ip_ref[...] = (jnp.dot(src, wih_ref[...],
                                   preferred_element_type=jnp.float32)
                           + b_ref[...])

            whh = whh_ref[...]                                     # (2H, 6H)
            bhn = jnp.broadcast_to(bhn_ref[...], (B, H2))          # hoisted

            h = jnp.zeros((B, H2), jnp.float32)                    # [h_f | h_b]
            acc = jnp.zeros((B, H2), jnp.float32)                  # running sum

            # T is small & static: full unroll, every slice static.
            for s in range(T):
                sb = T - 1 - s                                     # backward time
                ig_f = ip_ref[s * B:(s + 1) * B, :]                # fwd gates @ t=s
                ig_b = ip_ref[sb * B:(sb + 1) * B, :]              # bwd gates @ t=sb
                # time-align directions: fwd lanes <- ig_f, bwd lanes <- ig_b
                ig_rz = jnp.where(bwd4, ig_b[:, :H4], ig_f[:, :H4])
                ig_n = jnp.where(bwd2, ig_b[:, H4:], ig_f[:, H4:])

                # ONE block-diagonal recurrent matmul for both directions.
                hg = jnp.dot(h, whh, preferred_element_type=jnp.float32)

                rz = jax.nn.sigmoid(ig_rz + hg[:, :H4])            # 128-lane slab
                r = rz[:, :H2]
                z = rz[:, H2:]
                n = jnp.tanh(ig_n + r * (hg[:, H4:] + bhn))        # 2H slab
                h = (1.0 - z) * n + z * h                          # stays fused

                if last:
                    acc = acc + h                                  # running mean sum
                else:
                    # per-step direct writes to the VMEM inter-layer scratch
                    seq_ref[s * B:(s + 1) * B, 0:H] = h[:, 0:H]
                    seq_ref[sb * B:(sb + 1) * B, H:H2] = h[:, H:H2]

            if last:
                mean_ref[...] = acc * (1.0 / T)

    return kernel


def gru_encoder_pallas(tokens, embedding, fused_params, *, hidden_size):
    """tokens: (B, T) int32.  Returns pooled (B, 2H) float32."""
    B, T = tokens.shape
    H = hidden_size
    num_layers = len(fused_params)
    V = embedding.shape[0]

    b_pad = (-B) % 8
    B_pad = B + b_pad
    tok = tokens.astype(jnp.int32)
    if b_pad:
        tok = jnp.pad(tok, ((0, b_pad), (0, 0)))
    # Time-major flattened ids (tiny int32 relayout; all float work is fused).
    tok = tok.T.reshape(T * B_pad, 1)

    flat = [p for layer in fused_params for p in layer]
    pooled = pl.pallas_call(
        _make_encoder_kernel(num_layers, T, B_pad, H, V),
        out_shape=jax.ShapeDtypeStruct((B_pad, 2 * H), jnp.float32),
        in_specs=[_vmem_spec()] * (2 + 4 * num_layers),
        out_specs=_vmem_spec(),
        scratch_shapes=[
            pltpu.VMEM((T * B_pad, 6 * H), jnp.float32),   # input projection
            pltpu.VMEM((T * B_pad, 2 * H), jnp.float32),   # inter-layer sequence
        ],
    )(tok, embedding, *flat)
    return pooled[:B]


# ----------------------------------------------------------------------------
# GRUEncoder module (parameters built deterministically in-script)
# ----------------------------------------------------------------------------
class GRUEncoderPallas:
    def __init__(self, num_classes, num_support_per_class, vocab_size,
                 embed_size, hidden_size, num_layers, key, weights=None):
        self.hidden_size = hidden_size
        self.num_support = num_classes * num_support_per_class
        self.num_layers = num_layers

        H = hidden_size
        keys = jax.random.split(key, 1 + 8 * num_layers)
        kit = iter(keys)

        emb_key = next(kit)
        if weights is not None:
            emb = jnp.asarray(weights, dtype=jnp.float32)
        else:
            emb = jax.random.normal(emb_key, (vocab_size, embed_size), jnp.float32)
        self._emb_raw = emb
        v_pad = (-vocab_size) % 8                  # pad vocab rows; never selected
        self.embedding = jnp.pad(emb, ((0, v_pad), (0, 0))) if v_pad else emb

        bound = 1.0 / math.sqrt(hidden_size)

        def uni(k, shape):
            return jax.random.uniform(k, shape, jnp.float32, -bound, bound)

        def interleave(f, b):
            # (d, 3H) x2 -> (d, 6H) lanes ordered [r_f r_b z_f z_b n_f n_b]
            return jnp.concatenate([f[:, 0:H], b[:, 0:H],
                                    f[:, H:2 * H], b[:, H:2 * H],
                                    f[:, 2 * H:], b[:, 2 * H:]], axis=1)

        def fold(bi, bh):
            # fold b_hh into the r/z biases; n keeps only b_ih here (b_hn
            # stays separate because it is multiplied by r inside the cell).
            return jnp.concatenate([bi[:, :2 * H] + bh[:, :2 * H], bi[:, 2 * H:]],
                                   axis=1)

        self.fused_params = []   # per layer: (wih (D,6H), b (1,6H), whh (2H,6H), bhn (1,2H))
        self.raw_params = []     # per layer, per dir: (wih, whh, bih, bhh) — for the reference
        for layer in range(num_layers):
            d_in = embed_size if layer == 0 else 2 * hidden_size
            dirs = []
            for _ in range(2):   # forward, backward
                wih = uni(next(kit), (d_in, 3 * H))
                whh = uni(next(kit), (H, 3 * H))
                bih = uni(next(kit), (1, 3 * H))
                bhh = uni(next(kit), (1, 3 * H))
                dirs.append((wih, whh, bih, bhh))
            self.raw_params.append(dirs)
            (wih_f, whh_f, bih_f, bhh_f), (wih_b, whh_b, bih_b, bhh_b) = dirs

            wih_cat = interleave(wih_f, wih_b)
            b_cat = interleave(fold(bih_f, bhh_f), fold(bih_b, bhh_b))
            zeros = jnp.zeros_like(whh_f)
            whh_blk = jnp.concatenate([interleave(whh_f, zeros),
                                       interleave(zeros, whh_b)], axis=0)
            bhn_cat = jnp.concatenate([bhh_f[:, 2 * H:], bhh_b[:, 2 * H:]], axis=1)
            self.fused_params.append((wih_cat, b_cat, whh_blk, bhn_cat))

        self._jit_forward = jax.jit(self._forward)

    def _forward(self, tokens):
        pooled = gru_encoder_pallas(tokens, self.embedding, self.fused_params,
                                    hidden_size=self.hidden_size)
        return pooled[:self.num_support], pooled[self.num_support:]

    def __call__(self, tokens):
        return self._jit_forward(tokens)

    def get_output_dim(self):
        return self.hidden_size * 2


# ----------------------------------------------------------------------------
# Pure-JAX reference (textbook bidirectional GRU) for validation
# ----------------------------------------------------------------------------
def _reference_forward(model, tokens):
    hi = jax.lax.Precision.HIGHEST
    H = model.hidden_size
    seq = jnp.take(model._emb_raw, tokens, axis=0)        # (B, T, E)
    for dirs in model.raw_params:
        outs = []
        for d, (wih, whh, bih, bhh) in enumerate(dirs):
            Bn, Tn, _ = seq.shape
            inp = seq if d == 0 else seq[:, ::-1]
            h = jnp.zeros((Bn, H), jnp.float32)
            hs = []
            for t in range(Tn):
                gi = jnp.dot(inp[:, t], wih, precision=hi) + bih
                gh = jnp.dot(h, whh, precision=hi) + bhh
                r = jax.nn.sigmoid(gi[:, :H] + gh[:, :H])
                z = jax.nn.sigmoid(gi[:, H:2 * H] + gh[:, H:2 * H])
                n = jnp.tanh(gi[:, 2 * H:] + r * gh[:, 2 * H:])
                h = (1.0 - z) * n + z * h
                hs.append(h)
            out = jnp.stack(hs, axis=1)
            if d == 1:
                out = out[:, ::-1]
            outs.append(out)
        seq = jnp.concatenate(outs, axis=-1)
    pooled = jnp.mean(seq, axis=1)
    return pooled[:model.num_support], pooled[model.num_support:]


# ----------------------------------------------------------------------------
# Example run
# ----------------------------------------------------------------------------
if __name__ == "__main__":
    num_classes = 3
    num_support_per_class = 2
    vocab_size = 50
    embed_size = 32
    hidden_size = 32
    num_layers = 2
    seq_len = 8
    num_query = 4
    batch = num_classes * num_support_per_class + num_query  # 10

    key = jax.random.PRNGKey(0)
    k_model, k_data = jax.random.split(key)

    model = GRUEncoderPallas(num_classes, num_support_per_class, vocab_size,
                             embed_size, hidden_size, num_layers, k_model)

    x = jax.random.randint(k_data, (batch, seq_len), 0, vocab_size,
                           dtype=jnp.int32)

    support, query = model(x)
    support = jax.block_until_ready(support)
    query = jax.block_until_ready(query)

    assert support.shape == (num_classes * num_support_per_class, 2 * hidden_size)
    assert query.shape == (num_query, 2 * hidden_size)
    assert bool(jnp.all(jnp.isfinite(support)))
    assert bool(jnp.all(jnp.isfinite(query)))

    ref_s, ref_q = _reference_forward(model, x)
    assert bool(jnp.allclose(support, ref_s, atol=5e-3, rtol=5e-3)), \
        float(jnp.max(jnp.abs(support - ref_s)))
    assert bool(jnp.allclose(query, ref_q, atol=5e-3, rtol=5e-3)), \
        float(jnp.max(jnp.abs(query - ref_q)))

    print("KERNEL_OK")
</pallas_src>

<mosaic_0001>
module attributes {stable_mosaic.version = 11 : i64} {
  func.func @kernel(%arg0: memref<128x1xi32, #tpu.memory_space<vmem>>, %arg1: memref<56x32xf32, #tpu.memory_space<vmem>>, %arg2: memref<32x192xf32, #tpu.memory_space<vmem>>, %arg3: memref<1x192xf32, #tpu.memory_space<vmem>>, %arg4: memref<64x192xf32, #tpu.memory_space<vmem>>, %arg5: memref<1x64xf32, #tpu.memory_space<vmem>>, %arg6: memref<64x192xf32, #tpu.memory_space<vmem>>, %arg7: memref<1x192xf32, #tpu.memory_space<vmem>>, %arg8: memref<64x192xf32, #tpu.memory_space<vmem>>, %arg9: memref<1x64xf32, #tpu.memory_space<vmem>>, %arg10: memref<16x64xf32, #tpu.memory_space<vmem>>, %arg11: memref<128x192xf32, #tpu.memory_space<vmem>>, %arg12: memref<128x64xf32, #tpu.memory_space<vmem>>) attributes {dimension_semantics = [], scalar_prefetch = 0 : i64, scratch_operands = 2 : i64, tpu.core_type = #tpu.core_type<tc>} {
    %0 = tpu.iota {dimensions = array<i32: 1>} : vector<16x128xi32>
    %c32_i32 = arith.constant 32 : i32
    %1 = vector.broadcast %c32_i32 : i32 to vector<16x128xi32>
    %2 = arith.cmpi sge, %0, %1 : vector<16x128xi32>
    %c64_i32 = arith.constant 64 : i32
    %3 = vector.broadcast %c64_i32 : i32 to vector<16x128xi32>
    %4 = arith.cmpi slt, %0, %3 : vector<16x128xi32>
    %5 = arith.andi %2, %4 : vector<16x128xi1>
    %c96_i32 = arith.constant 96 : i32
    %6 = vector.broadcast %c96_i32 : i32 to vector<16x128xi32>
    %7 = arith.cmpi sge, %0, %6 : vector<16x128xi32>
    %8 = arith.ori %5, %7 : vector<16x128xi1>
    %9 = tpu.iota {dimensions = array<i32: 1>} : vector<16x64xi32>
    %c32_i32_0 = arith.constant 32 : i32
    %10 = vector.broadcast %c32_i32_0 : i32 to vector<16x64xi32>
    %11 = arith.cmpi sge, %9, %10 : vector<16x64xi32>
    %c0 = arith.constant 0 : index
    %c0_1 = arith.constant 0 : index
    %12 = vector.load %arg0[%c0, %c0_1] : memref<128x1xi32, #tpu.memory_space<vmem>>, vector<128x1xi32>
    %13 = tpu.iota {dimensions = array<i32: 1>} : vector<128x56xi32>
    %14 = vector.broadcast %12 : vector<128x1xi32> to vector<128x56xi32>
    %15 = arith.cmpi eq, %14, %13 : vector<128x56xi32>
    %16 = arith.extui %15 : vector<128x56xi1> to vector<128x56xi32>
    %17 = arith.sitofp %16 : vector<128x56xi32> to vector<128x56xf32>
    %c0_2 = arith.constant 0 : index
    %c0_3 = arith.constant 0 : index
    %18 = vector.load %arg1[%c0_2, %c0_3] : memref<56x32xf32, #tpu.memory_space<vmem>>, vector<56x32xf32>
    %cst = arith.constant dense<0.000000e+00> : vector<128x32xf32>
    %19 = tpu.matmul %17, %18, %cst {dimension_numbers = #tpu.dot_dimension_numbers<[1], [0], [0], [1], [0, 0, 1, 1], [], []>} : vector<128x56xf32>, vector<56x32xf32>, vector<128x32xf32> -> vector<128x32xf32>
    %c0_4 = arith.constant 0 : index
    %c0_5 = arith.constant 0 : index
    %20 = vector.load %arg2[%c0_4, %c0_5] : memref<32x192xf32, #tpu.memory_space<vmem>>, vector<32x192xf32>
    %cst_6 = arith.constant dense<0.000000e+00> : vector<128x192xf32>
    %21 = tpu.matmul %19, %20, %cst_6 {dimension_numbers = #tpu.dot_dimension_numbers<[1], [0], [0], [1], [0, 0, 1, 1], [], []>} : vector<128x32xf32>, vector<32x192xf32>, vector<128x192xf32> -> vector<128x192xf32>
    %c0_7 = arith.constant 0 : index
    %c0_8 = arith.constant 0 : index
    %22 = vector.load %arg3[%c0_7, %c0_8] : memref<1x192xf32, #tpu.memory_space<vmem>>, vector<1x192xf32>
    %23 = vector.broadcast %22 : vector<1x192xf32> to vector<128x192xf32>
    %24 = arith.addf %21, %23 : vector<128x192xf32>
    %c0_9 = arith.constant 0 : index
    %c0_10 = arith.constant 0 : index
    %25 = vector.load %arg11[%c0_9, %c0_10] : memref<128x192xf32, #tpu.memory_space<vmem>>, vector<128x192xf32>
    tpu.vector_store %arg11[%c0_9, %c0_10], %24 {strides = array<i32>} : memref<128x192xf32, #tpu.memory_space<vmem>>, vector<128x192xf32>,
    %c0_11 = arith.constant 0 : index
    %c0_12 = arith.constant 0 : index
    %26 = vector.load %arg4[%c0_11, %c0_12] : memref<64x192xf32, #tpu.memory_space<vmem>>, vector<64x192xf32>
    %c0_13 = arith.constant 0 : index
    %c0_14 = arith.constant 0 : index
    %27 = vector.load %arg5[%c0_13, %c0_14] : memref<1x64xf32, #tpu.memory_space<vmem>>, vector<1x64xf32>
    %28 = vector.shape_cast %27 : vector<1x64xf32> to vector<1x64xf32>
    %29 = vector.broadcast %28 : vector<1x64xf32> to vector<16x64xf32>
    %cst_15 = arith.constant 0.000000e+00 : f32
    %30 = vector.broadcast %cst_15 : f32 to vector<16x64xf32>
    %c0_16 = arith.constant 0 : index
    %c0_17 = arith.constant 0 : index
    %31 = vector.load %arg11[%c0_16, %c0_17] : memref<128x192xf32, #tpu.memory_space<vmem>>, vector<16x192xf32>
    %c112 = arith.constant 112 : index
    %c0_18 = arith.constant 0 : index
    %32 = vector.load %arg11[%c112, %c0_18] : memref<128x192xf32, #tpu.memory_space<vmem>>, vector<16x192xf32>
    %33 = vector.extract_strided_slice %32 {offsets = [0, 0], sizes = [16, 128], strides = [1, 1]} : vector<16x192xf32> to vector<16x128xf32>
    %34 = vector.extract_strided_slice %31 {offsets = [0, 0], sizes = [16, 128], strides = [1, 1]} : vector<16x192xf32> to vector<16x128xf32>
    %35 = arith.select %8, %33, %34 : vector<16x128xi1>, vector<16x128xf32>
    %36 = vector.extract_strided_slice %32 {offsets = [0, 128], sizes = [16, 64], strides = [1, 1]} : vector<16x192xf32> to vector<16x64xf32>
    %37 = vector.extract_strided_slice %31 {offsets = [0, 128], sizes = [16, 64], strides = [1, 1]} : vector<16x192xf32> to vector<16x64xf32>
    %38 = arith.select %11, %36, %37 : vector<16x64xi1>, vector<16x64xf32>
    %cst_19 = arith.constant dense<0.000000e+00> : vector<16x192xf32>
    %39 = tpu.matmul %30, %26, %cst_19 {dimension_numbers = #tpu.dot_dimension_numbers<[1], [0], [0], [1], [0, 0, 1, 1], [], []>} : vector<16x64xf32>, vector<64x192xf32>, vector<16x192xf32> -> vector<16x192xf32>
    %40 = vector.extract_strided_slice %39 {offsets = [0, 0], sizes = [16, 128], strides = [1, 1]} : vector<16x192xf32> to vector<16x128xf32>
    %41 = arith.addf %35, %40 : vector<16x128xf32>
    %42 = arith.negf %41 : vector<16x128xf32>
    %43 = math.exp %42 : vector<16x128xf32>
    %cst_20 = arith.constant 1.000000e+00 : f32
    %44 = vector.broadcast %cst_20 : f32 to vector<16x128xf32>
    %45 = arith.addf %44, %43 : vector<16x128xf32>
    %46 = arith.divf %44, %45 : vector<16x128xf32>
    %47 = vector.extract_strided_slice %46 {offsets = [0, 0], sizes = [16, 64], strides = [1, 1]} : vector<16x128xf32> to vector<16x64xf32>
    %48 = vector.extract_strided_slice %46 {offsets = [0, 64], sizes = [16, 64], strides = [1, 1]} : vector<16x128xf32> to vector<16x64xf32>
    %49 = vector.extract_strided_slice %39 {offsets = [0, 128], sizes = [16, 64], strides = [1, 1]} : vector<16x192xf32> to vector<16x64xf32>
    %50 = arith.addf %49, %29 : vector<16x64xf32>
    %51 = arith.mulf %47, %50 : vector<16x64xf32>
    %52 = arith.addf %38, %51 : vector<16x64xf32>
    %53 = math.tanh %52 : vector<16x64xf32>
    %cst_21 = arith.constant 1.000000e+00 : f32
    %54 = vector.broadcast %cst_21 : f32 to vector<16x64xf32>
    %55 = arith.subf %54, %48 : vector<16x64xf32>
    %56 = arith.mulf %55, %53 : vector<16x64xf32>
    %57 = arith.mulf %48, %30 : vector<16x64xf32>
    %58 = arith.addf %56, %57 : vector<16x64xf32>
    %59 = vector.extract_strided_slice %58 {offsets = [0, 0], sizes = [16, 32], strides = [1, 1]} : vector<16x64xf32> to vector<16x32xf32>
    %c0_22 = arith.constant 0 : index
    %c0_23 = arith.constant 0 : index
    %60 = vector.load %arg12[%c0_22, %c0_23] : memref<128x64xf32, #tpu.memory_space<vmem>>, vector<16x32xf32>
    tpu.vector_store %arg12[%c0_22, %c0_23], %59 {strides = array<i32>} : memref<128x64xf32, #tpu.memory_space<vmem>>, vector<16x32xf32>,
    %61 = vector.extract_strided_slice %58 {offsets = [0, 32], sizes = [16, 32], strides = [1, 1]} : vector<16x64xf32> to vector<16x32xf32>
    %c112_24 = arith.constant 112 : index
    %c32 = arith.constant 32 : index
    %62 = vector.load %arg12[%c112_24, %c32] : memref<128x64xf32, #tpu.memory_space<vmem>>, vector<16x32xf32>
    tpu.vector_store %arg12[%c112_24, %c32], %61 {strides = array<i32>} : memref<128x64xf32, #tpu.memory_space<vmem>>, vector<16x32xf32>,
    %c16 = arith.constant 16 : index
    %c0_25 = arith.constant 0 : index
    %63 = vector.load %arg11[%c16, %c0_25] : memref<128x192xf32, #tpu.memory_space<vmem>>, vector<16x192xf32>
    %c96 = arith.constant 96 : index
    %c0_26 = arith.constant 0 : index
    %64 = vector.load %arg11[%c96, %c0_26] : memref<128x192xf32, #tpu.memory_space<vmem>>, vector<16x192xf32>
    %65 = vector.extract_strided_slice %64 {offsets = [0, 0], sizes = [16, 128], strides = [1, 1]} : vector<16x192xf32> to vector<16x128xf32>
    %66 = vector.extract_strided_slice %63 {offsets = [0, 0], sizes = [16, 128], strides = [1, 1]} : vector<16x192xf32> to vector<16x128xf32>
    %67 = arith.select %8, %65, %66 : vector<16x128xi1>, vector<16x128xf32>
    %68 = vector.extract_strided_slice %64 {offsets = [0, 128], sizes = [16, 64], strides = [1, 1]} : vector<16x192xf32> to vector<16x64xf32>
    %69 = vector.extract_strided_slice %63 {offsets = [0, 128], sizes = [16, 64], strides = [1, 1]} : vector<16x192xf32> to vector<16x64xf32>
    %70 = arith.select %11, %68, %69 : vector<16x64xi1>, vector<16x64xf32>
    %cst_27 = arith.constant dense<0.000000e+00> : vector<16x192xf32>
    %71 = tpu.matmul %58, %26, %cst_27 {dimension_numbers = #tpu.dot_dimension_numbers<[1], [0], [0], [1], [0, 0, 1, 1], [], []>} : vector<16x64xf32>, vector<64x192xf32>, vector<16x192xf32> -> vector<16x192xf32>
    %72 = vector.extract_strided_slice %71 {offsets = [0, 0], sizes = [16, 128], strides = [1, 1]} : vector<16x192xf32> to vector<16x128xf32>
    %73 = arith.addf %67, %72 : vector<16x128xf32>
    %74 = arith.negf %73 : vector<16x128xf32>
    %75 = math.exp %74 : vector<16x128xf32>
    %cst_28 = arith.constant 1.000000e+00 : f32
    %76 = vector.broadcast %cst_28 : f32 to vector<16x128xf32>
    %77 = arith.addf %76, %75 : vector<16x128xf32>
    %78 = arith.divf %76, %77 : vector<16x128xf32>
    %79 = vector.extract_strided_slice %78 {offsets = [0, 0], sizes = [16, 64], strides = [1, 1]} : vector<16x128xf32> to vector<16x64xf32>
    %80 = vector.extract_strided_slice %78 {offsets = [0, 64], sizes = [16, 64], strides = [1, 1]} : vector<16x128xf32> to vector<16x64xf32>
    %81 = vector.extract_strided_slice %71 {offsets = [0, 128], sizes = [16, 64], strides = [1, 1]} : vector<16x192xf32> to vector<16x64xf32>
    %82 = arith.addf %81, %29 : vector<16x64xf32>
    %83 = arith.mulf %79, %82 : vector<16x64xf32>
    %84 = arith.addf %70, %83 : vector<16x64xf32>
    %85 = math.tanh %84 : vector<16x64xf32>
    %cst_29 = arith.constant 1.000000e+00 : f32
    %86 = vector.broadcast %cst_29 : f32 to vector<16x64xf32>
    %87 = arith.subf %86, %80 : vector<16x64xf32>
    %88 = arith.mulf %87, %85 : vector<16x64xf32>
    %89 = arith.mulf %80, %58 : vector<16x64xf32>
    %90 = arith.addf %88, %89 : vector<16x64xf32>
    %91 = vector.extract_strided_slice %90 {offsets = [0, 0], sizes = [16, 32], strides = [1, 1]} : vector<16x64xf32> to vector<16x32xf32>
    %c16_30 = arith.constant 16 : index
    %c0_31 = arith.constant 0 : index
    %92 = vector.load %arg12[%c16_30, %c0_31] : memref<128x64xf32, #tpu.memory_space<vmem>>, vector<16x32xf32>
    tpu.vector_store %arg12[%c16_30, %c0_31], %91 {strides = array<i32>} : memref<128x64xf32, #tpu.memory_space<vmem>>, vector<16x32xf32>,
    %93 = vector.extract_strided_slice %90 {offsets = [0, 32], sizes = [16, 32], strides = [1, 1]} : vector<16x64xf32> to vector<16x32xf32>
    %c96_32 = arith.constant 96 : index
    %c32_33 = arith.constant 32 : index
    %94 = vector.load %arg12[%c96_32, %c32_33] : memref<128x64xf32, #tpu.memory_space<vmem>>, vector<16x32xf32>
    tpu.vector_store %arg12[%c96_32, %c32_33], %93 {strides = array<i32>} : memref<128x64xf32, #tpu.memory_space<vmem>>, vector<16x32xf32>,
    %c32_34 = arith.constant 32 : index
    %c0_35 = arith.constant 0 : index
    %95 = vector.load %arg11[%c32_34, %c0_35] : memref<128x192xf32, #tpu.memory_space<vmem>>, vector<16x192xf32>
    %c80 = arith.constant 80 : index
    %c0_36 = arith.constant 0 : index
    %96 = vector.load %arg11[%c80, %c0_36] : memref<128x192xf32, #tpu.memory_space<vmem>>, vector<16x192xf32>
    %97 = vector.extract_strided_slice %96 {offsets = [0, 0], sizes = [16, 128], strides = [1, 1]} : vector<16x192xf32> to vector<16x128xf32>
    %98 = vector.extract_strided_slice %95 {offsets = [0, 0], sizes = [16, 128], strides = [1, 1]} : vector<16x192xf32> to vector<16x128xf32>
    %99 = arith.select %8, %97, %98 : vector<16x128xi1>, vector<16x128xf32>
    %100 = vector.extract_strided_slice %96 {offsets = [0, 128], sizes = [16, 64], strides = [1, 1]} : vector<16x192xf32> to vector<16x64xf32>
    %101 = vector.extract_strided_slice %95 {offsets = [0, 128], sizes = [16, 64], strides = [1, 1]} : vector<16x192xf32> to vector<16x64xf32>
    %102 = arith.select %11, %100, %101 : vector<16x64xi1>, vector<16x64xf32>
    %cst_37 = arith.constant dense<0.000000e+00> : vector<16x192xf32>
    %103 = tpu.matmul %90, %26, %cst_37 {dimension_numbers = #tpu.dot_dimension_numbers<[1], [0], [0], [1], [0, 0, 1, 1], [], []>} : vector<16x64xf32>, vector<64x192xf32>, vector<16x192xf32> -> vector<16x192xf32>
    %104 = vector.extract_strided_slice %103 {offsets = [0, 0], sizes = [16, 128], strides = [1, 1]} : vector<16x192xf32> to vector<16x128xf32>
    %105 = arith.addf %99, %104 : vector<16x128xf32>
    %106 = arith.negf %105 : vector<16x128xf32>
    %107 = math.exp %106 : vector<16x128xf32>
    %cst_38 = arith.constant 1.000000e+00 : f32
    %108 = vector.broadcast %cst_38 : f32 to vector<16x128xf32>
    %109 = arith.addf %108, %107 : vector<16x128xf32>
    %110 = arith.divf %108, %109 : vector<16x128xf32>
    %111 = vector.extract_strided_slice %110 {offsets = [0, 0], sizes = [16, 64], strides = [1, 1]} : vector<16x128xf32> to vector<16x64xf32>
    %112 = vector.extract_strided_slice %110 {offsets = [0, 64], sizes = [16, 64], strides = [1, 1]} : vector<16x128xf32> to vector<16x64xf32>
    %113 = vector.extract_strided_slice %103 {offsets = [0, 128], sizes = [16, 64], strides = [1, 1]} : vector<16x192xf32> to vector<16x64xf32>
    %114 = arith.addf %113, %29 : vector<16x64xf32>
    %115 = arith.mulf %111, %114 : vector<16x64xf32>
    %116 = arith.addf %102, %115 : vector<16x64xf32>
    %117 = math.tanh %116 : vector<16x64xf32>
    %cst_39 = arith.constant 1.000000e+00 : f32
    %118 = vector.broadcast %cst_39 : f32 to vector<16x64xf32>
    %119 = arith.subf %118, %112 : vector<16x64xf32>
    %120 = arith.mulf %119, %117 : vector<16x64xf32>
    %121 = arith.mulf %112, %90 : vector<16x64xf32>
    %122 = arith.addf %120, %121 : vector<16x64xf32>
    %123 = vector.extract_strided_slice %122 {offsets = [0, 0], sizes = [16, 32], strides = [1, 1]} : vector<16x64xf32> to vector<16x32xf32>
    %c32_40 = arith.constant 32 : index
    %c0_41 = arith.constant 0 : index
    %124 = vector.load %arg12[%c32_40, %c0_41] : memref<128x64xf32, #tpu.memory_space<vmem>>, vector<16x32xf32>
    tpu.vector_store %arg12[%c32_40, %c0_41], %123 {strides = array<i32>} : memref<128x64xf32, #tpu.memory_space<vmem>>, vector<16x32xf32>,
    %125 = vector.extract_strided_slice %122 {offsets = [0, 32], sizes = [16, 32], strides = [1, 1]} : vector<16x64xf32> to vector<16x32xf32>
    %c80_42 = arith.constant 80 : index
    %c32_43 = arith.constant 32 : index
    %126 = vector.load %arg12[%c80_42, %c32_43] : memref<128x64xf32, #tpu.memory_space<vmem>>, vector<16x32xf32>
    tpu.vector_store %arg12[%c80_42, %c32_43], %125 {strides = array<i32>} : memref<128x64xf32, #tpu.memory_space<vmem>>, vector<16x32xf32>,
    %c48 = arith.constant 48 : index
    %c0_44 = arith.constant 0 : index
    %127 = vector.load %arg11[%c48, %c0_44] : memref<128x192xf32, #tpu.memory_space<vmem>>, vector<16x192xf32>
    %c64 = arith.constant 64 : index
    %c0_45 = arith.constant 0 : index
    %128 = vector.load %arg11[%c64, %c0_45] : memref<128x192xf32, #tpu.memory_space<vmem>>, vector<16x192xf32>
    %129 = vector.extract_strided_slice %128 {offsets = [0, 0], sizes = [16, 128], strides = [1, 1]} : vector<16x192xf32> to vector<16x128xf32>
    %130 = vector.extract_strided_slice %127 {offsets = [0, 0], sizes = [16, 128], strides = [1, 1]} : vector<16x192xf32> to vector<16x128xf32>
    %131 = arith.select %8, %129, %130 : vector<16x128xi1>, vector<16x128xf32>
    %132 = vector.extract_strided_slice %128 {offsets = [0, 128], sizes = [16, 64], strides = [1, 1]} : vector<16x192xf32> to vector<16x64xf32>
    %133 = vector.extract_strided_slice %127 {offsets = [0, 128], sizes = [16, 64], strides = [1, 1]} : vector<16x192xf32> to vector<16x64xf32>
    %134 = arith.select %11, %132, %133 : vector<16x64xi1>, vector<16x64xf32>
    %cst_46 = arith.constant dense<0.000000e+00> : vector<16x192xf32>
    %135 = tpu.matmul %122, %26, %cst_46 {dimension_numbers = #tpu.dot_dimension_numbers<[1], [0], [0], [1], [0, 0, 1, 1], [], []>} : vector<16x64xf32>, vector<64x192xf32>, vector<16x192xf32> -> vector<16x192xf32>
    %136 = vector.extract_strided_slice %135 {offsets = [0, 0], sizes = [16, 128], strides = [1, 1]} : vector<16x192xf32> to vector<16x128xf32>
    %137 = arith.addf %131, %136 : vector<16x128xf32>
    %138 = arith.negf %137 : vector<16x128xf32>
    %139 = math.exp %138 : vector<16x128xf32>
    %cst_47 = arith.constant 1.000000e+00 : f32
    %140 = vector.broadcast %cst_47 : f32 to vector<16x128xf32>
    %141 = arith.addf %140, %139 : vector<16x128xf32>
    %142 = arith.divf %140, %141 : vector<16x128xf32>
    %143 = vector.extract_strided_slice %142 {offsets = [0, 0], sizes = [16, 64], strides = [1, 1]} : vector<16x128xf32> to vector<16x64xf32>
    %144 = vector.extract_strided_slice %142 {offsets = [0, 64], sizes = [16, 64], strides = [1, 1]} : vector<16x128xf32> to vector<16x64xf32>
    %145 = vector.extract_strided_slice %135 {offsets = [0, 128], sizes = [16, 64], strides = [1, 1]} : vector<16x192xf32> to vector<16x64xf32>
    %146 = arith.addf %145, %29 : vector<16x64xf32>
    %147 = arith.mulf %143, %146 : vector<16x64xf32>
    %148 = arith.addf %134, %147 : vector<16x64xf32>
    %149 = math.tanh %148 : vector<16x64xf32>
    %cst_48 = arith.constant 1.000000e+00 : f32
    %150 = vector.broadcast %cst_48 : f32 to vector<16x64xf32>
    %151 = arith.subf %150, %144 : vector<16x64xf32>
    %152 = arith.mulf %151, %149 : vector<16x64xf32>
    %153 = arith.mulf %144, %122 : vector<16x64xf32>
    %154 = arith.addf %152, %153 : vector<16x64xf32>
    %155 = vector.extract_strided_slice %154 {offsets = [0, 0], sizes = [16, 32], strides = [1, 1]} : vector<16x64xf32> to vector<16x32xf32>
    %c48_49 = arith.constant 48 : index
    %c0_50 = arith.constant 0 : index
    %156 = vector.load %arg12[%c48_49, %c0_50] : memref<128x64xf32, #tpu.memory_space<vmem>>, vector<16x32xf32>
    tpu.vector_store %arg12[%c48_49, %c0_50], %155 {strides = array<i32>} : memref<128x64xf32, #tpu.memory_space<vmem>>, vector<16x32xf32>,
    %157 = vector.extract_strided_slice %154 {offsets = [0, 32], sizes = [16, 32], strides = [1, 1]} : vector<16x64xf32> to vector<16x32xf32>
    %c64_51 = arith.constant 64 : index
    %c32_52 = arith.constant 32 : index
    %158 = vector.load %arg12[%c64_51, %c32_52] : memref<128x64xf32, #tpu.memory_space<vmem>>, vector<16x32xf32>
    tpu.vector_store %arg12[%c64_51, %c32_52], %157 {strides = array<i32>} : memref<128x64xf32, #tpu.memory_space<vmem>>, vector<16x32xf32>,
    %c64_53 = arith.constant 64 : index
    %c0_54 = arith.constant 0 : index
    %159 = vector.load %arg11[%c64_53, %c0_54] : memref<128x192xf32, #tpu.memory_space<vmem>>, vector<16x192xf32>
    %c48_55 = arith.constant 48 : index
    %c0_56 = arith.constant 0 : index
    %160 = vector.load %arg11[%c48_55, %c0_56] : memref<128x192xf32, #tpu.memory_space<vmem>>, vector<16x192xf32>
    %161 = vector.extract_strided_slice %160 {offsets = [0, 0], sizes = [16, 128], strides = [1, 1]} : vector<16x192xf32> to vector<16x128xf32>
    %162 = vector.extract_strided_slice %159 {offsets = [0, 0], sizes = [16, 128], strides = [1, 1]} : vector<16x192xf32> to vector<16x128xf32>
    %163 = arith.select %8, %161, %162 : vector<16x128xi1>, vector<16x128xf32>
    %164 = vector.extract_strided_slice %160 {offsets = [0, 128], sizes = [16, 64], strides = [1, 1]} : vector<16x192xf32> to vector<16x64xf32>
    %165 = vector.extract_strided_slice %159 {offsets = [0, 128], sizes = [16, 64], strides = [1, 1]} : vector<16x192xf32> to vector<16x64xf32>
    %166 = arith.select %11, %164, %165 : vector<16x64xi1>, vector<16x64xf32>
    %cst_57 = arith.constant dense<0.000000e+00> : vector<16x192xf32>
    %167 = tpu.matmul %154, %26, %cst_57 {dimension_numbers = #tpu.dot_dimension_numbers<[1], [0], [0], [1], [0, 0, 1, 1], [], []>} : vector<16x64xf32>, vector<64x192xf32>, vector<16x192xf32> -> vector<16x192xf32>
    %168 = vector.extract_strided_slice %167 {offsets = [0, 0], sizes = [16, 128], strides = [1, 1]} : vector<16x192xf32> to vector<16x128xf32>
    %169 = arith.addf %163, %168 : vector<16x128xf32>
    %170 = arith.negf %169 : vector<16x128xf32>
    %171 = math.exp %170 : vector<16x128xf32>
    %cst_58 = arith.constant 1.000000e+00 : f32
    %172 = vector.broadcast %cst_58 : f32 to vector<16x128xf32>
    %173 = arith.addf %172, %171 : vector<16x128xf32>
    %174 = arith.divf %172, %173 : vector<16x128xf32>
    %175 = vector.extract_strided_slice %174 {offsets = [0, 0], sizes = [16, 64], strides = [1, 1]} : vector<16x128xf32> to vector<16x64xf32>
    %176 = vector.extract_strided_slice %174 {offsets = [0, 64], sizes = [16, 64], strides = [1, 1]} : vector<16x128xf32> to vector<16x64xf32>
    %177 = vector.extract_strided_slice %167 {offsets = [0, 128], sizes = [16, 64], strides = [1, 1]} : vector<16x192xf32> to vector<16x64xf32>
    %178 = arith.addf %177, %29 : vector<16x64xf32>
    %179 = arith.mulf %175, %178 : vector<16x64xf32>
    %180 = arith.addf %166, %179 : vector<16x64xf32>
    %181 = math.tanh %180 : vector<16x64xf32>
    %cst_59 = arith.constant 1.000000e+00 : f32
    %182 = vector.broadcast %cst_59 : f32 to vector<16x64xf32>
    %183 = arith.subf %182, %176 : vector<16x64xf32>
    %184 = arith.mulf %183, %181 : vector<16x64xf32>
    %185 = arith.mulf %176, %154 : vector<16x64xf32>
    %186 = arith.addf %184, %185 : vector<16x64xf32>
    %187 = vector.extract_strided_slice %186 {offsets = [0, 0], sizes = [16, 32], strides = [1, 1]} : vector<16x64xf32> to vector<16x32xf32>
    %c64_60 = arith.constant 64 : index
    %c0_61 = arith.constant 0 : index
    %188 = vector.load %arg12[%c64_60, %c0_61] : memref<128x64xf32, #tpu.memory_space<vmem>>, vector<16x32xf32>
    tpu.vector_store %arg12[%c64_60, %c0_61], %187 {strides = array<i32>} : memref<128x64xf32, #tpu.memory_space<vmem>>, vector<16x32xf32>,
    %189 = vector.extract_strided_slice %186 {offsets = [0, 32], sizes = [16, 32], strides = [1, 1]} : vector<16x64xf32> to vector<16x32xf32>
    %c48_62 = arith.constant 48 : index
    %c32_63 = arith.constant 32 : index
    %190 = vector.load %arg12[%c48_62, %c32_63] : memref<128x64xf32, #tpu.memory_space<vmem>>, vector<16x32xf32>
    tpu.vector_store %arg12[%c48_62, %c32_63], %189 {strides = array<i32>} : memref<128x64xf32, #tpu.memory_space<vmem>>, vector<16x32xf32>,
    %c80_64 = arith.constant 80 : index
    %c0_65 = arith.constant 0 : index
    %191 = vector.load %arg11[%c80_64, %c0_65] : memref<128x192xf32, #tpu.memory_space<vmem>>, vector<16x192xf32>
    %c32_66 = arith.constant 32 : index
    %c0_67 = arith.constant 0 : index
    %192 = vector.load %arg11[%c32_66, %c0_67] : memref<128x192xf32, #tpu.memory_space<vmem>>, vector<16x192xf32>
    %193 = vector.extract_strided_slice %192 {offsets = [0, 0], sizes = [16, 128], strides = [1, 1]} : vector<16x192xf32> to vector<16x128xf32>
    %194 = vector.extract_strided_slice %191 {offsets = [0, 0], sizes = [16, 128], strides = [1, 1]} : vector<16x192xf32> to vector<16x128xf32>
    %195 = arith.select %8, %193, %194 : vector<16x128xi1>, vector<16x128xf32>
    %196 = vector.extract_strided_slice %192 {offsets = [0, 128], sizes = [16, 64], strides = [1, 1]} : vector<16x192xf32> to vector<16x64xf32>
    %197 = vector.extract_strided_slice %191 {offsets = [0, 128], sizes = [16, 64], strides = [1, 1]} : vector<16x192xf32> to vector<16x64xf32>
    %198 = arith.select %11, %196, %197 : vector<16x64xi1>, vector<16x64xf32>
    %cst_68 = arith.constant dense<0.000000e+00> : vector<16x192xf32>
    %199 = tpu.matmul %186, %26, %cst_68 {dimension_numbers = #tpu.dot_dimension_numbers<[1], [0], [0], [1], [0, 0, 1, 1], [], []>} : vector<16x64xf32>, vector<64x192xf32>, vector<16x192xf32> -> vector<16x192xf32>
    %200 = vector.extract_strided_slice %199 {offsets = [0, 0], sizes = [16, 128], strides = [1, 1]} : vector<16x192xf32> to vector<16x128xf32>
    %201 = arith.addf %195, %200 : vector<16x128xf32>
    %202 = arith.negf %201 : vector<16x128xf32>
    %203 = math.exp %202 : vector<16x128xf32>
    %cst_69 = arith.constant 1.000000e+00 : f32
    %204 = vector.broadcast %cst_69 : f32 to vector<16x128xf32>
    %205 = arith.addf %204, %203 : vector<16x128xf32>
    %206 = arith.divf %204, %205 : vector<16x128xf32>
    %207 = vector.extract_strided_slice %206 {offsets = [0, 0], sizes = [16, 64], strides = [1, 1]} : vector<16x128xf32> to vector<16x64xf32>
    %208 = vector.extract_strided_slice %206 {offsets = [0, 64], sizes = [16, 64], strides = [1, 1]} : vector<16x128xf32> to vector<16x64xf32>
    %209 = vector.extract_strided_slice %199 {offsets = [0, 128], sizes = [16, 64], strides = [1, 1]} : vector<16x192xf32> to vector<16x64xf32>
    %210 = arith.addf %209, %29 : vector<16x64xf32>
    %211 = arith.mulf %207, %210 : vector<16x64xf32>
    %212 = arith.addf %198, %211 : vector<16x64xf32>
    %213 = math.tanh %212 : vector<16x64xf32>
    %cst_70 = arith.constant 1.000000e+00 : f32
    %214 = vector.broadcast %cst_70 : f32 to vector<16x64xf32>
    %215 = arith.subf %214, %208 : vector<16x64xf32>
    %216 = arith.mulf %215, %213 : vector<16x64xf32>
    %217 = arith.mulf %208, %186 : vector<16x64xf32>
    %218 = arith.addf %216, %217 : vector<16x64xf32>
    %219 = vector.extract_strided_slice %218 {offsets = [0, 0], sizes = [16, 32], strides = [1, 1]} : vector<16x64xf32> to vector<16x32xf32>
    %c80_71 = arith.constant 80 : index
    %c0_72 = arith.constant 0 : index
    %220 = vector.load %arg12[%c80_71, %c0_72] : memref<128x64xf32, #tpu.memory_space<vmem>>, vector<16x32xf32>
    tpu.vector_store %arg12[%c80_71, %c0_72], %219 {strides = array<i32>} : memref<128x64xf32, #tpu.memory_space<vmem>>, vector<16x32xf32>,
    %221 = vector.extract_strided_slice %218 {offsets = [0, 32], sizes = [16, 32], strides = [1, 1]} : vector<16x64xf32> to vector<16x32xf32>
    %c32_73 = arith.constant 32 : index
    %c32_74 = arith.constant 32 : index
    %222 = vector.load %arg12[%c32_73, %c32_74] : memref<128x64xf32, #tpu.memory_space<vmem>>, vector<16x32xf32>
    tpu.vector_store %arg12[%c32_73, %c32_74], %221 {strides = array<i32>} : memref<128x64xf32, #tpu.memory_space<vmem>>, vector<16x32xf32>,
    %c96_75 = arith.constant 96 : index
    %c0_76 = arith.constant 0 : index
    %223 = vector.load %arg11[%c96_75, %c0_76] : memref<128x192xf32, #tpu.memory_space<vmem>>, vector<16x192xf32>
    %c16_77 = arith.constant 16 : index
    %c0_78 = arith.constant 0 : index
    %224 = vector.load %arg11[%c16_77, %c0_78] : memref<128x192xf32, #tpu.memory_space<vmem>>, vector<16x192xf32>
    %225 = vector.extract_strided_slice %224 {offsets = [0, 0], sizes = [16, 128], strides = [1, 1]} : vector<16x192xf32> to vector<16x128xf32>
    %226 = vector.extract_strided_slice %223 {offsets = [0, 0], sizes = [16, 128], strides = [1, 1]} : vector<16x192xf32> to vector<16x128xf32>
    %227 = arith.select %8, %225, %226 : vector<16x128xi1>, vector<16x128xf32>
    %228 = vector.extract_strided_slice %224 {offsets = [0, 128], sizes = [16, 64], strides = [1, 1]} : vector<16x192xf32> to vector<16x64xf32>
    %229 = vector.extract_strided_slice %223 {offsets = [0, 128], sizes = [16, 64], strides = [1, 1]} : vector<16x192xf32> to vector<16x64xf32>
    %230 = arith.select %11, %228, %229 : vector<16x64xi1>, vector<16x64xf32>
    %cst_79 = arith.constant dense<0.000000e+00> : vector<16x192xf32>
    %231 = tpu.matmul %218, %26, %cst_79 {dimension_numbers = #tpu.dot_dimension_numbers<[1], [0], [0], [1], [0, 0, 1, 1], [], []>} : vector<16x64xf32>, vector<64x192xf32>, vector<16x192xf32> -> vector<16x192xf32>
    %232 = vector.extract_strided_slice %231 {offsets = [0, 0], sizes = [16, 128], strides = [1, 1]} : vector<16x192xf32> to vector<16x128xf32>
    %233 = arith.addf %227, %232 : vector<16x128xf32>
    %234 = arith.negf %233 : vector<16x128xf32>
    %235 = math.exp %234 : vector<16x128xf32>
    %cst_80 = arith.constant 1.000000e+00 : f32
    %236 = vector.broadcast %cst_80 : f32 to vector<16x128xf32>
    %237 = arith.addf %236, %235 : vector<16x128xf32>
    %238 = arith.divf %236, %237 : vector<16x128xf32>
    %239 = vector.extract_strided_slice %238 {offsets = [0, 0], sizes = [16, 64], strides = [1, 1]} : vector<16x128xf32> to vector<16x64xf32>
    %240 = vector.extract_strided_slice %238 {offsets = [0, 64], sizes = [16, 64], strides = [1, 1]} : vector<16x128xf32> to vector<16x64xf32>
    %241 = vector.extract_strided_slice %231 {offsets = [0, 128], sizes = [16, 64], strides = [1, 1]} : vector<16x192xf32> to vector<16x64xf32>
    %242 = arith.addf %241, %29 : vector<16x64xf32>
    %243 = arith.mulf %239, %242 : vector<16x64xf32>
    %244 = arith.addf %230, %243 : vector<16x64xf32>
    %245 = math.tanh %244 : vector<16x64xf32>
    %cst_81 = arith.constant 1.000000e+00 : f32
    %246 = vector.broadcast %cst_81 : f32 to vector<16x64xf32>
    %247 = arith.subf %246, %240 : vector<16x64xf32>
    %248 = arith.mulf %247, %245 : vector<16x64xf32>
    %249 = arith.mulf %240, %218 : vector<16x64xf32>
    %250 = arith.addf %248, %249 : vector<16x64xf32>
    %251 = vector.extract_strided_slice %250 {offsets = [0, 0], sizes = [16, 32], strides = [1, 1]} : vector<16x64xf32> to vector<16x32xf32>
    %c96_82 = arith.constant 96 : index
    %c0_83 = arith.constant 0 : index
    %252 = vector.load %arg12[%c96_82, %c0_83] : memref<128x64xf32, #tpu.memory_space<vmem>>, vector<16x32xf32>
    tpu.vector_store %arg12[%c96_82, %c0_83], %251 {strides = array<i32>} : memref<128x64xf32, #tpu.memory_space<vmem>>, vector<16x32xf32>,
    %253 = vector.extract_strided_slice %250 {offsets = [0, 32], sizes = [16, 32], strides = [1, 1]} : vector<16x64xf32> to vector<16x32xf32>
    %c16_84 = arith.constant 16 : index
    %c32_85 = arith.constant 32 : index
    %254 = vector.load %arg12[%c16_84, %c32_85] : memref<128x64xf32, #tpu.memory_space<vmem>>, vector<16x32xf32>
    tpu.vector_store %arg12[%c16_84, %c32_85], %253 {strides = array<i32>} : memref<128x64xf32, #tpu.memory_space<vmem>>, vector<16x32xf32>,
    %c112_86 = arith.constant 112 : index
    %c0_87 = arith.constant 0 : index
    %255 = vector.load %arg11[%c112_86, %c0_87] : memref<128x192xf32, #tpu.memory_space<vmem>>, vector<16x192xf32>
    %c0_88 = arith.constant 0 : index
    %c0_89 = arith.constant 0 : index
    %256 = vector.load %arg11[%c0_88, %c0_89] : memref<128x192xf32, #tpu.memory_space<vmem>>, vector<16x192xf32>
    %257 = vector.extract_strided_slice %256 {offsets = [0, 0], sizes = [16, 128], strides = [1, 1]} : vector<16x192xf32> to vector<16x128xf32>
    %258 = vector.extract_strided_slice %255 {offsets = [0, 0], sizes = [16, 128], strides = [1, 1]} : vector<16x192xf32> to vector<16x128xf32>
    %259 = arith.select %8, %257, %258 : vector<16x128xi1>, vector<16x128xf32>
    %260 = vector.extract_strided_slice %256 {offsets = [0, 128], sizes = [16, 64], strides = [1, 1]} : vector<16x192xf32> to vector<16x64xf32>
    %261 = vector.extract_strided_slice %255 {offsets = [0, 128], sizes = [16, 64], strides = [1, 1]} : vector<16x192xf32> to vector<16x64xf32>
    %262 = arith.select %11, %260, %261 : vector<16x64xi1>, vector<16x64xf32>
    %cst_90 = arith.constant dense<0.000000e+00> : vector<16x192xf32>
    %263 = tpu.matmul %250, %26, %cst_90 {dimension_numbers = #tpu.dot_dimension_numbers<[1], [0], [0], [1], [0, 0, 1, 1], [], []>} : vector<16x64xf32>, vector<64x192xf32>, vector<16x192xf32> -> vector<16x192xf32>
    %264 = vector.extract_strided_slice %263 {offsets = [0, 0], sizes = [16, 128], strides = [1, 1]} : vector<16x192xf32> to vector<16x128xf32>
    %265 = arith.addf %259, %264 : vector<16x128xf32>
    %266 = arith.negf %265 : vector<16x128xf32>
    %267 = math.exp %266 : vector<16x128xf32>
    %cst_91 = arith.constant 1.000000e+00 : f32
    %268 = vector.broadcast %cst_91 : f32 to vector<16x128xf32>
    %269 = arith.addf %268, %267 : vector<16x128xf32>
    %270 = arith.divf %268, %269 : vector<16x128xf32>
    %271 = vector.extract_strided_slice %270 {offsets = [0, 0], sizes = [16, 64], strides = [1, 1]} : vector<16x128xf32> to vector<16x64xf32>
    %272 = vector.extract_strided_slice %270 {offsets = [0, 64], sizes = [16, 64], strides = [1, 1]} : vector<16x128xf32> to vector<16x64xf32>
    %273 = vector.extract_strided_slice %263 {offsets = [0, 128], sizes = [16, 64], strides = [1, 1]} : vector<16x192xf32> to vector<16x64xf32>
    %274 = arith.addf %273, %29 : vector<16x64xf32>
    %275 = arith.mulf %271, %274 : vector<16x64xf32>
    %276 = arith.addf %262, %275 : vector<16x64xf32>
    %277 = math.tanh %276 : vector<16x64xf32>
    %cst_92 = arith.constant 1.000000e+00 : f32
    %278 = vector.broadcast %cst_92 : f32 to vector<16x64xf32>
    %279 = arith.subf %278, %272 : vector<16x64xf32>
    %280 = arith.mulf %279, %277 : vector<16x64xf32>
    %281 = arith.mulf %272, %250 : vector<16x64xf32>
    %282 = arith.addf %280, %281 : vector<16x64xf32>
    %283 = vector.extract_strided_slice %282 {offsets = [0, 0], sizes = [16, 32], strides = [1, 1]} : vector<16x64xf32> to vector<16x32xf32>
    %c112_93 = arith.constant 112 : index
    %c0_94 = arith.constant 0 : index
    %284 = vector.load %arg12[%c112_93, %c0_94] : memref<128x64xf32, #tpu.memory_space<vmem>>, vector<16x32xf32>
    tpu.vector_store %arg12[%c112_93, %c0_94], %283 {strides = array<i32>} : memref<128x64xf32, #tpu.memory_space<vmem>>, vector<16x32xf32>,
    %285 = vector.extract_strided_slice %282 {offsets = [0, 32], sizes = [16, 32], strides = [1, 1]} : vector<16x64xf32> to vector<16x32xf32>
    %c0_95 = arith.constant 0 : index
    %c32_96 = arith.constant 32 : index
    %286 = vector.load %arg12[%c0_95, %c32_96] : memref<128x64xf32, #tpu.memory_space<vmem>>, vector<16x32xf32>
    tpu.vector_store %arg12[%c0_95, %c32_96], %285 {strides = array<i32>} : memref<128x64xf32, #tpu.memory_space<vmem>>, vector<16x32xf32>,
    %c0_97 = arith.constant 0 : index
    %c0_98 = arith.constant 0 : index
    %287 = vector.load %arg12[%c0_97, %c0_98] : memref<128x64xf32, #tpu.memory_space<vmem>>, vector<128x64xf32>
    %c0_99 = arith.constant 0 : index
    %c0_100 = arith.constant 0 : index
    %288 = vector.load %arg6[%c0_99, %c0_100] : memref<64x192xf32, #tpu.memory_space<vmem>>, vector<64x192xf32>
    %cst_101 = arith.constant dense<0.000000e+00> : vector<128x192xf32>
    %289 = tpu.matmul %287, %288, %cst_101 {dimension_numbers = #tpu.dot_dimension_numbers<[1], [0], [0], [1], [0, 0, 1, 1], [], []>} : vector<128x64xf32>, vector<64x192xf32>, vector<128x192xf32> -> vector<128x192xf32>
    %c0_102 = arith.constant 0 : index
    %c0_103 = arith.constant 0 : index
    %290 = vector.load %arg7[%c0_102, %c0_103] : memref<1x192xf32, #tpu.memory_space<vmem>>, vector<1x192xf32>
    %291 = vector.broadcast %290 : vector<1x192xf32> to vector<128x192xf32>
    %292 = arith.addf %289, %291 : vector<128x192xf32>
    %c0_104 = arith.constant 0 : index
    %c0_105 = arith.constant 0 : index
    %293 = vector.load %arg11[%c0_104, %c0_105] : memref<128x192xf32, #tpu.memory_space<vmem>>, vector<128x192xf32>
    tpu.vector_store %arg11[%c0_104, %c0_105], %292 {strides = array<i32>} : memref<128x192xf32, #tpu.memory_space<vmem>>, vector<128x192xf32>,
    %c0_106 = arith.constant 0 : index
    %c0_107 = arith.constant 0 : index
    %294 = vector.load %arg8[%c0_106, %c0_107] : memref<64x192xf32, #tpu.memory_space<vmem>>, vector<64x192xf32>
    %c0_108 = arith.constant 0 : index
    %c0_109 = arith.constant 0 : index
    %295 = vector.load %arg9[%c0_108, %c0_109] : memref<1x64xf32, #tpu.memory_space<vmem>>, vector<1x64xf32>
    %296 = vector.shape_cast %295 : vector<1x64xf32> to vector<1x64xf32>
    %297 = vector.broadcast %296 : vector<1x64xf32> to vector<16x64xf32>
    %cst_110 = arith.constant 0.000000e+00 : f32
    %298 = vector.broadcast %cst_110 : f32 to vector<16x64xf32>
    %cst_111 = arith.constant 0.000000e+00 : f32
    %299 = vector.broadcast %cst_111 : f32 to vector<16x64xf32>
    %c0_112 = arith.constant 0 : index
    %c0_113 = arith.constant 0 : index
    %300 = vector.load %arg11[%c0_112, %c0_113] : memref<128x192xf32, #tpu.memory_space<vmem>>, vector<16x192xf32>
    %c112_114 = arith.constant 112 : index
    %c0_115 = arith.constant 0 : index
    %301 = vector.load %arg11[%c112_114, %c0_115] : memref<128x192xf32, #tpu.memory_space<vmem>>, vector<16x192xf32>
    %302 = vector.extract_strided_slice %301 {offsets = [0, 0], sizes = [16, 128], strides = [1, 1]} : vector<16x192xf32> to vector<16x128xf32>
    %303 = vector.extract_strided_slice %300 {offsets = [0, 0], sizes = [16, 128], strides = [1, 1]} : vector<16x192xf32> to vector<16x128xf32>
    %304 = arith.select %8, %302, %303 : vector<16x128xi1>, vector<16x128xf32>
    %305 = vector.extract_strided_slice %301 {offsets = [0, 128], sizes = [16, 64], strides = [1, 1]} : vector<16x192xf32> to vector<16x64xf32>
    %306 = vector.extract_strided_slice %300 {offsets = [0, 128], sizes = [16, 64], strides = [1, 1]} : vector<16x192xf32> to vector<16x64xf32>
    %307 = arith.select %11, %305, %306 : vector<16x64xi1>, vector<16x64xf32>
    %cst_116 = arith.constant dense<0.000000e+00> : vector<16x192xf32>
    %308 = tpu.matmul %298, %294, %cst_116 {dimension_numbers = #tpu.dot_dimension_numbers<[1], [0], [0], [1], [0, 0, 1, 1], [], []>} : vector<16x64xf32>, vector<64x192xf32>, vector<16x192xf32> -> vector<16x192xf32>
    %309 = vector.extract_strided_slice %308 {offsets = [0, 0], sizes = [16, 128], strides = [1, 1]} : vector<16x192xf32> to vector<16x128xf32>
    %310 = arith.addf %304, %309 : vector<16x128xf32>
    %311 = arith.negf %310 : vector<16x128xf32>
    %312 = math.exp %311 : vector<16x128xf32>
    %cst_117 = arith.constant 1.000000e+00 : f32
    %313 = vector.broadcast %cst_117 : f32 to vector<16x128xf32>
    %314 = arith.addf %313, %312 : vector<16x128xf32>
    %315 = arith.divf %313, %314 : vector<16x128xf32>
    %316 = vector.extract_strided_slice %315 {offsets = [0, 0], sizes = [16, 64], strides = [1, 1]} : vector<16x128xf32> to vector<16x64xf32>
    %317 = vector.extract_strided_slice %315 {offsets = [0, 64], sizes = [16, 64], strides = [1, 1]} : vector<16x128xf32> to vector<16x64xf32>
    %318 = vector.extract_strided_slice %308 {offsets = [0, 128], sizes = [16, 64], strides = [1, 1]} : vector<16x192xf32> to vector<16x64xf32>
    %319 = arith.addf %318, %297 : vector<16x64xf32>
    %320 = arith.mulf %316, %319 : vector<16x64xf32>
    %321 = arith.addf %307, %320 : vector<16x64xf32>
    %322 = math.tanh %321 : vector<16x64xf32>
    %cst_118 = arith.constant 1.000000e+00 : f32
    %323 = vector.broadcast %cst_118 : f32 to vector<16x64xf32>
    %324 = arith.subf %323, %317 : vector<16x64xf32>
    %325 = arith.mulf %324, %322 : vector<16x64xf32>
    %326 = arith.mulf %317, %298 : vector<16x64xf32>
    %327 = arith.addf %325, %326 : vector<16x64xf32>
    %328 = arith.addf %299, %327 : vector<16x64xf32>
    %c16_119 = arith.constant 16 : index
    %c0_120 = arith.constant 0 : index
    %329 = vector.load %arg11[%c16_119, %c0_120] : memref<128x192xf32, #tpu.memory_space<vmem>>, vector<16x192xf32>
    %c96_121 = arith.constant 96 : index
    %c0_122 = arith.constant 0 : index
    %330 = vector.load %arg11[%c96_121, %c0_122] : memref<128x192xf32, #tpu.memory_space<vmem>>, vector<16x192xf32>
    %331 = vector.extract_strided_slice %330 {offsets = [0, 0], sizes = [16, 128], strides = [1, 1]} : vector<16x192xf32> to vector<16x128xf32>
    %332 = vector.extract_strided_slice %329 {offsets = [0, 0], sizes = [16, 128], strides = [1, 1]} : vector<16x192xf32> to vector<16x128xf32>
    %333 = arith.select %8, %331, %332 : vector<16x128xi1>, vector<16x128xf32>
    %334 = vector.extract_strided_slice %330 {offsets = [0, 128], sizes = [16, 64], strides = [1, 1]} : vector<16x192xf32> to vector<16x64xf32>
    %335 = vector.extract_strided_slice %329 {offsets = [0, 128], sizes = [16, 64], strides = [1, 1]} : vector<16x192xf32> to vector<16x64xf32>
    %336 = arith.select %11, %334, %335 : vector<16x64xi1>, vector<16x64xf32>
    %cst_123 = arith.constant dense<0.000000e+00> : vector<16x192xf32>
    %337 = tpu.matmul %327, %294, %cst_123 {dimension_numbers = #tpu.dot_dimension_numbers<[1], [0], [0], [1], [0, 0, 1, 1], [], []>} : vector<16x64xf32>, vector<64x192xf32>, vector<16x192xf32> -> vector<16x192xf32>
    %338 = vector.extract_strided_slice %337 {offsets = [0, 0], sizes = [16, 128], strides = [1, 1]} : vector<16x192xf32> to vector<16x128xf32>
    %339 = arith.addf %333, %338 : vector<16x128xf32>
    %340 = arith.negf %339 : vector<16x128xf32>
    %341 = math.exp %340 : vector<16x128xf32>
    %cst_124 = arith.constant 1.000000e+00 : f32
    %342 = vector.broadcast %cst_124 : f32 to vector<16x128xf32>
    %343 = arith.addf %342, %341 : vector<16x128xf32>
    %344 = arith.divf %342, %343 : vector<16x128xf32>
    %345 = vector.extract_strided_slice %344 {offsets = [0, 0], sizes = [16, 64], strides = [1, 1]} : vector<16x128xf32> to vector<16x64xf32>
    %346 = vector.extract_strided_slice %344 {offsets = [0, 64], sizes = [16, 64], strides = [1, 1]} : vector<16x128xf32> to vector<16x64xf32>
    %347 = vector.extract_strided_slice %337 {offsets = [0, 128], sizes = [16, 64], strides = [1, 1]} : vector<16x192xf32> to vector<16x64xf32>
    %348 = arith.addf %347, %297 : vector<16x64xf32>
    %349 = arith.mulf %345, %348 : vector<16x64xf32>
    %350 = arith.addf %336, %349 : vector<16x64xf32>
    %351 = math.tanh %350 : vector<16x64xf32>
    %cst_125 = arith.constant 1.000000e+00 : f32
    %352 = vector.broadcast %cst_125 : f32 to vector<16x64xf32>
    %353 = arith.subf %352, %346 : vector<16x64xf32>
    %354 = arith.mulf %353, %351 : vector<16x64xf32>
    %355 = arith.mulf %346, %327 : vector<16x64xf32>
    %356 = arith.addf %354, %355 : vector<16x64xf32>
    %357 = arith.addf %328, %356 : vector<16x64xf32>
    %c32_126 = arith.constant 32 : index
    %c0_127 = arith.constant 0 : index
    %358 = vector.load %arg11[%c32_126, %c0_127] : memref<128x192xf32, #tpu.memory_space<vmem>>, vector<16x192xf32>
    %c80_128 = arith.constant 80 : index
    %c0_129 = arith.constant 0 : index
    %359 = vector.load %arg11[%c80_128, %c0_129] : memref<128x192xf32, #tpu.memory_space<vmem>>, vector<16x192xf32>
    %360 = vector.extract_strided_slice %359 {offsets = [0, 0], sizes = [16, 128], strides = [1, 1]} : vector<16x192xf32> to vector<16x128xf32>
    %361 = vector.extract_strided_slice %358 {offsets = [0, 0], sizes = [16, 128], strides = [1, 1]} : vector<16x192xf32> to vector<16x128xf32>
    %362 = arith.select %8, %360, %361 : vector<16x128xi1>, vector<16x128xf32>
    %363 = vector.extract_strided_slice %359 {offsets = [0, 128], sizes = [16, 64], strides = [1, 1]} : vector<16x192xf32> to vector<16x64xf32>
    %364 = vector.extract_strided_slice %358 {offsets = [0, 128], sizes = [16, 64], strides = [1, 1]} : vector<16x192xf32> to vector<16x64xf32>
    %365 = arith.select %11, %363, %364 : vector<16x64xi1>, vector<16x64xf32>
    %cst_130 = arith.constant dense<0.000000e+00> : vector<16x192xf32>
    %366 = tpu.matmul %356, %294, %cst_130 {dimension_numbers = #tpu.dot_dimension_numbers<[1], [0], [0], [1], [0, 0, 1, 1], [], []>} : vector<16x64xf32>, vector<64x192xf32>, vector<16x192xf32> -> vector<16x192xf32>
    %367 = vector.extract_strided_slice %366 {offsets = [0, 0], sizes = [16, 128], strides = [1, 1]} : vector<16x192xf32> to vector<16x128xf32>
    %368 = arith.addf %362, %367 : vector<16x128xf32>
    %369 = arith.negf %368 : vector<16x128xf32>
    %370 = math.exp %369 : vector<16x128xf32>
    %cst_131 = arith.constant 1.000000e+00 : f32
    %371 = vector.broadcast %cst_131 : f32 to vector<16x128xf32>
    %372 = arith.addf %371, %370 : vector<16x128xf32>
    %373 = arith.divf %371, %372 : vector<16x128xf32>
    %374 = vector.extract_strided_slice %373 {offsets = [0, 0], sizes = [16, 64], strides = [1, 1]} : vector<16x128xf32> to vector<16x64xf32>
    %375 = vector.extract_strided_slice %373 {offsets = [0, 64], sizes = [16, 64], strides = [1, 1]} : vector<16x128xf32> to vector<16x64xf32>
    %376 = vector.extract_strided_slice %366 {offsets = [0, 128], sizes = [16, 64], strides = [1, 1]} : vector<16x192xf32> to vector<16x64xf32>
    %377 = arith.addf %376, %297 : vector<16x64xf32>
    %378 = arith.mulf %374, %377 : vector<16x64xf32>
    %379 = arith.addf %365, %378 : vector<16x64xf32>
    %380 = math.tanh %379 : vector<16x64xf32>
    %cst_132 = arith.constant 1.000000e+00 : f32
    %381 = vector.broadcast %cst_132 : f32 to vector<16x64xf32>
    %382 = arith.subf %381, %375 : vector<16x64xf32>
    %383 = arith.mulf %382, %380 : vector<16x64xf32>
    %384 = arith.mulf %375, %356 : vector<16x64xf32>
    %385 = arith.addf %383, %384 : vector<16x64xf32>
    %386 = arith.addf %357, %385 : vector<16x64xf32>
    %c48_133 = arith.constant 48 : index
    %c0_134 = arith.constant 0 : index
    %387 = vector.load %arg11[%c48_133, %c0_134] : memref<128x192xf32, #tpu.memory_space<vmem>>, vector<16x192xf32>
    %c64_135 = arith.constant 64 : index
    %c0_136 = arith.constant 0 : index
    %388 = vector.load %arg11[%c64_135, %c0_136] : memref<128x192xf32, #tpu.memory_space<vmem>>, vector<16x192xf32>
    %389 = vector.extract_strided_slice %388 {offsets = [0, 0], sizes = [16, 128], strides = [1, 1]} : vector<16x192xf32> to vector<16x128xf32>
    %390 = vector.extract_strided_slice %387 {offsets = [0, 0], sizes = [16, 128], strides = [1, 1]} : vector<16x192xf32> to vector<16x128xf32>
    %391 = arith.select %8, %389, %390 : vector<16x128xi1>, vector<16x128xf32>
    %392 = vector.extract_strided_slice %388 {offsets = [0, 128], sizes = [16, 64], strides = [1, 1]} : vector<16x192xf32> to vector<16x64xf32>
    %393 = vector.extract_strided_slice %387 {offsets = [0, 128], sizes = [16, 64], strides = [1, 1]} : vector<16x192xf32> to vector<16x64xf32>
    %394 = arith.select %11, %392, %393 : vector<16x64xi1>, vector<16x64xf32>
    %cst_137 = arith.constant dense<0.000000e+00> : vector<16x192xf32>
    %395 = tpu.matmul %385, %294, %cst_137 {dimension_numbers = #tpu.dot_dimension_numbers<[1], [0], [0], [1], [0, 0, 1, 1], [], []>} : vector<16x64xf32>, vector<64x192xf32>, vector<16x192xf32> -> vector<16x192xf32>
    %396 = vector.extract_strided_slice %395 {offsets = [0, 0], sizes = [16, 128], strides = [1, 1]} : vector<16x192xf32> to vector<16x128xf32>
    %397 = arith.addf %391, %396 : vector<16x128xf32>
    %398 = arith.negf %397 : vector<16x128xf32>
    %399 = math.exp %398 : vector<16x128xf32>
    %cst_138 = arith.constant 1.000000e+00 : f32
    %400 = vector.broadcast %cst_138 : f32 to vector<16x128xf32>
    %401 = arith.addf %400, %399 : vector<16x128xf32>
    %402 = arith.divf %400, %401 : vector<16x128xf32>
    %403 = vector.extract_strided_slice %402 {offsets = [0, 0], sizes = [16, 64], strides = [1, 1]} : vector<16x128xf32> to vector<16x64xf32>
    %404 = vector.extract_strided_slice %402 {offsets = [0, 64], sizes = [16, 64], strides = [1, 1]} : vector<16x128xf32> to vector<16x64xf32>
    %405 = vector.extract_strided_slice %395 {offsets = [0, 128], sizes = [16, 64], strides = [1, 1]} : vector<16x192xf32> to vector<16x64xf32>
    %406 = arith.addf %405, %297 : vector<16x64xf32>
    %407 = arith.mulf %403, %406 : vector<16x64xf32>
    %408 = arith.addf %394, %407 : vector<16x64xf32>
    %409 = math.tanh %408 : vector<16x64xf32>
    %cst_139 = arith.constant 1.000000e+00 : f32
    %410 = vector.broadcast %cst_139 : f32 to vector<16x64xf32>
    %411 = arith.subf %410, %404 : vector<16x64xf32>
    %412 = arith.mulf %411, %409 : vector<16x64xf32>
    %413 = arith.mulf %404, %385 : vector<16x64xf32>
    %414 = arith.addf %412, %413 : vector<16x64xf32>
    %415 = arith.addf %386, %414 : vector<16x64xf32>
    %c64_140 = arith.constant 64 : index
    %c0_141 = arith.constant 0 : index
    %416 = vector.load %arg11[%c64_140, %c0_141] : memref<128x192xf32, #tpu.memory_space<vmem>>, vector<16x192xf32>
    %c48_142 = arith.constant 48 : index
    %c0_143 = arith.constant 0 : index
    %417 = vector.load %arg11[%c48_142, %c0_143] : memref<128x192xf32, #tpu.memory_space<vmem>>, vector<16x192xf32>
    %418 = vector.extract_strided_slice %417 {offsets = [0, 0], sizes = [16, 128], strides = [1, 1]} : vector<16x192xf32> to vector<16x128xf32>
    %419 = vector.extract_strided_slice %416 {offsets = [0, 0], sizes = [16, 128], strides = [1, 1]} : vector<16x192xf32> to vector<16x128xf32>
    %420 = arith.select %8, %418, %419 : vector<16x128xi1>, vector<16x128xf32>
    %421 = vector.extract_strided_slice %417 {offsets = [0, 128], sizes = [16, 64], strides = [1, 1]} : vector<16x192xf32> to vector<16x64xf32>
    %422 = vector.extract_strided_slice %416 {offsets = [0, 128], sizes = [16, 64], strides = [1, 1]} : vector<16x192xf32> to vector<16x64xf32>
    %423 = arith.select %11, %421, %422 : vector<16x64xi1>, vector<16x64xf32>
    %cst_144 = arith.constant dense<0.000000e+00> : vector<16x192xf32>
    %424 = tpu.matmul %414, %294, %cst_144 {dimension_numbers = #tpu.dot_dimension_numbers<[1], [0], [0], [1], [0, 0, 1, 1], [], []>} : vector<16x64xf32>, vector<64x192xf32>, vector<16x192xf32> -> vector<16x192xf32>
    %425 = vector.extract_strided_slice %424 {offsets = [0, 0], sizes = [16, 128], strides = [1, 1]} : vector<16x192xf32> to vector<16x128xf32>
    %426 = arith.addf %420, %425 : vector<16x128xf32>
    %427 = arith.negf %426 : vector<16x128xf32>
    %428 = math.exp %427 : vector<16x128xf32>
    %cst_145 = arith.constant 1.000000e+00 : f32
    %429 = vector.broadcast %cst_145 : f32 to vector<16x128xf32>
    %430 = arith.addf %429, %428 : vector<16x128xf32>
    %431 = arith.divf %429, %430 : vector<16x128xf32>
    %432 = vector.extract_strided_slice %431 {offsets = [0, 0], sizes = [16, 64], strides = [1, 1]} : vector<16x128xf32> to vector<16x64xf32>
    %433 = vector.extract_strided_slice %431 {offsets = [0, 64], sizes = [16, 64], strides = [1, 1]} : vector<16x128xf32> to vector<16x64xf32>
    %434 = vector.extract_strided_slice %424 {offsets = [0, 128], sizes = [16, 64], strides = [1, 1]} : vector<16x192xf32> to vector<16x64xf32>
    %435 = arith.addf %434, %297 : vector<16x64xf32>
    %436 = arith.mulf %432, %435 : vector<16x64xf32>
    %437 = arith.addf %423, %436 : vector<16x64xf32>
    %438 = math.tanh %437 : vector<16x64xf32>
    %cst_146 = arith.constant 1.000000e+00 : f32
    %439 = vector.broadcast %cst_146 : f32 to vector<16x64xf32>
    %440 = arith.subf %439, %433 : vector<16x64xf32>
    %441 = arith.mulf %440, %438 : vector<16x64xf32>
    %442 = arith.mulf %433, %414 : vector<16x64xf32>
    %443 = arith.addf %441, %442 : vector<16x64xf32>
    %444 = arith.addf %415, %443 : vector<16x64xf32>
    %c80_147 = arith.constant 80 : index
    %c0_148 = arith.constant 0 : index
    %445 = vector.load %arg11[%c80_147, %c0_148] : memref<128x192xf32, #tpu.memory_space<vmem>>, vector<16x192xf32>
    %c32_149 = arith.constant 32 : index
    %c0_150 = arith.constant 0 : index
    %446 = vector.load %arg11[%c32_149, %c0_150] : memref<128x192xf32, #tpu.memory_space<vmem>>, vector<16x192xf32>
    %447 = vector.extract_strided_slice %446 {offsets = [0, 0], sizes = [16, 128], strides = [1, 1]} : vector<16x192xf32> to vector<16x128xf32>
    %448 = vector.extract_strided_slice %445 {offsets = [0, 0], sizes = [16, 128], strides = [1, 1]} : vector<16x192xf32> to vector<16x128xf32>
    %449 = arith.select %8, %447, %448 : vector<16x128xi1>, vector<16x128xf32>
    %450 = vector.extract_strided_slice %446 {offsets = [0, 128], sizes = [16, 64], strides = [1, 1]} : vector<16x192xf32> to vector<16x64xf32>
    %451 = vector.extract_strided_slice %445 {offsets = [0, 128], sizes = [16, 64], strides = [1, 1]} : vector<16x192xf32> to vector<16x64xf32>
    %452 = arith.select %11, %450, %451 : vector<16x64xi1>, vector<16x64xf32>
    %cst_151 = arith.constant dense<0.000000e+00> : vector<16x192xf32>
    %453 = tpu.matmul %443, %294, %cst_151 {dimension_numbers = #tpu.dot_dimension_numbers<[1], [0], [0], [1], [0, 0, 1, 1], [], []>} : vector<16x64xf32>, vector<64x192xf32>, vector<16x192xf32> -> vector<16x192xf32>
    %454 = vector.extract_strided_slice %453 {offsets = [0, 0], sizes = [16, 128], strides = [1, 1]} : vector<16x192xf32> to vector<16x128xf32>
    %455 = arith.addf %449, %454 : vector<16x128xf32>
    %456 = arith.negf %455 : vector<16x128xf32>
    %457 = math.exp %456 : vector<16x128xf32>
    %cst_152 = arith.constant 1.000000e+00 : f32
    %458 = vector.broadcast %cst_152 : f32 to vector<16x128xf32>
    %459 = arith.addf %458, %457 : vector<16x128xf32>
    %460 = arith.divf %458, %459 : vector<16x128xf32>
    %461 = vector.extract_strided_slice %460 {offsets = [0, 0], sizes = [16, 64], strides = [1, 1]} : vector<16x128xf32> to vector<16x64xf32>
    %462 = vector.extract_strided_slice %460 {offsets = [0, 64], sizes = [16, 64], strides = [1, 1]} : vector<16x128xf32> to vector<16x64xf32>
    %463 = vector.extract_strided_slice %453 {offsets = [0, 128], sizes = [16, 64], strides = [1, 1]} : vector<16x192xf32> to vector<16x64xf32>
    %464 = arith.addf %463, %297 : vector<16x64xf32>
    %465 = arith.mulf %461, %464 : vector<16x64xf32>
    %466 = arith.addf %452, %465 : vector<16x64xf32>
    %467 = math.tanh %466 : vector<16x64xf32>
    %cst_153 = arith.constant 1.000000e+00 : f32
    %468 = vector.broadcast %cst_153 : f32 to vector<16x64xf32>
    %469 = arith.subf %468, %462 : vector<16x64xf32>
    %470 = arith.mulf %469, %467 : vector<16x64xf32>
    %471 = arith.mulf %462, %443 : vector<16x64xf32>
    %472 = arith.addf %470, %471 : vector<16x64xf32>
    %473 = arith.addf %444, %472 : vector<16x64xf32>
    %c96_154 = arith.constant 96 : index
    %c0_155 = arith.constant 0 : index
    %474 = vector.load %arg11[%c96_154, %c0_155] : memref<128x192xf32, #tpu.memory_space<vmem>>, vector<16x192xf32>
    %c16_156 = arith.constant 16 : index
    %c0_157 = arith.constant 0 : index
    %475 = vector.load %arg11[%c16_156, %c0_157] : memref<128x192xf32, #tpu.memory_space<vmem>>, vector<16x192xf32>
    %476 = vector.extract_strided_slice %475 {offsets = [0, 0], sizes = [16, 128], strides = [1, 1]} : vector<16x192xf32> to vector<16x128xf32>
    %477 = vector.extract_strided_slice %474 {offsets = [0, 0], sizes = [16, 128], strides = [1, 1]} : vector<16x192xf32> to vector<16x128xf32>
    %478 = arith.select %8, %476, %477 : vector<16x128xi1>, vector<16x128xf32>
    %479 = vector.extract_strided_slice %475 {offsets = [0, 128], sizes = [16, 64], strides = [1, 1]} : vector<16x192xf32> to vector<16x64xf32>
    %480 = vector.extract_strided_slice %474 {offsets = [0, 128], sizes = [16, 64], strides = [1, 1]} : vector<16x192xf32> to vector<16x64xf32>
    %481 = arith.select %11, %479, %480 : vector<16x64xi1>, vector<16x64xf32>
    %cst_158 = arith.constant dense<0.000000e+00> : vector<16x192xf32>
    %482 = tpu.matmul %472, %294, %cst_158 {dimension_numbers = #tpu.dot_dimension_numbers<[1], [0], [0], [1], [0, 0, 1, 1], [], []>} : vector<16x64xf32>, vector<64x192xf32>, vector<16x192xf32> -> vector<16x192xf32>
    %483 = vector.extract_strided_slice %482 {offsets = [0, 0], sizes = [16, 128], strides = [1, 1]} : vector<16x192xf32> to vector<16x128xf32>
    %484 = arith.addf %478, %483 : vector<16x128xf32>
    %485 = arith.negf %484 : vector<16x128xf32>
    %486 = math.exp %485 : vector<16x128xf32>
    %cst_159 = arith.constant 1.000000e+00 : f32
    %487 = vector.broadcast %cst_159 : f32 to vector<16x128xf32>
    %488 = arith.addf %487, %486 : vector<16x128xf32>
    %489 = arith.divf %487, %488 : vector<16x128xf32>
    %490 = vector.extract_strided_slice %489 {offsets = [0, 0], sizes = [16, 64], strides = [1, 1]} : vector<16x128xf32> to vector<16x64xf32>
    %491 = vector.extract_strided_slice %489 {offsets = [0, 64], sizes = [16, 64], strides = [1, 1]} : vector<16x128xf32> to vector<16x64xf32>
    %492 = vector.extract_strided_slice %482 {offsets = [0, 128], sizes = [16, 64], strides = [1, 1]} : vector<16x192xf32> to vector<16x64xf32>
    %493 = arith.addf %492, %297 : vector<16x64xf32>
    %494 = arith.mulf %490, %493 : vector<16x64xf32>
    %495 = arith.addf %481, %494 : vector<16x64xf32>
    %496 = math.tanh %495 : vector<16x64xf32>
    %cst_160 = arith.constant 1.000000e+00 : f32
    %497 = vector.broadcast %cst_160 : f32 to vector<16x64xf32>
    %498 = arith.subf %497, %491 : vector<16x64xf32>
    %499 = arith.mulf %498, %496 : vector<16x64xf32>
    %500 = arith.mulf %491, %472 : vector<16x64xf32>
    %501 = arith.addf %499, %500 : vector<16x64xf32>
    %502 = arith.addf %473, %501 : vector<16x64xf32>
    %c112_161 = arith.constant 112 : index
    %c0_162 = arith.constant 0 : index
    %503 = vector.load %arg11[%c112_161, %c0_162] : memref<128x192xf32, #tpu.memory_space<vmem>>, vector<16x192xf32>
    %c0_163 = arith.constant 0 : index
    %c0_164 = arith.constant 0 : index
    %504 = vector.load %arg11[%c0_163, %c0_164] : memref<128x192xf32, #tpu.memory_space<vmem>>, vector<16x192xf32>
    %505 = vector.extract_strided_slice %504 {offsets = [0, 0], sizes = [16, 128], strides = [1, 1]} : vector<16x192xf32> to vector<16x128xf32>
    %506 = vector.extract_strided_slice %503 {offsets = [0, 0], sizes = [16, 128], strides = [1, 1]} : vector<16x192xf32> to vector<16x128xf32>
    %507 = arith.select %8, %505, %506 : vector<16x128xi1>, vector<16x128xf32>
    %508 = vector.extract_strided_slice %504 {offsets = [0, 128], sizes = [16, 64], strides = [1, 1]} : vector<16x192xf32> to vector<16x64xf32>
    %509 = vector.extract_strided_slice %503 {offsets = [0, 128], sizes = [16, 64], strides = [1, 1]} : vector<16x192xf32> to vector<16x64xf32>
    %510 = arith.select %11, %508, %509 : vector<16x64xi1>, vector<16x64xf32>
    %cst_165 = arith.constant dense<0.000000e+00> : vector<16x192xf32>
    %511 = tpu.matmul %501, %294, %cst_165 {dimension_numbers = #tpu.dot_dimension_numbers<[1], [0], [0], [1], [0, 0, 1, 1], [], []>} : vector<16x64xf32>, vector<64x192xf32>, vector<16x192xf32> -> vector<16x192xf32>
    %512 = vector.extract_strided_slice %511 {offsets = [0, 0], sizes = [16, 128], strides = [1, 1]} : vector<16x192xf32> to vector<16x128xf32>
    %513 = arith.addf %507, %512 : vector<16x128xf32>
    %514 = arith.negf %513 : vector<16x128xf32>
    %515 = math.exp %514 : vector<16x128xf32>
    %cst_166 = arith.constant 1.000000e+00 : f32
    %516 = vector.broadcast %cst_166 : f32 to vector<16x128xf32>
    %517 = arith.addf %516, %515 : vector<16x128xf32>
    %518 = arith.divf %516, %517 : vector<16x128xf32>
    %519 = vector.extract_strided_slice %518 {offsets = [0, 0], sizes = [16, 64], strides = [1, 1]} : vector<16x128xf32> to vector<16x64xf32>
    %520 = vector.extract_strided_slice %518 {offsets = [0, 64], sizes = [16, 64], strides = [1, 1]} : vector<16x128xf32> to vector<16x64xf32>
    %521 = vector.extract_strided_slice %511 {offsets = [0, 128], sizes = [16, 64], strides = [1, 1]} : vector<16x192xf32> to vector<16x64xf32>
    %522 = arith.addf %521, %297 : vector<16x64xf32>
    %523 = arith.mulf %519, %522 : vector<16x64xf32>
    %524 = arith.addf %510, %523 : vector<16x64xf32>
    %525 = math.tanh %524 : vector<16x64xf32>
    %cst_167 = arith.constant 1.000000e+00 : f32
    %526 = vector.broadcast %cst_167 : f32 to vector<16x64xf32>
    %527 = arith.subf %526, %520 : vector<16x64xf32>
    %528 = arith.mulf %527, %525 : vector<16x64xf32>
    %529 = arith.mulf %520, %501 : vector<16x64xf32>
    %530 = arith.addf %528, %529 : vector<16x64xf32>
    %531 = arith.addf %502, %530 : vector<16x64xf32>
    %cst_168 = arith.constant 1.250000e-01 : f32
    %532 = vector.broadcast %cst_168 : f32 to vector<16x64xf32>
    %533 = arith.mulf %531, %532 : vector<16x64xf32>
    %c0_169 = arith.constant 0 : index
    %c0_170 = arith.constant 0 : index
    %534 = vector.load %arg10[%c0_169, %c0_170] : memref<16x64xf32, #tpu.memory_space<vmem>>, vector<16x64xf32>
    tpu.vector_store %arg10[%c0_169, %c0_170], %533 {strides = array<i32>} : memref<16x64xf32, #tpu.memory_space<vmem>>, vector<16x64xf32>,
    return
  }
}

</mosaic_0001>

<bundles_post_ra>
// kernel: _forward.1
= control target key start
LH: loop header
LB: loop body
LE: loop exit
PB: predicated region body
PF: predicated region fallthrough
CT: control target
= control target key end

     0   :  { %15 = vsyncpa [#allocation5], 0  ;;  %s5322_s0 = inlined_call_operand.vmem [shape: s32[128,1], index: 0, kind: input, shape index: {}]   ;;  %s5323_s1 = inlined_call_operand.hbm [shape: f32[56,32], index: 1, kind: input, shape index: {}]   ;;  %s5324_s2 = inlined_call_operand.hbm [shape: f32[32,192], index: 2, kind: input, shape index: {}]   ;;  %s5325_s3 = inlined_call_operand.vmem [shape: f32[1,192], index: 3, kind: input, shape index: {}]   ;;  %s5326_s4 = inlined_call_operand.hbm [shape: f32[64,192], index: 4, kind: input, shape index: {}]   ;;  %s5327_s5 = inlined_call_operand.vmem [shape: f32[1,64], index: 5, kind: input, shape index: {}]   ;;  %s5328_s6 = inlined_call_operand.hbm [shape: f32[64,192], index: 6, kind: input, shape index: {}]   ;;  %s5329_s7 = inlined_call_operand.vmem [shape: f32[1,192], index: 7, kind: input, shape index: {}]   ;;  %s5330_s8 = inlined_call_operand.vmem [shape: f32[64,192], index: 8, kind: input, shape index: {}]   ;;  %s5331_s9 = inlined_call_operand.vmem [shape: f32[1,64], index: 9, kind: input, shape index: {}]   ;;  %s5332_s10 = inlined_call_operand.vmem [shape: f32[16,64], index: 10, kind: output, shape index: {}]  }
   0x1   :  { %16 = vsyncpa [#allocation7], 0 }
   0x2   :  { %17 = vsyncpa [#allocation10], 0  ;;  %s3745_s13 = smov [#allocation6]  }
   0x3   :  { %s37_s14 = sshll.u32 %s3745_s13, 4  ;;  %s38_s14 = int_to_ptr.vmem [resolvable:$true] %s37_s14 }
   0x4   :  { %s3667_s15 = scalar_lea.vmem %s38_s14, 1024  ;;  %p3672_p1 = scmp.lt.s32.totalorder %s38_s14, %s38_s14 }
   0x5   :  { %p3668_p0 = scmp.ne.s32.totalorder %s38_s14, %s3667_s15  ;;  %p3673_p2 = scmp.lt.s32.totalorder %s3667_s15, %s3667_s15 }
   0x7   :  { %p3674_p3 = por %p3673_p2, %p3672_p1 }
   0x9   :  { %p3675_p4 = pnand %p3674_p3, %p3668_p0 }
   0xb   :  { %3678 = shalt.err (!%p3675_p4)
}
   0xc   :  { %s3746_s16 = smov 256   ;;  %s3747_s17 = smov 16  }
   0xd   :  { %43 = dma.hbm_to_vmem [thread:$0]  %s5324_s2, 1024, %s38_s14, [#allocation7], %s3746_s16, %s3746_s16, %s3747_s17  }
   0xe   :  { %s3748_s20 = smov [#allocation4]  }
   0xf   :  { %s25_s21 = sshll.u32 %s3748_s20, 4  ;;  %s26_s21 = int_to_ptr.vmem [resolvable:$true] %s25_s21 }
  0x10   :  { %s3687_s22 = scalar_lea.vmem %s26_s21, 896  ;;  %p3692_p6 = scmp.lt.s32.totalorder %s26_s21, %s26_s21 }
  0x11   :  { %p3688_p5 = scmp.ne.s32.totalorder %s26_s21, %s3687_s22  ;;  %p3693_p7 = scmp.lt.s32.totalorder %s3687_s22, %s3687_s22 }
  0x13   :  { %p3694_p8 = por %p3693_p7, %p3692_p6 }
  0x15   :  { %p3695_p9 = pnand %p3694_p8, %p3688_p5 }
  0x17   :  { %3698 = shalt.err (!%p3695_p9)
}
  0x18   :  { %s3749_s23 = smov 128   ;;  %s3750_s24 = smov 8  }
  0x19   :  { %31 = dma.hbm_to_vmem [thread:$0]  %s5323_s1, 896, %s26_s21, [#allocation5], %s3749_s23, %s3749_s23, %s3750_s24  }
  0x1a   :  { %s3751_s27 = smov [#allocation8]   ;;  %s3752_s29 = smov [#allocation9]  }
  0x1b   :  { %s51_s28 = sshll.u32 %s3751_s27, 4  ;;  %s65_s2 = sshll.u32 %s3752_s29, 4  ;;  %s52_s28 = int_to_ptr.vmem [resolvable:$true] %s51_s28  ;;  %s66_s2 = int_to_ptr.vmem [resolvable:$true] %s65_s2 }
  0x1c   :  { %s3707_s30 = scalar_lea.vmem %s52_s28, 2048  ;;  %p3712_p11 = scmp.lt.s32.totalorder %s52_s28, %s52_s28 }
  0x1d   :  { %p3708_p10 = scmp.ne.s32.totalorder %s52_s28, %s3707_s30  ;;  %p3713_p12 = scmp.lt.s32.totalorder %s3707_s30, %s3707_s30 }
  0x1f   :  { %p3714_p13 = por %p3713_p12, %p3712_p11 }
  0x21   :  { %p3715_p0 = pnand %p3714_p13, %p3708_p10 }
  0x23   :  { %3718 = shalt.err (!%p3715_p0)
}
  0x24   :  { %57 = dma.hbm_to_vmem [thread:$0]  %s5326_s4, 2048, %s52_s28, [#allocation7], %s3746_s16, %s3746_s16, %s3747_s17  }
  0x25   :  { %s3727_s1 = scalar_lea.vmem %s66_s2, 2048  ;;  %p3732_p2 = scmp.lt.s32.totalorder %s66_s2, %s66_s2 }
  0x26   :  { %p3728_p1 = scmp.ne.s32.totalorder %s66_s2, %s3727_s1  ;;  %p3733_p3 = scmp.lt.s32.totalorder %s3727_s1, %s3727_s1 }
  0x28   :  { %p3734_p4 = por %p3733_p3, %p3732_p2 }
  0x2a   :  { %p3735_p5 = pnand %p3734_p4, %p3728_p1 }
  0x2c   :  { %3738 = shalt.err (!%p3735_p5)
}
  0x2d   :  { %71 = dma.hbm_to_vmem [thread:$0]  %s5328_s6, 2048, %s66_s2, [#allocation10], %s3746_s16, %s3746_s16, %s3747_s17  }
  0x2e   :  { %3739 = dma.done.wait [#allocation5], 896  }
  0x2f   :  { %3740 = vsyncadd [#allocation5], 4294966400 }
  0x30   :  { %3741 = dma.done.wait [#allocation7], 3072  }
  0x31   :  { %3742 = vsyncadd [#allocation7], 4294964224 }
  0x32   :  { %3743 = dma.done.wait [#allocation10], 2048  }
  0x33   :  { %3744 = vsyncadd [#allocation10], 4294965248  ;;  %v3753_v0 = vmov 0   ;;  %v5335_v1 = vmov 0.0   ;;  %v99_v2 = vld [vmem:[%s5322_s0 + $0x10] sm:$0xff]  ;;  %v97_v3 = vld [vmem:[%s5322_s0] sm:$0xff]  ;;  %v90_v30 = vlaneseq }
  0x34   :  { %3436 = vset.pattern.permute.xlu1 %v3753_v0  ;;  %3435 = vset.pattern.permute.xlu0 %v3753_v0  ;;  %v100_v4 = vld [vmem:[%s5322_s0 + $0x18] sm:$0xff]  ;;  %v98_v5 = vld [vmem:[%s5322_s0 + $0x8] sm:$0xff]  ;;  %v215_v6 = vld [vmem:[#allocation4 + $0x30] sm:$0xff]  ;;  %vm216_vm0 = vcmask 457728  }
  0x35   :  { %543 = vmatprep.mubr.f32.mxu1 %v5335_v1  ;;  %120 = vperm.xlu1 %3436, %v99_v2   ;;  %v214_v7 = vld [vmem:[#allocation4 + $0x28] sm:$0xff]  ;;  %v101_v9 = vld [vmem:[%s5322_s0 + $0x20] sm:$0xff]  ;;  %v104_v11 = vld [vmem:[%s5322_s0 + $0x38] sm:$0xff]  ;;  %v3882_v31 = vand.u32 127, %v90_v30 }
  0x36   :  { %114 = vperm.xlu0 %3435, %v97_v3   ;;  %v102_v8 = vld [vmem:[%s5322_s0 + $0x28] sm:$0xff]  ;;  %3386 = vmatprep.subr.mxu0 %v215_v6  ;;  %v213_v10 = vld [vmem:[#allocation4 + $0x20] sm:$0xff]  ;;  %v103_v12 = vld [vmem:[%s5322_s0 + $0x30] sm:$0xff] }
  0x37   :  { %3387 = vmatpush3.msra.mxu0 %v215_v6  ;;  %v212_v13 = vld [vmem:[#allocation4 + $0x18] sm:$0xff]  ;;  %v211_v14 = vld [vmem:[#allocation4 + $0x10] sm:$0xff]  ;;  %v106_v15 = vld [vmem:[%s5322_s0 + $0x48] sm:$0xff] }
  0x38   :  { %3388 = vmatprep.subr.mxu0 %v214_v7  ;;  %v105_v16 = vld [vmem:[%s5322_s0 + $0x40] sm:$0xff]  ;;  %v210_v17 = vld [vmem:[#allocation4 + $0x8] sm:$0xff]  ;;  %v108_v18 = vld [vmem:[%s5322_s0 + $0x58] sm:$0xff] }
  0x39   :  { %123 = vperm.xlu1 %3436, %v100_v4   ;;  %3389 = vmatpush3.msra.mxu0 %v214_v7  ;;  %v107_v19 = vld [vmem:[%s5322_s0 + $0x50] sm:$0xff]  ;;  %v209_v20 = vld [vmem:[#allocation4] sm:$0xff]  ;;  %v110_v21 = vld [vmem:[%s5322_s0 + $0x68] sm:$0xff] }
  0x3a   :  { %117 = vperm.xlu0 %3435, %v98_v5   ;;  %3390 = vmatprep.subr.mxu0 %v213_v10  ;;  %v109_v22 = vld [vmem:[%s5322_s0 + $0x60] sm:$0xff]  ;;  %v112_v23 = vld [vmem:[%s5322_s0 + $0x78] sm:$0xff]  ;;  %v111_v24 = vld [vmem:[%s5322_s0 + $0x70] sm:$0xff] }
  0x3b   :  { %3391 = vmatpush3.msra.mxu0 %v213_v10  ;;  %v417_v25 = vld [vmem:[#allocation6 + $0x38] sm:$0xff]  ;;  %v416_v26 = vld [vmem:[#allocation6 + $0x30] sm:$0xff]  ;;  %v415_v27 = vld [vmem:[#allocation6 + $0x28] sm:$0xff] }
  0x3c   :  { %3392 = vmatprep.subr.mxu0 %v212_v13  ;;  %503 = vmatprep.subr.mxu1 %v417_v25  ;;  %v414_v28 = vld [vmem:[#allocation6 + $0x20] sm:$0xff]  ;;  %v413_v29 = vld [vmem:[#allocation6 + $0x18] sm:$0xff]  ;;  %v412_v0 = vld [vmem:[#allocation6 + $0x10] sm:$0xff] }
  0x3d   :  { %129 = vperm.xlu1 %3436, %v102_v8   ;;  %3393 = vmatpush3.msra.mxu0 %v212_v13  ;;  %v411_v2 = vld [vmem:[#allocation6 + $0x8] sm:$0xff]  ;;  %v410_v3 = vld [vmem:[#allocation6] sm:$0xff]  ;;  %v3933_v4 = vld [vmem:[#allocation8 + $0x78] sm:$0xff] }
  0x3e   :  { %126 = vperm.xlu0 %3435, %v101_v9   ;;  %3394 = vmatprep.subr.mxu0 %v211_v14  ;;  %v3936_v5 = vld [vmem:[#allocation8 + $0x70] sm:$0xff]  ;;  %v3940_v6 = vld [vmem:[#allocation8 + $0x68] sm:$0xff]  ;;  %v3943_v7 = vld [vmem:[#allocation8 + $0x60] sm:$0xff] }
  0x3f   :  { %3395 = vmatpush3.msra.mxu0 %v211_v14  ;;  %504 = vmatpush1.msra.mxu1 %v416_v26  ;;  %v3946_v8 = vld [vmem:[#allocation8 + $0x58] sm:$0xff]  ;;  %v3949_v9 = vld [vmem:[#allocation8 + $0x50] sm:$0xff]  ;;  %v3952_v10 = vld [vmem:[#allocation8 + $0x48] sm:$0xff] }
  0x40   :  { %3396 = vmatprep.subr.mxu0 %v210_v17  ;;  %505 = vmatprep.subr.mxu1 %v415_v27  ;;  %v3961_v13 = vld [vmem:[#allocation8 + $0x30] sm:$0xff]  ;;  %v3964_v14 = vld [vmem:[#allocation8 + $0x28] sm:$0xff] }
  0x41   :  { %135 = vperm.xlu1 %3436, %v104_v11   ;;  %3397 = vmatpush3.msra.mxu0 %v210_v17  ;;  %v3955_v11 = vld [vmem:[#allocation8 + $0x40] sm:$0xff]  ;;  %v3973_v17 = vld [vmem:[#allocation8 + $0x10] sm:$0xff] }
  0x42   :  { %132 = vperm.xlu0 %3435, %v103_v12   ;;  %3398 = vmatprep.subr.mxu0 %v209_v20  ;;  %v3958_v12 = vld [vmem:[#allocation8 + $0x38] sm:$0xff] }
  0x43   :  { %3399 = vmatpush3.msra.mxu0 %v209_v20  ;;  %506 = vmatpush1.msra.mxu1 %v414_v28 }
  0x44   :  { %507 = vmatprep.subr.mxu1 %v413_v29  ;;  %727 = vmatprep.subr.mxu0 %v3933_v4 }
  0x45   :  { %141 = vperm.xlu1 %3436, %v106_v15   ;;  %508 = vmatpush1.msra.mxu1 %v412_v0  ;;  %v3967_v15 = vld [vmem:[#allocation8 + $0x20] sm:$0xff] }
  0x46   :  { %138 = vperm.xlu0 %3435, %v105_v16   ;;  %509 = vmatprep.subr.mxu1 %v411_v2  ;;  %v3970_v16 = vld [vmem:[#allocation8 + $0x18] sm:$0xff] }
  0x47   :  { %510 = vmatpush1.msra.mxu1 %v410_v3 }
  0x48   :  { %1014 = vmatprep.subr.mxu1 %v3933_v4 }
  0x49   :  { %147 = vperm.xlu1 %3436, %v108_v18   ;;  %v3976_v18 = vld [vmem:[#allocation8 + $0x8] sm:$0xff] }
  0x4a   :  { %144 = vperm.xlu0 %3435, %v107_v19   ;;  %v3979_v19 = vld [vmem:[#allocation8] sm:$0xff] }
  0x4d   :  { %153 = vperm.xlu1 %3436, %v110_v21  }
  0x4e   :  { %150 = vperm.xlu0 %3435, %v109_v22  }
  0x51   :  { %159 = vperm.xlu1 %3436, %v112_v23  }
  0x52   :  { %156 = vperm.xlu0 %3435, %v111_v24  }
  0xb0   :  { %v121_v32 = vpop.permute.xlu1 %120 }
  0xb1   :  { %v115_v33 = vpop.permute.xlu0 %114  ;;  %vm163_vm2 = vcmp.eq.s32.totalorder %v121_v32, %v3882_v31 }
  0xb2   :  { %vm161_vm1 = vcmp.eq.s32.totalorder %v115_v33, %v3882_v31  ;;  %v3239_v37 = vsel %vm163_vm2, 1.0, %v5335_v1  ;;  %vm641_vm2 = vcmask 523264  }
  0xb3   :  { %v3237_v34 = vsel %vm161_vm1, 1.0, %v5335_v1 }
  0xb4   :  { %3400 = vmatprep.mubr.msk.f32.mxu0 %vm216_vm0, %v3237_v34  ;;  %v124_v35 = vpop.permute.xlu1 %123 }
  0xb5   :  { %v118_v36 = vpop.permute.xlu0 %117  ;;  %vm164_vm3 = vcmp.eq.s32.totalorder %v124_v35, %v3882_v31 }
  0xb6   :  { %vm162_vm4 = vcmp.eq.s32.totalorder %v118_v36, %v3882_v31  ;;  %v3240_v39 = vsel %vm164_vm3, 1.0, %v5335_v1  ;;  %vm92_vm3 = vcmp.ge.s32.totalorder %v3882_v31, 32 }
  0xb7   :  { %v3238_v38 = vsel %vm162_vm4, 1.0, %v5335_v1  ;;  %vm93_vm4 = vcmp.lt.s32.totalorder %v3882_v31, 64 }
  0xb8   :  { %3401 = vmatmul.mubr.msk.f32.vlgmr.msra.gmra.mxu0 %vm216_vm0, %v3238_v38  ;;  %v130_v40 = vpop.permute.xlu1 %129  ;;  %v4052_v38 = vshrl.u32 %v90_v30, 7 }
  0xb9   :  { %v127_v41 = vpop.permute.xlu0 %126  ;;  %3403 = vmatprep.mubr.msk.f32.mxu0 %vm216_vm0, %v3239_v37  ;;  %vm166_vm6 = vcmp.eq.s32.totalorder %v130_v40, %v3882_v31  ;;  %728 = vmatpush1.msra.mxu0 %v3936_v5  ;;  %v418_v40 = vld [vmem:[%s5325_s3] sm:$0x3] }
  0xba   :  { %vm165_vm5 = vcmp.eq.s32.totalorder %v127_v41, %v3882_v31  ;;  %v3242_v45 = vsel %vm166_vm6, 1.0, %v5335_v1  ;;  %729 = vmatprep.subr.mxu0 %v3940_v6  ;;  %v5333_v41 = vsub.s32 1, %v4052_v38  ;;  %vm95_vm6 = vcmp.ge.s32.totalorder %v3882_v31, 96 }
  0xbb   :  { %v3241_v42 = vsel %vm165_vm5, 1.0, %v5335_v1  ;;  %730 = vmatpush1.msra.mxu0 %v3943_v7  ;;  %vm94_vm5 = vmand %vm92_vm3, %vm93_vm4 }
  0xbc   :  { %3404 = vmatmul.mubr.msk.f32.gmra.mxu0 %vm216_vm0, %v3240_v39  ;;  %v136_v43 = vpop.permute.xlu1 %135  ;;  %731 = vmatprep.subr.mxu0 %v3946_v8  ;;  %v5334_v39 = vsub.s32 0, %v4052_v38 }
  0xbd   :  { %3406 = vmatprep.mubr.msk.f32.mxu0 %vm216_vm0, %v3241_v42  ;;  %v133_v44 = vpop.permute.xlu0 %132  ;;  %vm168_vm8 = vcmp.eq.s32.totalorder %v136_v43, %v3882_v31  ;;  %732 = vmatpush1.msra.mxu0 %v3949_v9  ;;  %v4065_v43 = vrot.slane %v418_v40, %v5333_v41 }
  0xbe   :  { %vm167_vm7 = vcmp.eq.s32.totalorder %v133_v44, %v3882_v31  ;;  %v3244_v49 = vsel %vm168_vm8, 1.0, %v5335_v1  ;;  %733 = vmatprep.subr.mxu0 %v3952_v10  ;;  %v4061_v42 = vrot.slane %v418_v40, %v5334_v39  ;;  %vm836_vm8 = vcmask 523520  }
  0xbf   :  { %v3243_v46 = vsel %vm167_vm7, 1.0, %v5335_v1  ;;  %734 = vmatpush1.msra.mxu0 %v3955_v11  ;;  %vm4115_vm7 = vmor %vm94_vm5, %vm95_vm6 }
  0xc0   :  { %3407 = vmatmul.mubr.msk.f32.gmra.mxu0 %vm216_vm0, %v3242_v45  ;;  %v142_v47 = vpop.permute.xlu1 %141  ;;  %735 = vmatprep.subr.mxu0 %v3958_v12 }
  0xc1   :  { %3409 = vmatprep.mubr.msk.f32.mxu0 %vm216_vm0, %v3243_v46  ;;  %v139_v48 = vpop.permute.xlu0 %138  ;;  %vm170_vm10 = vcmp.eq.s32.totalorder %v142_v47, %v3882_v31  ;;  %736 = vmatpush1.msra.mxu0 %v3961_v13 }
  0xc2   :  { %vm169_vm9 = vcmp.eq.s32.totalorder %v139_v48, %v3882_v31  ;;  %v3246_v53 = vsel %vm170_vm10, 1.0, %v5335_v1  ;;  %737 = vmatprep.subr.mxu0 %v3964_v14 }
  0xc3   :  { %v3245_v50 = vsel %vm169_vm9, 1.0, %v5335_v1  ;;  %738 = vmatpush1.msra.mxu0 %v3967_v15 }
  0xc4   :  { %3410 = vmatmul.mubr.msk.f32.gmra.mxu0 %vm216_vm0, %v3244_v49  ;;  %v148_v51 = vpop.permute.xlu1 %147  ;;  %739 = vmatprep.subr.mxu0 %v3970_v16 }
  0xc5   :  { %3412 = vmatprep.mubr.msk.f32.mxu0 %vm216_vm0, %v3245_v50  ;;  %v145_v52 = vpop.permute.xlu0 %144  ;;  %vm172_vm12 = vcmp.eq.s32.totalorder %v148_v51, %v3882_v31  ;;  %740 = vmatpush1.msra.mxu0 %v3973_v17 }
  0xc6   :  { %vm171_vm11 = vcmp.eq.s32.totalorder %v145_v52, %v3882_v31  ;;  %v3248_v57 = vsel %vm172_vm12, 1.0, %v5335_v1  ;;  %741 = vmatprep.subr.mxu0 %v3976_v18 }
  0xc7   :  { %v3247_v54 = vsel %vm171_vm11, 1.0, %v5335_v1  ;;  %742 = vmatpush1.msra.mxu0 %v3979_v19 }
  0xc8   :  { %3413 = vmatmul.mubr.msk.f32.gmra.mxu0 %vm216_vm0, %v3246_v53  ;;  %v154_v55 = vpop.permute.xlu1 %153  ;;  %871 = vmatprep.subr.mxu0 %v3933_v4 }
  0xc9   :  { %3415 = vmatprep.mubr.msk.f32.mxu0 %vm216_vm0, %v3247_v54  ;;  %v151_v56 = vpop.permute.xlu0 %150  ;;  %vm174_vm14 = vcmp.eq.s32.totalorder %v154_v55, %v3882_v31 }
  0xca   :  { %vm173_vm13 = vcmp.eq.s32.totalorder %v151_v56, %v3882_v31  ;;  %v3250_v61 = vsel %vm174_vm14, 1.0, %v5335_v1 }
  0xcb   :  { %v3249_v58 = vsel %vm173_vm13, 1.0, %v5335_v1 }
  0xcc   :  { %3416 = vmatmul.mubr.msk.f32.gmra.mxu0 %vm216_vm0, %v3248_v57  ;;  %v160_v59 = vpop.permute.xlu1 %159 }
  0xcd   :  { %3418 = vmatprep.mubr.msk.f32.mxu0 %vm216_vm0, %v3249_v58  ;;  %v157_v60 = vpop.permute.xlu0 %156  ;;  %vm176_vm1 = vcmp.eq.s32.totalorder %v160_v59, %v3882_v31 }
  0xce   :  { %vm175_vm15 = vcmp.eq.s32.totalorder %v157_v60, %v3882_v31  ;;  %v3252_v63 = vsel %vm176_vm1, 1.0, %v5335_v1 }
  0xcf   :  { %v3251_v62 = vsel %vm175_vm15, 1.0, %v5335_v1 }
  0xd0   :  { %3419 = vmatmul.mubr.msk.f32.gmra.mxu0 %vm216_vm0, %v3250_v61 }
  0xd1   :  { %3421 = vmatprep.mubr.msk.f32.mxu0 %vm216_vm0, %v3251_v62 }
  0xd4   :  { %3422 = vmatmul.mubr.msk.f32.gmra.mxu0 %vm216_vm0, %v3252_v63  ;;  %vm430_vm0 = vcmask 261120  }
  0xd5   :  { %775 = vmatprep.mubr.f32.mxu0 %v5335_v1 }
  0xd8   :  { %776 = vmatmul.mubr.f32.vlgmr.msra.gmra.mxu0 %v5335_v1 }
  0xd9   :  { %781 = vmatprep.mubr.f32.mxu0 %v5335_v1  ;;  %872 = vmatpush1.msra.mxu0 %v3936_v5 }
  0xda   :  { %873 = vmatprep.subr.mxu0 %v3940_v6 }
  0xdb   :  { %874 = vmatpush1.msra.mxu0 %v3943_v7 }
  0xdc   :  { %782 = vmatmul.mubr.f32.gmra.mxu0 %v5335_v1  ;;  %875 = vmatprep.subr.mxu0 %v3946_v8 }
  0xdd   :  { %876 = vmatpush1.msra.mxu0 %v3949_v9  ;;  %919 = vmatprep.mubr.f32.mxu0 %v5335_v1 }
  0xde   :  { %877 = vmatprep.subr.mxu0 %v3952_v10 }
  0xdf   :  { %878 = vmatpush1.msra.mxu0 %v3955_v11 }
  0xe0   :  { %879 = vmatprep.subr.mxu0 %v3958_v12 }
  0xe1   :  { %880 = vmatpush1.msra.mxu0 %v3961_v13 }
  0xe2   :  { %881 = vmatprep.subr.mxu0 %v3964_v14 }
  0xe3   :  { %882 = vmatpush1.msra.mxu0 %v3967_v15 }
  0xe4   :  { %883 = vmatprep.subr.mxu0 %v3970_v16 }
  0xe5   :  { %884 = vmatpush1.msra.mxu0 %v3973_v17 }
  0xe6   :  { %885 = vmatprep.subr.mxu0 %v3976_v18 }
  0xe7   :  { %886 = vmatpush1.msra.mxu0 %v3979_v19 }
  0xe8   :  { %1157 = vmatprep.subr.mxu0 %v3933_v4 }
 0x178   :  { %v3402_v20 = vpop.f32.mrf.mxu0 }
 0x17a   :  { %v331_v21 = vpop.f32.mrf.mxu0 }
 0x17b   :  { %3269 = vmatmul.mubr.msk.f32.vlgmr.msra.gmra.mxu1 %vm430_vm0, %v331_v21 }
 0x17c   :  { %549 = vmatprep.mubr.f32.mxu1 %v5335_v1  ;;  %1015 = vmatpush1.msra.mxu1 %v3936_v5  ;;  %v3405_v22 = vpop.f32.mrf.mxu0 }
 0x17d   :  { %1016 = vmatprep.subr.mxu1 %v3940_v6 }
 0x17e   :  { %1017 = vmatpush1.msra.mxu1 %v3943_v7  ;;  %v341_v23 = vpop.f32.mrf.mxu0 }
 0x17f   :  { %3270 = vmatmul.mubr.msk.f32.gmra.mxu1 %vm430_vm0, %v3402_v20  ;;  %1018 = vmatprep.subr.mxu1 %v3946_v8 }
 0x180   :  { %555 = vmatprep.mubr.f32.mxu1 %v5335_v1  ;;  %1019 = vmatpush1.msra.mxu1 %v3949_v9  ;;  %v3408_v24 = vpop.f32.mrf.mxu0 }
 0x181   :  { %1020 = vmatprep.subr.mxu1 %v3952_v10 }
 0x182   :  { %1021 = vmatpush1.msra.mxu1 %v3955_v11  ;;  %v351_v25 = vpop.f32.mrf.mxu0 }
 0x183   :  { %3271 = vmatmul.mubr.msk.f32.gmra.mxu1 %vm430_vm0, %v341_v23  ;;  %1022 = vmatprep.subr.mxu1 %v3958_v12 }
 0x184   :  { %561 = vmatprep.mubr.f32.mxu1 %v5335_v1  ;;  %1023 = vmatpush1.msra.mxu1 %v3961_v13  ;;  %v3411_v26 = vpop.f32.mrf.mxu0 }
 0x185   :  { %1024 = vmatprep.subr.mxu1 %v3964_v14 }
 0x186   :  { %1025 = vmatpush1.msra.mxu1 %v3967_v15  ;;  %v361_v27 = vpop.f32.mrf.mxu0 }
 0x187   :  { %3272 = vmatmul.mubr.msk.f32.gmra.mxu1 %vm430_vm0, %v3405_v22  ;;  %1026 = vmatprep.subr.mxu1 %v3970_v16 }
 0x188   :  { %567 = vmatprep.mubr.f32.mxu1 %v5335_v1  ;;  %1027 = vmatpush1.msra.mxu1 %v3973_v17  ;;  %v3414_v28 = vpop.f32.mrf.mxu0 }
 0x189   :  { %1028 = vmatprep.subr.mxu1 %v3976_v18 }
 0x18a   :  { %1029 = vmatpush1.msra.mxu1 %v3979_v19  ;;  %v371_v29 = vpop.f32.mrf.mxu0 }
 0x18b   :  { %3273 = vmatmul.mubr.msk.f32.gmra.mxu1 %vm430_vm0, %v351_v25  ;;  %1300 = vmatprep.subr.mxu1 %v3933_v4 }
 0x18c   :  { %573 = vmatprep.mubr.f32.mxu1 %v5335_v1  ;;  %v3417_v32 = vpop.f32.mrf.mxu0 }
 0x18e   :  { %v381_v33 = vpop.f32.mrf.mxu0 }
 0x18f   :  { %3274 = vmatmul.mubr.msk.f32.gmra.mxu1 %vm430_vm0, %v3408_v24 }
 0x190   :  { %579 = vmatprep.mubr.f32.mxu1 %v5335_v1  ;;  %v3420_v34 = vpop.f32.mrf.mxu0 }
 0x192   :  { %v391_v35 = vpop.f32.mrf.mxu0 }
 0x193   :  { %3275 = vmatmul.mubr.msk.f32.gmra.mxu1 %vm430_vm0, %v361_v27 }
 0x194   :  { %585 = vmatprep.mubr.f32.mxu1 %v5335_v1  ;;  %v3423_v36 = vpop.f32.mrf.mxu0 }
 0x196   :  { %v401_v37 = vpop.f32.mrf.mxu0 }
 0x197   :  { %3276 = vmatmul.mubr.msk.f32.gmra.mxu1 %vm430_vm0, %v3411_v26 }
 0x198   :  { %591 = vmatprep.mubr.f32.mxu1 %v5335_v1 }
 0x19b   :  { %3277 = vmatmul.mubr.msk.f32.gmra.mxu1 %vm430_vm0, %v371_v29 }
 0x19c   :  { %597 = vmatprep.mubr.f32.mxu1 %v5335_v1 }
 0x19f   :  { %3278 = vmatmul.mubr.msk.f32.gmra.mxu1 %vm430_vm0, %v3414_v28 }
 0x1a0   :  { %603 = vmatprep.mubr.f32.mxu1 %v5335_v1 }
 0x1a3   :  { %3279 = vmatmul.mubr.msk.f32.gmra.mxu1 %vm430_vm0, %v381_v33 }
 0x1a4   :  { %609 = vmatprep.mubr.f32.mxu1 %v5335_v1 }
 0x1a7   :  { %3280 = vmatmul.mubr.msk.f32.gmra.mxu1 %vm430_vm0, %v3417_v32 }
 0x1a8   :  { %615 = vmatprep.mubr.f32.mxu1 %v5335_v1 }
 0x1ab   :  { %3281 = vmatmul.mubr.msk.f32.gmra.mxu1 %vm430_vm0, %v391_v35 }
 0x1ac   :  { %621 = vmatprep.mubr.f32.mxu1 %v5335_v1 }
 0x1af   :  { %3282 = vmatmul.mubr.msk.f32.gmra.mxu1 %vm430_vm0, %v3420_v34 }
 0x1b0   :  { %627 = vmatprep.mubr.f32.mxu1 %v5335_v1 }
 0x1b3   :  { %3283 = vmatmul.mubr.msk.f32.gmra.mxu1 %vm430_vm0, %v401_v37 }
 0x1b4   :  { %633 = vmatprep.mubr.f32.mxu1 %v5335_v1 }
 0x1b7   :  { %3284 = vmatmul.mubr.msk.f32.gmra.mxu1 %vm430_vm0, %v3423_v36 }
 0x1b8   :  { %1062 = vmatprep.mubr.f32.mxu1 %v5335_v1 }
 0x23b   :  { %v545_v44 = vpop.f32.mrf.mxu1 }
 0x23c   :  { %v4068_v30 = vadd.f32 %v545_v44, %v4061_v42 }
 0x23d   :  { %v547_v45 = vpop.f32.mrf.mxu1 }
 0x23e   :  { %640 = vst [vmem:[#allocation2] sm:$0xff] %v4068_v30  ;;  %v548_v46 = vadd.f32 %v547_v45, %v4065_v43 }
 0x23f   :  { %v551_v47 = vpop.f32.mrf.mxu1 }
 0x240   :  { %642 = vst.msk [vmem:[#allocation2 + $0x8] sm:$0xff] %vm641_vm2, %v548_v46  ;;  %v4074_v48 = vadd.f32 %v551_v47, %v4061_v42 }
 0x241   :  { %v553_v49 = vpop.f32.mrf.mxu1 }
 0x242   :  { %643 = vst [vmem:[#allocation2 + $0x10] sm:$0xff] %v4074_v48  ;;  %v554_v50 = vadd.f32 %v553_v49, %v4065_v43 }
 0x243   :  { %v557_v51 = vpop.f32.mrf.mxu1 }
 0x244   :  { %644 = vst.msk [vmem:[#allocation2 + $0x18] sm:$0xff] %vm641_vm2, %v554_v50  ;;  %v4080_v52 = vadd.f32 %v557_v51, %v4061_v42 }
 0x245   :  { %v559_v53 = vpop.f32.mrf.mxu1 }
 0x246   :  { %645 = vst [vmem:[#allocation2 + $0x20] sm:$0xff] %v4080_v52  ;;  %v560_v54 = vadd.f32 %v559_v53, %v4065_v43 }
 0x247   :  { %v563_v55 = vpop.f32.mrf.mxu1 }
 0x248   :  { %646 = vst.msk [vmem:[#allocation2 + $0x28] sm:$0xff] %vm641_vm2, %v560_v54  ;;  %v4086_v56 = vadd.f32 %v563_v55, %v4061_v42 }
 0x249   :  { %v565_v57 = vpop.f32.mrf.mxu1 }
 0x24a   :  { %647 = vst [vmem:[#allocation2 + $0x30] sm:$0xff] %v4086_v56  ;;  %v566_v58 = vadd.f32 %v565_v57, %v4065_v43 }
 0x24b   :  { %v569_v59 = vpop.f32.mrf.mxu1 }
 0x24c   :  { %648 = vst.msk [vmem:[#allocation2 + $0x38] sm:$0xff] %vm641_vm2, %v566_v58  ;;  %v4092_v60 = vadd.f32 %v569_v59, %v4061_v42 }
 0x24d   :  { %v571_v61 = vpop.f32.mrf.mxu1 }
 0x24e   :  { %v572_v62 = vadd.f32 %v571_v61, %v4065_v43 }
 0x24f   :  { %v575_v63 = vpop.f32.mrf.mxu1 }
 0x250   :  { %650 = vst.msk [vmem:[#allocation2 + $0x48] sm:$0xff] %vm641_vm2, %v572_v62  ;;  %v4097_v0 = vadd.f32 %v575_v63, %v4061_v42 }
 0x251   :  { %v577_v2 = vpop.f32.mrf.mxu1 }
 0x252   :  { %v578_v3 = vadd.f32 %v577_v2, %v4065_v43 }
 0x253   :  { %v581_v20 = vpop.f32.mrf.mxu1 }
 0x254   :  { %652 = vst.msk [vmem:[#allocation2 + $0x58] sm:$0xff] %vm641_vm2, %v578_v3  ;;  %v4102_v21 = vadd.f32 %v581_v20, %v4061_v42 }
 0x255   :  { %v583_v22 = vpop.f32.mrf.mxu1 }
 0x256   :  { %v584_v23 = vadd.f32 %v583_v22, %v4065_v43 }
 0x257   :  { %v587_v24 = vpop.f32.mrf.mxu1 }
 0x258   :  { %654 = vst.msk [vmem:[#allocation2 + $0x68] sm:$0xff] %vm641_vm2, %v584_v23  ;;  %v4109_v25 = vadd.f32 %v587_v24, %v4061_v42 }
 0x259   :  { %v589_v26 = vpop.f32.mrf.mxu1 }
 0x25a   :  { %v590_v27 = vadd.f32 %v589_v26, %v4065_v43 }
 0x25b   :  { %v593_v28 = vpop.f32.mrf.mxu1 }
 0x25c   :  { %656 = vst.msk [vmem:[#allocation2 + $0x78] sm:$0xff] %vm641_vm2, %v590_v27  ;;  %v4121_v32 = vadd.f32 %v593_v28, %v4061_v42 }
 0x25d   :  { %v595_v33 = vpop.f32.mrf.mxu1 }
 0x25e   :  { %v596_v34 = vadd.f32 %v595_v33, %v4065_v43  ;;  %v1133_v35 = vsel %vm4115_vm7, %v4121_v32, %v4102_v21  ;;  %v1276_v36 = vsel %vm4115_vm7, %v4102_v21, %v4121_v32  ;;  %v777_v33 = vpop.f32.mrf.mxu0 }
 0x25f   :  { %v599_v37 = vpop.f32.mrf.mxu1 }
 0x260   :  { %658 = vst.msk [vmem:[#allocation2 + $0x88] sm:$0xff] %vm641_vm2, %v596_v34  ;;  %v4134_v40 = vadd.f32 %v599_v37, %v4061_v42 }
 0x261   :  { %v601_v44 = vpop.f32.mrf.mxu1 }
 0x262   :  { %v602_v45 = vadd.f32 %v601_v44, %v4065_v43  ;;  %v1134_v46 = vsel %vm4115_vm7, %v4134_v40, %v4109_v25  ;;  %v1277_v47 = vsel %vm4115_vm7, %v4109_v25, %v4134_v40 }
 0x263   :  { %v605_v49 = vpop.f32.mrf.mxu1 }
 0x264   :  { %660 = vst.msk [vmem:[#allocation2 + $0x98] sm:$0xff] %vm641_vm2, %v602_v45  ;;  %v4147_v50 = vadd.f32 %v605_v49, %v4061_v42 }
 0x265   :  { %v607_v51 = vpop.f32.mrf.mxu1 }
 0x266   :  { %v608_v53 = vadd.f32 %v607_v51, %v4065_v43  ;;  %v990_v54 = vsel %vm4115_vm7, %v4147_v50, %v4092_v60  ;;  %v1419_v55 = vsel %vm4115_vm7, %v4092_v60, %v4147_v50 }
 0x267   :  { %v611_v57 = vpop.f32.mrf.mxu1 }
 0x268   :  { %662 = vst.msk [vmem:[#allocation2 + $0xa8] sm:$0xff] %vm641_vm2, %v608_v53  ;;  %v4160_v58 = vadd.f32 %v611_v57, %v4061_v42  ;;  %v779_v53 = vpop.f32.mrf.mxu0 }
 0x269   :  { %v613_v59 = vpop.f32.mrf.mxu1 }
 0x26a   :  { %v614_v61 = vadd.f32 %v613_v59, %v4065_v43  ;;  %v991_v62 = vsel %vm4115_vm7, %v4160_v58, %v4097_v0  ;;  %v1420_v63 = vsel %vm4115_vm7, %v4097_v0, %v4160_v58 }
 0x26b   :  { %v617_v2 = vpop.f32.mrf.mxu1 }
 0x26c   :  { %664 = vst.msk [vmem:[#allocation2 + $0xb8] sm:$0xff] %vm641_vm2, %v614_v61  ;;  %v4173_v3 = vadd.f32 %v617_v2, %v4061_v42 }
 0x26d   :  { %v619_v20 = vpop.f32.mrf.mxu1 }
 0x26e   :  { %v620_v22 = vadd.f32 %v619_v20, %v4065_v43  ;;  %v847_v23 = vsel %vm4115_vm7, %v4173_v3, %v4080_v52 }
 0x26f   :  { %v623_v24 = vpop.f32.mrf.mxu1 }
 0x270   :  { %666 = vst.msk [vmem:[#allocation2 + $0xc8] sm:$0xff] %vm641_vm2, %v620_v22  ;;  %v4182_v26 = vadd.f32 %v623_v24, %v4061_v42 }
 0x271   :  { %v625_v27 = vpop.f32.mrf.mxu1 }
 0x272   :  { %v626_v28 = vadd.f32 %v625_v27, %v4065_v43  ;;  %v848_v34 = vsel %vm4115_vm7, %v4182_v26, %v4086_v56  ;;  %v783_v27 = vpop.f32.mrf.mxu0 }
 0x273   :  { %v629_v37 = vpop.f32.mrf.mxu1 }
 0x274   :  { %668 = vst.msk [vmem:[#allocation2 + $0xd8] sm:$0xff] %vm641_vm2, %v626_v28  ;;  %v630_v44 = vadd.f32 %v629_v37, %v4061_v42 }
 0x275   :  { %v631_v45 = vpop.f32.mrf.mxu1 }
 0x276   :  { %669 = vst [vmem:[#allocation2 + $0xe0] sm:$0xff] %v630_v44  ;;  %v632_v49 = vadd.f32 %v631_v45, %v4065_v43  ;;  %v704_v51 = vsel %vm4115_vm7, %v630_v44, %v4068_v30 }
 0x277   :  { %v635_v57 = vpop.f32.mrf.mxu1  ;;  %v788_v59 = vadd.f32 %v777_v33, %v704_v51  ;;  %v785_v51 = vpop.f32.mrf.mxu0  ;;  %v4257_v52 = vld [vmem:[#allocation2 + $0xc8] sm:$0xff] }
 0x278   :  { %670 = vst.msk [vmem:[#allocation2 + $0xe8] sm:$0xff] %vm641_vm2, %v632_v49  ;;  %v636_v61 = vadd.f32 %v635_v57, %v4061_v42  ;;  %v697_v57 = vld [vmem:[#allocation2 + $0x8] sm:$0xff] }
 0x279   :  { %v637_v2 = vpop.f32.mrf.mxu1  ;;  %v3286_v20 = vmul.f32 -1.442695, %v788_v59 }
 0x27a   :  { %671 = vst [vmem:[#allocation2 + $0xf0] sm:$0xff] %v636_v61  ;;  %v638_v22 = vadd.f32 %v637_v2, %v4065_v43  ;;  %v705_v24 = vsel %vm4115_vm7, %v636_v61, %v4074_v48  ;;  %v4205_v43 = vld [vmem:[%s5327_s5] ss:$0 sm:$0xff]  ;;  %s3755_s5 = smov 64  }
 0x27b   :  { %3437 = vpow2.f32 %v3286_v20  ;;  %v789_v28 = vadd.f32 %v783_v27, %v705_v24  ;;  %v802_v48 = vadd.f32 %v4205_v43, %v779_v53  ;;  %v699_v27 = vld [vmem:[#allocation2 + $0x18] sm:$0xff] }
 0x27c   :  { %672 = vst.msk [vmem:[#allocation2 + $0xf8] sm:$0xff] %vm641_vm2, %v638_v22  ;;  %v803_v22 = vadd.f32 %v4205_v43, %v785_v51 }
 0x27d   :  { %v3287_v30 = vmul.f32 -1.442695, %v789_v28 }
 0x27f   :  { %3439 = vpow2.f32 %v3287_v30  ;;  %v701_v45 = vld [vmem:[#allocation2 + $0xe8] sm:$0xff] }
 0x280   :  { %v706_v61 = vsel %vm92_vm3, %v701_v45, %v697_v57 }
 0x283   :  { %v703_v20 = vld [vmem:[#allocation2 + $0xf8] sm:$0xff] }
 0x284   :  { %v707_v30 = vsel %vm92_vm3, %v703_v20, %v699_v27 }
 0x288   :  { %v3438_v33 = vpop.eup %3437 }
 0x289   :  { %v796_v37 = vadd.f32 1.0, %v3438_v33 }
 0x28b   :  { %3441 = vrcp.f32 %v796_v37 }
 0x28c   :  { %v3440_v42 = vpop.eup %3439 }
 0x28d   :  { %v797_v44 = vadd.f32 1.0, %v3440_v42 }
 0x28f   :  { %3443 = vrcp.f32 %v797_v44 }
 0x298   :  { %v3442_v49 = vpop.eup %3441 }
 0x299   :  { %v804_v59 = vmul.f32 %v3442_v49, %v802_v48  ;;  %v810_v42 = vsub.f32 1.0, %v3442_v49  ;;  %v822_v45 = vmul.f32 0.0, %v3442_v49 }
 0x29b   :  { %v806_v2 = vadd.f32 %v804_v59, %v706_v61 }
 0x29c   :  { %v3444_v24 = vpop.eup %3443 }
 0x29d   :  { %3445 = vtanh.f32 %v806_v2  ;;  %v805_v28 = vmul.f32 %v3444_v24, %v803_v22  ;;  %v811_v57 = vsub.f32 1.0, %v3444_v24  ;;  %v823_v61 = vmul.f32 0.0, %v3444_v24 }
 0x29f   :  { %v807_v33 = vadd.f32 %v805_v28, %v707_v30 }
 0x2a1   :  { %3447 = vtanh.f32 %v807_v33 }
 0x2aa   :  { %v3446_v53 = vpop.eup %3445 }
 0x2ab   :  { %814 = vrot.lane.b32.xlu0 %v3446_v53, %s3755_s5 }
 0x2ae   :  { %v3448_v37 = vpop.eup %3447 }
 0x2af   :  { %816 = vrot.lane.b32.xlu1 %v3448_v37, %s3755_s5 }
 0x31d   :  { %v815_v44 = vpop.permute.xlu0 %814 }
 0x31e   :  { %v820_v48 = vmul.f32 %v815_v44, %v810_v42 }
 0x320   :  { %v4215_v51 = vadd.f32 %v822_v45, %v820_v48 }
 0x321   :  { %v817_v59 = vpop.permute.xlu1 %816 }
 0x322   :  { %v821_v2 = vmul.f32 %v817_v59, %v811_v57  ;;  %828 = vrot.lane.b32.xlu0 %v4215_v51, %s3755_s5 }
 0x324   :  { %v4219_v20 = vadd.f32 %v823_v61, %v821_v2  ;;  %v4260_v61 = vld [vmem:[#allocation2 + $0x28] sm:$0xff] }
 0x325   :  { %v849_v56 = vsel %vm92_vm3, %v4257_v52, %v4260_v61 }
 0x326   :  { %830 = vrot.lane.b32.xlu1 %v4219_v20, %s3755_s5 }
 0x394   :  { %v829_v22 = vpop.permute.xlu0 %828 }
 0x395   :  { %834 = vst.msk [vmem:[#allocation3] sm:$0xff] %vm430_vm0, %v829_v22  ;;  %3288 = vmatmul.mubr.msk.f32.vlgmr.msra.gmra.mxu0 %vm641_vm2, %v829_v22 }
 0x396   :  { %837 = vst.msk [vmem:[#allocation3 + $0x70] sm:$0xff] %vm836_vm8, %v829_v22  ;;  %925 = vmatprep.mubr.f32.mxu0 %v5335_v1  ;;  %1158 = vmatpush1.msra.mxu0 %v3936_v5  ;;  %v4266_v22 = vld [vmem:[#allocation2 + $0xd8] sm:$0xff] }
 0x397   :  { %1159 = vmatprep.subr.mxu0 %v3940_v6 }
 0x398   :  { %v831_v49 = vpop.permute.xlu1 %830  ;;  %1160 = vmatpush1.msra.mxu0 %v3943_v7 }
 0x399   :  { %835 = vst.msk [vmem:[#allocation3 + $0x8] sm:$0xff] %vm430_vm0, %v831_v49  ;;  %3289 = vmatmul.mubr.msk.f32.gmra.mxu0 %vm641_vm2, %v831_v49  ;;  %1161 = vmatprep.subr.mxu0 %v3946_v8 }
 0x39a   :  { %838 = vst.msk [vmem:[#allocation3 + $0x78] sm:$0xff] %vm836_vm8, %v831_v49  ;;  %1162 = vmatpush1.msra.mxu0 %v3949_v9  ;;  %1205 = vmatprep.mubr.f32.mxu0 %v5335_v1 }
 0x39b   :  { %1163 = vmatprep.subr.mxu0 %v3952_v10 }
 0x39c   :  { %1164 = vmatpush1.msra.mxu0 %v3955_v11 }
 0x39d   :  { %1165 = vmatprep.subr.mxu0 %v3958_v12 }
 0x39e   :  { %1166 = vmatpush1.msra.mxu0 %v3961_v13 }
 0x39f   :  { %1167 = vmatprep.subr.mxu0 %v3964_v14 }
 0x3a0   :  { %1168 = vmatpush1.msra.mxu0 %v3967_v15 }
 0x3a1   :  { %1169 = vmatprep.subr.mxu0 %v3970_v16 }
 0x3a2   :  { %1170 = vmatpush1.msra.mxu0 %v3973_v17 }
 0x3a3   :  { %1171 = vmatprep.subr.mxu0 %v3976_v18 }
 0x3a4   :  { %1172 = vmatpush1.msra.mxu0 %v3979_v19 }
 0x3a5   :  { %1443 = vmatprep.subr.mxu0 %v3933_v4 }
 0x455   :  { %v921_v24 = vpop.f32.mrf.mxu0 }
 0x456   :  { %v932_v27 = vadd.f32 %v921_v24, %v847_v23 }
 0x457   :  { %v923_v28 = vpop.f32.mrf.mxu0 }
 0x458   :  { %v3290_v30 = vmul.f32 -1.442695, %v932_v27  ;;  %v946_v23 = vadd.f32 %v4205_v43, %v923_v28  ;;  %v4269_v27 = vld [vmem:[#allocation2 + $0x38] sm:$0xff] }
 0x459   :  { %v927_v33 = vpop.f32.mrf.mxu0 }
 0x45a   :  { %3449 = vpow2.f32 %v3290_v30  ;;  %v933_v53 = vadd.f32 %v927_v33, %v848_v34  ;;  %v850_v30 = vsel %vm92_vm3, %v4266_v22, %v4269_v27 }
 0x45b   :  { %v929_v59 = vpop.f32.mrf.mxu0 }
 0x45c   :  { %v3291_v37 = vmul.f32 -1.442695, %v933_v53  ;;  %v947_v49 = vadd.f32 %v4205_v43, %v929_v59 }
 0x45e   :  { %3451 = vpow2.f32 %v3291_v37 }
 0x467   :  { %v3450_v42 = vpop.eup %3449 }
 0x468   :  { %v940_v44 = vadd.f32 1.0, %v3450_v42 }
 0x46a   :  { %3453 = vrcp.f32 %v940_v44 }
 0x46b   :  { %v3452_v45 = vpop.eup %3451 }
 0x46c   :  { %v941_v48 = vadd.f32 1.0, %v3452_v45 }
 0x46e   :  { %3455 = vrcp.f32 %v941_v48 }
 0x477   :  { %v3454_v57 = vpop.eup %3453 }
 0x478   :  { %v948_v2 = vmul.f32 %v3454_v57, %v946_v23  ;;  %v954_v42 = vsub.f32 1.0, %v3454_v57  ;;  %v966_v45 = vmul.f32 %v3454_v57, %v4215_v51 }
 0x47a   :  { %v950_v34 = vadd.f32 %v948_v2, %v849_v56 }
 0x47b   :  { %v3456_v24 = vpop.eup %3455 }
 0x47c   :  { %3457 = vtanh.f32 %v950_v34  ;;  %v949_v28 = vmul.f32 %v3456_v24, %v947_v49  ;;  %v955_v59 = vsub.f32 1.0, %v3456_v24  ;;  %v967_v56 = vmul.f32 %v3456_v24, %v4219_v20 }
 0x47e   :  { %v951_v33 = vadd.f32 %v949_v28, %v850_v30 }
 0x480   :  { %3459 = vtanh.f32 %v951_v33 }
 0x489   :  { %v3458_v53 = vpop.eup %3457 }
 0x48a   :  { %958 = vrot.lane.b32.xlu0 %v3458_v53, %s3755_s5 }
 0x48d   :  { %v3460_v37 = vpop.eup %3459 }
 0x48e   :  { %960 = vrot.lane.b32.xlu1 %v3460_v37, %s3755_s5 }
 0x4fc   :  { %v959_v44 = vpop.permute.xlu0 %958 }
 0x4fd   :  { %v964_v48 = vmul.f32 %v959_v44, %v954_v42 }
 0x4ff   :  { %v4278_v23 = vadd.f32 %v966_v45, %v964_v48 }
 0x500   :  { %v961_v2 = vpop.permute.xlu1 %960 }
 0x501   :  { %v965_v34 = vmul.f32 %v961_v2, %v955_v59  ;;  %972 = vrot.lane.b32.xlu0 %v4278_v23, %s3755_s5  ;;  %v4321_v59 = vld [vmem:[#allocation2 + $0xa8] sm:$0xff] }
 0x503   :  { %v4283_v49 = vadd.f32 %v967_v56, %v965_v34  ;;  %v4324_v34 = vld [vmem:[#allocation2 + $0x48] sm:$0xff] }
 0x505   :  { %974 = vrot.lane.b32.xlu1 %v4283_v49, %s3755_s5 }
 0x573   :  { %v973_v28 = vpop.permute.xlu0 %972 }
 0x574   :  { %978 = vst.msk [vmem:[#allocation3 + $0x10] sm:$0xff] %vm430_vm0, %v973_v28  ;;  %3292 = vmatmul.mubr.msk.f32.vlgmr.msra.gmra.mxu1 %vm641_vm2, %v973_v28 }
 0x575   :  { %980 = vst.msk [vmem:[#allocation3 + $0x60] sm:$0xff] %vm836_vm8, %v973_v28  ;;  %1068 = vmatprep.mubr.f32.mxu1 %v5335_v1  ;;  %1301 = vmatpush1.msra.mxu1 %v3936_v5 }
 0x576   :  { %1302 = vmatprep.subr.mxu1 %v3940_v6 }
 0x577   :  { %v975_v51 = vpop.permute.xlu1 %974  ;;  %1303 = vmatpush1.msra.mxu1 %v3943_v7 }
 0x578   :  { %979 = vst.msk [vmem:[#allocation3 + $0x18] sm:$0xff] %vm430_vm0, %v975_v51  ;;  %3293 = vmatmul.mubr.msk.f32.gmra.mxu1 %vm641_vm2, %v975_v51  ;;  %1304 = vmatprep.subr.mxu1 %v3946_v8 }
 0x579   :  { %981 = vst.msk [vmem:[#allocation3 + $0x68] sm:$0xff] %vm836_vm8, %v975_v51  ;;  %1305 = vmatpush1.msra.mxu1 %v3949_v9  ;;  %1348 = vmatprep.mubr.f32.mxu1 %v5335_v1 }
 0x57a   :  { %1306 = vmatprep.subr.mxu1 %v3952_v10 }
 0x57b   :  { %1307 = vmatpush1.msra.mxu1 %v3955_v11 }
 0x57c   :  { %1308 = vmatprep.subr.mxu1 %v3958_v12 }
 0x57d   :  { %1309 = vmatpush1.msra.mxu1 %v3961_v13 }
 0x57e   :  { %1310 = vmatprep.subr.mxu1 %v3964_v14 }
 0x57f   :  { %1311 = vmatpush1.msra.mxu1 %v3967_v15 }
 0x580   :  { %1312 = vmatprep.subr.mxu1 %v3970_v16 }
 0x581   :  { %1313 = vmatpush1.msra.mxu1 %v3973_v17 }
 0x582   :  { %1314 = vmatprep.subr.mxu1 %v3976_v18 }
 0x583   :  { %1315 = vmatpush1.msra.mxu1 %v3979_v19 }
 0x584   :  { %1586 = vmatprep.subr.mxu1 %v3933_v4 }
 0x634   :  { %v1064_v20 = vpop.f32.mrf.mxu1 }
 0x635   :  { %v1075_v57 = vadd.f32 %v1064_v20, %v990_v54  ;;  %v4330_v20 = vld [vmem:[#allocation2 + $0xb8] sm:$0xff] }
 0x636   :  { %v1066_v24 = vpop.f32.mrf.mxu1 }
 0x637   :  { %v3294_v30 = vmul.f32 -1.442695, %v1075_v57  ;;  %v1089_v54 = vadd.f32 %v4205_v43, %v1066_v24 }
 0x638   :  { %v1070_v33 = vpop.f32.mrf.mxu1 }
 0x639   :  { %3461 = vpow2.f32 %v3294_v30  ;;  %v1076_v53 = vadd.f32 %v1070_v33, %v991_v62  ;;  %v992_v62 = vsel %vm92_vm3, %v4321_v59, %v4324_v34  ;;  %v4333_v33 = vld [vmem:[#allocation2 + $0x58] sm:$0xff] }
 0x63a   :  { %v1072_v56 = vpop.f32.mrf.mxu1 }
 0x63b   :  { %v3295_v37 = vmul.f32 -1.442695, %v1076_v53  ;;  %v1090_v57 = vadd.f32 %v4205_v43, %v1072_v56  ;;  %v993_v53 = vsel %vm92_vm3, %v4330_v20, %v4333_v33 }
 0x63d   :  { %3463 = vpow2.f32 %v3295_v37 }
 0x646   :  { %v3462_v42 = vpop.eup %3461 }
 0x647   :  { %v1083_v44 = vadd.f32 1.0, %v3462_v42 }
 0x649   :  { %3465 = vrcp.f32 %v1083_v44 }
 0x64a   :  { %v3464_v45 = vpop.eup %3463 }
 0x64b   :  { %v1084_v48 = vadd.f32 1.0, %v3464_v45 }
 0x64d   :  { %3467 = vrcp.f32 %v1084_v48 }
 0x656   :  { %v3466_v2 = vpop.eup %3465 }
 0x657   :  { %v1091_v28 = vmul.f32 %v3466_v2, %v1089_v54  ;;  %v1097_v45 = vsub.f32 1.0, %v3466_v2  ;;  %v1109_v54 = vmul.f32 %v3466_v2, %v4278_v23 }
 0x659   :  { %v1093_v51 = vadd.f32 %v1091_v28, %v992_v62 }
 0x65a   :  { %v3468_v30 = vpop.eup %3467 }
 0x65b   :  { %3469 = vtanh.f32 %v1093_v51  ;;  %v1092_v24 = vmul.f32 %v3468_v30, %v1090_v57  ;;  %v1098_v62 = vsub.f32 1.0, %v3468_v30  ;;  %v1110_v57 = vmul.f32 %v3468_v30, %v4283_v49 }
 0x65d   :  { %v1094_v37 = vadd.f32 %v1092_v24, %v993_v53 }
 0x65f   :  { %3471 = vtanh.f32 %v1094_v37 }
 0x668   :  { %v3470_v42 = vpop.eup %3469 }
 0x669   :  { %1101 = vrot.lane.b32.xlu0 %v3470_v42, %s3755_s5 }
 0x66c   :  { %v3472_v44 = vpop.eup %3471 }
 0x66d   :  { %1103 = vrot.lane.b32.xlu1 %v3472_v44, %s3755_s5 }
 0x6db   :  { %v1102_v48 = vpop.permute.xlu0 %1101 }
 0x6dc   :  { %v1107_v56 = vmul.f32 %v1102_v48, %v1097_v45 }
 0x6de   :  { %v4342_v28 = vadd.f32 %v1109_v54, %v1107_v56  ;;  %v4385_v56 = vld [vmem:[#allocation2 + $0x88] sm:$0xff] }
 0x6df   :  { %v1104_v51 = vpop.permute.xlu1 %1103 }
 0x6e0   :  { %v1108_v41 = vmul.f32 %v1104_v51, %v1098_v62  ;;  %1115 = vrot.lane.b32.xlu0 %v4342_v28, %s3755_s5 }
 0x6e2   :  { %v4347_v24 = vadd.f32 %v1110_v57, %v1108_v41  ;;  %v4388_v57 = vld [vmem:[#allocation2 + $0x68] sm:$0xff] }
 0x6e4   :  { %1117 = vrot.lane.b32.xlu1 %v4347_v24, %s3755_s5 }
 0x752   :  { %v1116_v53 = vpop.permute.xlu0 %1115 }
 0x753   :  { %1121 = vst.msk [vmem:[#allocation3 + $0x20] sm:$0xff] %vm430_vm0, %v1116_v53  ;;  %3296 = vmatmul.mubr.msk.f32.vlgmr.msra.gmra.mxu0 %vm641_vm2, %v1116_v53 }
 0x754   :  { %1123 = vst.msk [vmem:[#allocation3 + $0x50] sm:$0xff] %vm836_vm8, %v1116_v53  ;;  %1211 = vmatprep.mubr.f32.mxu0 %v5335_v1  ;;  %1444 = vmatpush1.msra.mxu0 %v3936_v5 }
 0x755   :  { %1445 = vmatprep.subr.mxu0 %v3940_v6 }
 0x756   :  { %v1118_v23 = vpop.permute.xlu1 %1117  ;;  %1446 = vmatpush1.msra.mxu0 %v3943_v7 }
 0x757   :  { %1122 = vst.msk [vmem:[#allocation3 + $0x28] sm:$0xff] %vm430_vm0, %v1118_v23  ;;  %3297 = vmatmul.mubr.msk.f32.gmra.mxu0 %vm641_vm2, %v1118_v23  ;;  %1447 = vmatprep.subr.mxu0 %v3946_v8 }
 0x758   :  { %1124 = vst.msk [vmem:[#allocation3 + $0x58] sm:$0xff] %vm836_vm8, %v1118_v23  ;;  %1448 = vmatpush1.msra.mxu0 %v3949_v9  ;;  %1491 = vmatprep.mubr.f32.mxu0 %v5335_v1 }
 0x759   :  { %1449 = vmatprep.subr.mxu0 %v3952_v10 }
 0x75a   :  { %1450 = vmatpush1.msra.mxu0 %v3955_v11 }
 0x75b   :  { %1451 = vmatprep.subr.mxu0 %v3958_v12 }
 0x75c   :  { %1452 = vmatpush1.msra.mxu0 %v3961_v13 }
 0x75d   :  { %1453 = vmatprep.subr.mxu0 %v3964_v14 }
 0x75e   :  { %1454 = vmatpush1.msra.mxu0 %v3967_v15 }
 0x75f   :  { %1455 = vmatprep.subr.mxu0 %v3970_v16 }
 0x760   :  { %1456 = vmatpush1.msra.mxu0 %v3973_v17 }
 0x761   :  { %1457 = vmatprep.subr.mxu0 %v3976_v18 }
 0x762   :  { %1458 = vmatpush1.msra.mxu0 %v3979_v19 }
 0x763   :  { %1729 = vmatprep.subr.mxu0 %v3933_v4 }
 0x813   :  { %v1207_v41 = vpop.f32.mrf.mxu0 }
 0x814   :  { %v1218_v49 = vadd.f32 %v1207_v41, %v1133_v35  ;;  %v4394_v41 = vld [vmem:[#allocation2 + $0x98] sm:$0xff] }
 0x815   :  { %v1209_v2 = vpop.f32.mrf.mxu0 }
 0x816   :  { %v3298_v30 = vmul.f32 -1.442695, %v1218_v49  ;;  %v1232_v35 = vadd.f32 %v4205_v43, %v1209_v2 }
 0x817   :  { %v1213_v37 = vpop.f32.mrf.mxu0 }
 0x818   :  { %3473 = vpow2.f32 %v3298_v30  ;;  %v1219_v42 = vadd.f32 %v1213_v37, %v1134_v46  ;;  %v1135_v46 = vsel %vm92_vm3, %v4385_v56, %v4388_v57  ;;  %v4397_v37 = vld [vmem:[#allocation2 + $0x78] sm:$0xff] }
 0x819   :  { %v1215_v51 = vpop.f32.mrf.mxu0  ;;  %v1279_v40 = vsel %vm92_vm3, %v4397_v37, %v4394_v41 }
 0x81a   :  { %v3299_v44 = vmul.f32 -1.442695, %v1219_v42  ;;  %v1233_v49 = vadd.f32 %v4205_v43, %v1215_v51  ;;  %v1136_v42 = vsel %vm92_vm3, %v4394_v41, %v4397_v37 }
 0x81c   :  { %3475 = vpow2.f32 %v3299_v44 }
 0x825   :  { %v3474_v4 = vpop.eup %3473 }
 0x826   :  { %v1226_v45 = vadd.f32 1.0, %v3474_v4 }
 0x828   :  { %3477 = vrcp.f32 %v1226_v45 }
 0x829   :  { %v3476_v48 = vpop.eup %3475 }
 0x82a   :  { %v1227_v54 = vadd.f32 1.0, %v3476_v48 }
 0x82c   :  { %3479 = vrcp.f32 %v1227_v54 }
 0x835   :  { %v3478_v62 = vpop.eup %3477 }
 0x836   :  { %v1234_v53 = vmul.f32 %v3478_v62, %v1232_v35  ;;  %v1240_v48 = vsub.f32 1.0, %v3478_v62  ;;  %v1252_v35 = vmul.f32 %v3478_v62, %v4342_v28 }
 0x838   :  { %v1236_v23 = vadd.f32 %v1234_v53, %v1135_v46 }
 0x839   :  { %v3480_v30 = vpop.eup %3479 }
 0x83a   :  { %3481 = vtanh.f32 %v1236_v23  ;;  %v1235_v2 = vmul.f32 %v3480_v30, %v1233_v49  ;;  %v1241_v46 = vsub.f32 1.0, %v3480_v30  ;;  %v1253_v49 = vmul.f32 %v3480_v30, %v4347_v24 }
 0x83c   :  { %v1237_v44 = vadd.f32 %v1235_v2, %v1136_v42 }
 0x83e   :  { %3483 = vtanh.f32 %v1237_v44 }
 0x847   :  { %v3482_v4 = vpop.eup %3481 }
 0x848   :  { %1244 = vrot.lane.b32.xlu0 %v3482_v4, %s3755_s5 }
 0x84b   :  { %v3484_v45 = vpop.eup %3483 }
 0x84c   :  { %1246 = vrot.lane.b32.xlu1 %v3484_v45, %s3755_s5 }
 0x8ba   :  { %v1245_v54 = vpop.permute.xlu0 %1244 }
 0x8bb   :  { %v1250_v51 = vmul.f32 %v1245_v54, %v1240_v48 }
 0x8bd   :  { %v4406_v53 = vadd.f32 %v1252_v35, %v1250_v51  ;;  %v3629_v51 = vld [vmem:[#allocation8 + $0x70] sm:$0xff] }
 0x8be   :  { %v1247_v23 = vpop.permute.xlu1 %1246 }
 0x8bf   :  { %v1251_v39 = vmul.f32 %v1247_v23, %v1241_v46  ;;  %1258 = vrot.lane.b32.xlu0 %v4406_v53, %s3755_s5  ;;  %v3631_v23 = vld [vmem:[#allocation8 + $0x60] sm:$0xff] }
 0x8c1   :  { %v4411_v2 = vadd.f32 %v1253_v49, %v1251_v39  ;;  %v1278_v39 = vsel %vm92_vm3, %v4388_v57, %v4385_v56  ;;  %v3632_v49 = vld [vmem:[#allocation8 + $0x58] sm:$0xff] }
 0x8c3   :  { %1260 = vrot.lane.b32.xlu1 %v4411_v2, %s3755_s5 }
 0x931   :  { %v1259_v42 = vpop.permute.xlu0 %1258 }
 0x932   :  { %1264 = vst.msk [vmem:[#allocation3 + $0x30] sm:$0xff] %vm430_vm0, %v1259_v42  ;;  %3300 = vmatmul.mubr.msk.f32.vlgmr.msra.gmra.mxu1 %vm641_vm2, %v1259_v42 }
 0x933   :  { %1266 = vst.msk [vmem:[#allocation3 + $0x40] sm:$0xff] %vm836_vm8, %v1259_v42  ;;  %1354 = vmatprep.mubr.f32.mxu1 %v5335_v1  ;;  %1587 = vmatpush1.msra.mxu1 %v3936_v5  ;;  %v3634_v42 = vld [vmem:[#allocation8 + $0x48] sm:$0xff] }
 0x934   :  { %1588 = vmatprep.subr.mxu1 %v3940_v6 }
 0x935   :  { %v1261_v28 = vpop.permute.xlu1 %1260  ;;  %1589 = vmatpush1.msra.mxu1 %v3943_v7 }
 0x936   :  { %1265 = vst.msk [vmem:[#allocation3 + $0x38] sm:$0xff] %vm430_vm0, %v1261_v28  ;;  %3301 = vmatmul.mubr.msk.f32.gmra.mxu1 %vm641_vm2, %v1261_v28  ;;  %1590 = vmatprep.subr.mxu1 %v3946_v8 }
 0x937   :  { %1267 = vst.msk [vmem:[#allocation3 + $0x48] sm:$0xff] %vm836_vm8, %v1261_v28  ;;  %1591 = vmatpush1.msra.mxu1 %v3949_v9  ;;  %1634 = vmatprep.mubr.f32.mxu1 %v5335_v1  ;;  %v3635_v28 = vld [vmem:[#allocation8 + $0x40] sm:$0xff] }
 0x938   :  { %1592 = vmatprep.subr.mxu1 %v3952_v10 }
 0x939   :  { %1593 = vmatpush1.msra.mxu1 %v3955_v11 }
 0x93a   :  { %1594 = vmatprep.subr.mxu1 %v3958_v12 }
 0x93b   :  { %1595 = vmatpush1.msra.mxu1 %v3961_v13 }
 0x93c   :  { %1596 = vmatprep.subr.mxu1 %v3964_v14 }
 0x93d   :  { %1597 = vmatpush1.msra.mxu1 %v3967_v15 }
 0x93e   :  { %1598 = vmatprep.subr.mxu1 %v3970_v16 }
 0x93f   :  { %1599 = vmatpush1.msra.mxu1 %v3973_v17 }
 0x940   :  { %1600 = vmatprep.subr.mxu1 %v3976_v18 }
 0x941   :  { %1601 = vmatpush1.msra.mxu1 %v3979_v19 }
 0x9f2   :  { %v1350_v5 = vpop.f32.mrf.mxu1 }
 0x9f3   :  { %v1361_v6 = vadd.f32 %v1350_v5, %v1276_v36  ;;  %v3636_v5 = vld [vmem:[#allocation8 + $0x38] sm:$0xff] }
 0x9f4   :  { %v1352_v7 = vpop.f32.mrf.mxu1 }
 0x9f5   :  { %v3302_v8 = vmul.f32 -1.442695, %v1361_v6  ;;  %v1375_v16 = vadd.f32 %v4205_v43, %v1352_v7  ;;  %v3637_v6 = vld [vmem:[#allocation8 + $0x30] sm:$0xff]  ;;  %v3638_v7 = vld [vmem:[#allocation8 + $0x28] sm:$0xff] }
 0x9f6   :  { %v1356_v9 = vpop.f32.mrf.mxu1 }
 0x9f7   :  { %3485 = vpow2.f32 %v3302_v8  ;;  %v1362_v10 = vadd.f32 %v1356_v9, %v1277_v47  ;;  %v3639_v8 = vld [vmem:[#allocation8 + $0x20] sm:$0xff]  ;;  %v3640_v9 = vld [vmem:[#allocation8 + $0x18] sm:$0xff] }
 0x9f8   :  { %v1358_v18 = vpop.f32.mrf.mxu1 }
 0x9f9   :  { %v3303_v11 = vmul.f32 -1.442695, %v1362_v10  ;;  %v1376_v25 = vadd.f32 %v4205_v43, %v1358_v18  ;;  %v3641_v10 = vld [vmem:[#allocation8 + $0x10] sm:$0xff] }
 0x9fb   :  { %3487 = vpow2.f32 %v3303_v11  ;;  %v3642_v11 = vld [vmem:[#allocation8 + $0x8] sm:$0xff] }
 0xa04   :  { %v3486_v12 = vpop.eup %3485 }
 0xa05   :  { %v1369_v13 = vadd.f32 1.0, %v3486_v12  ;;  %v3643_v12 = vld [vmem:[#allocation8] sm:$0xff] }
 0xa07   :  { %3489 = vrcp.f32 %v1369_v13 }
 0xa08   :  { %v3488_v14 = vpop.eup %3487 }
 0xa09   :  { %v1370_v15 = vadd.f32 1.0, %v3488_v14 }
 0xa0b   :  { %3491 = vrcp.f32 %v1370_v15 }
 0xa14   :  { %v3490_v17 = vpop.eup %3489 }
 0xa15   :  { %v1377_v19 = vmul.f32 %v3490_v17, %v1375_v16  ;;  %v1383_v56 = vsub.f32 1.0, %v3490_v17  ;;  %v1395_v30 = vmul.f32 %v3490_v17, %v4406_v53  ;;  %v3630_v53 = vld [vmem:[#allocation8 + $0x68] sm:$0xff] }
 0xa17   :  { %v1379_v21 = vadd.f32 %v1377_v19, %v1278_v39 }
 0xa18   :  { %v3492_v32 = vpop.eup %3491 }
 0xa19   :  { %3493 = vtanh.f32 %v1379_v21  ;;  %v1378_v36 = vmul.f32 %v3492_v32, %v1376_v25  ;;  %v1384_v45 = vsub.f32 1.0, %v3492_v32  ;;  %v1396_v54 = vmul.f32 %v3492_v32, %v4411_v2  ;;  %v3633_v2 = vld [vmem:[#allocation8 + $0x50] sm:$0xff] }
 0xa1b   :  { %v1380_v47 = vadd.f32 %v1378_v36, %v1279_v40  ;;  %v1421_v40 = vsel %vm92_vm3, %v4324_v34, %v4321_v59 }
 0xa1d   :  { %3495 = vtanh.f32 %v1380_v47 }
 0xa26   :  { %v3494_v24 = vpop.eup %3493 }
 0xa27   :  { %1387 = vrot.lane.b32.xlu0 %v3494_v24, %s3755_s5  ;;  %v1422_v24 = vsel %vm92_vm3, %v4333_v33, %v4330_v20 }
 0xa2a   :  { %v3496_v62 = vpop.eup %3495 }
 0xa2b   :  { %1389 = vrot.lane.b32.xlu1 %v3496_v62, %s3755_s5 }
 0xa99   :  { %v1388_v57 = vpop.permute.xlu0 %1387 }
 0xa9a   :  { %v1393_v44 = vmul.f32 %v1388_v57, %v1383_v56 }
 0xa9c   :  { %v4461_v4 = vadd.f32 %v1395_v30, %v1393_v44 }
 0xa9d   :  { %v1390_v48 = vpop.permute.xlu1 %1389 }
 0xa9e   :  { %v1394_v41 = vmul.f32 %v1390_v48, %v1384_v45  ;;  %1401 = vrot.lane.b32.xlu0 %v4461_v4, %s3755_s5 }
 0xaa0   :  { %v4466_v37 = vadd.f32 %v1396_v54, %v1394_v41 }
 0xaa2   :  { %1403 = vrot.lane.b32.xlu1 %v4466_v37, %s3755_s5 }
 0xb10   :  { %v1402_v35 = vpop.permute.xlu0 %1401 }
 0xb11   :  { %1407 = vst.msk [vmem:[#allocation3 + $0x40] sm:$0xff] %vm430_vm0, %v1402_v35  ;;  %3304 = vmatmul.mubr.msk.f32.vlgmr.msra.gmra.mxu0 %vm641_vm2, %v1402_v35 }
 0xb12   :  { %1409 = vst.msk [vmem:[#allocation3 + $0x30] sm:$0xff] %vm836_vm8, %v1402_v35  ;;  %1497 = vmatprep.mubr.f32.mxu0 %v5335_v1  ;;  %1730 = vmatpush1.msra.mxu0 %v3629_v51 }
 0xb13   :  { %1731 = vmatprep.subr.mxu0 %v3630_v53 }
 0xb14   :  { %v1404_v46 = vpop.permute.xlu1 %1403  ;;  %1732 = vmatpush1.msra.mxu0 %v3631_v23 }
 0xb15   :  { %1408 = vst.msk [vmem:[#allocation3 + $0x48] sm:$0xff] %vm430_vm0, %v1404_v46  ;;  %3305 = vmatmul.mubr.msk.f32.gmra.mxu0 %vm641_vm2, %v1404_v46  ;;  %1733 = vmatprep.subr.mxu0 %v3632_v49 }
 0xb16   :  { %1410 = vst.msk [vmem:[#allocation3 + $0x38] sm:$0xff] %vm836_vm8, %v1404_v46  ;;  %1734 = vmatpush1.msra.mxu0 %v3633_v2  ;;  %1777 = vmatprep.mubr.f32.mxu0 %v5335_v1  ;;  %v1560_v2 = vld [vmem:[#allocation2 + $0x30] sm:$0xff] }
 0xb17   :  { %1735 = vmatprep.subr.mxu0 %v3634_v42  ;;  %v1563_v42 = vsel %vm4115_vm7, %v1560_v2, %v4182_v26  ;;  %v1564_v26 = vsel %vm92_vm3, %v4260_v61, %v4257_v52  ;;  %v1700_v2 = vld [vmem:[#allocation2 + $0xf8] sm:$0xff] }
 0xb18   :  { %1736 = vmatpush1.msra.mxu0 %v3635_v28 }
 0xb19   :  { %1737 = vmatprep.subr.mxu0 %v3636_v5 }
 0xb1a   :  { %1738 = vmatpush1.msra.mxu0 %v3637_v6 }
 0xb1b   :  { %1739 = vmatprep.subr.mxu0 %v3638_v7 }
 0xb1c   :  { %1740 = vmatpush1.msra.mxu0 %v3639_v8 }
 0xb1d   :  { %1741 = vmatprep.subr.mxu0 %v3640_v9 }
 0xb1e   :  { %1742 = vmatpush1.msra.mxu0 %v3641_v10 }
 0xb1f   :  { %1743 = vmatprep.subr.mxu0 %v3642_v11 }
 0xb20   :  { %1744 = vmatpush1.msra.mxu0 %v3643_v12 }
 0xbd1   :  { %v1493_v13 = vpop.f32.mrf.mxu0 }
 0xbd2   :  { %v1504_v14 = vadd.f32 %v1493_v13, %v1419_v55 }
 0xbd3   :  { %v1495_v15 = vpop.f32.mrf.mxu0 }
 0xbd4   :  { %v3306_v16 = vmul.f32 -1.442695, %v1504_v14  ;;  %v1518_v60 = vadd.f32 %v4205_v43, %v1495_v15 }
 0xbd5   :  { %v1499_v17 = vpop.f32.mrf.mxu0 }
 0xbd6   :  { %3497 = vpow2.f32 %v3306_v16  ;;  %v1505_v18 = vadd.f32 %v1499_v17, %v1420_v63 }
 0xbd7   :  { %v1501_v55 = vpop.f32.mrf.mxu0 }
 0xbd8   :  { %v3307_v19 = vmul.f32 -1.442695, %v1505_v18  ;;  %v1519_v58 = vadd.f32 %v4205_v43, %v1501_v55  ;;  %v1565_v18 = vsel %vm92_vm3, %v4269_v27, %v4266_v22 }
 0xbda   :  { %3499 = vpow2.f32 %v3307_v19 }
 0xbe3   :  { %v3498_v39 = vpop.eup %3497 }
 0xbe4   :  { %v1512_v21 = vadd.f32 1.0, %v3498_v39 }
 0xbe6   :  { %3501 = vrcp.f32 %v1512_v21 }
 0xbe7   :  { %v3500_v25 = vpop.eup %3499 }
 0xbe8   :  { %v1513_v32 = vadd.f32 1.0, %v3500_v25 }
 0xbea   :  { %3503 = vrcp.f32 %v1513_v32 }
 0xbf3   :  { %v3502_v50 = vpop.eup %3501 }
 0xbf4   :  { %v1520_v36 = vmul.f32 %v3502_v50, %v1518_v60  ;;  %v1526_v59 = vsub.f32 1.0, %v3502_v50  ;;  %v1538_v30 = vmul.f32 %v3502_v50, %v4461_v4 }
 0xbf6   :  { %v1522_v0 = vadd.f32 %v1520_v36, %v1421_v40 }
 0xbf7   :  { %v3504_v63 = vpop.eup %3503 }
 0xbf8   :  { %3505 = vtanh.f32 %v1522_v0  ;;  %v1521_v47 = vmul.f32 %v3504_v63, %v1519_v58  ;;  %v1527_v48 = vsub.f32 1.0, %v3504_v63  ;;  %v1539_v41 = vmul.f32 %v3504_v63, %v4466_v37  ;;  %v1558_v37 = vld [vmem:[#allocation2 + $0x20] sm:$0xff] }
 0xbf9   :  { %v1562_v51 = vsel %vm4115_vm7, %v1558_v37, %v4173_v3  ;;  %v1697_v58 = vld [vmem:[#allocation2 + $0xe0] sm:$0xff] }
 0xbfa   :  { %v1523_v62 = vadd.f32 %v1521_v47, %v1422_v24  ;;  %v1701_v63 = vld [vmem:[#allocation2] sm:$0xff] }
 0xbfb   :  { %v1705_v47 = vsel %vm4115_vm7, %v1701_v63, %v1697_v58 }
 0xbfc   :  { %3507 = vtanh.f32 %v1523_v62 }
 0xc05   :  { %v3506_v56 = vpop.eup %3505 }
 0xc06   :  { %1530 = vrot.lane.b32.xlu0 %v3506_v56, %s3755_s5  ;;  %v1699_v56 = vld [vmem:[#allocation2 + $0xf0] sm:$0xff] }
 0xc09   :  { %v3508_v57 = vpop.eup %3507 }
 0xc0a   :  { %1532 = vrot.lane.b32.xlu1 %v3508_v57, %s3755_s5 }
 0xc78   :  { %v1531_v34 = vpop.permute.xlu0 %1530 }
 0xc79   :  { %v1536_v44 = vmul.f32 %v1531_v34, %v1526_v59  ;;  %v1703_v34 = vld [vmem:[#allocation2 + $0x10] sm:$0xff] }
 0xc7b   :  { %v1540_v45 = vadd.f32 %v1538_v30, %v1536_v44  ;;  %v1706_v30 = vsel %vm4115_vm7, %v1703_v34, %v1699_v56  ;;  %v4596_v56 = vld [vmem:[%s5330_s8 + $0x50] sm:$0xff]  ;;  %v4614_v34 = vld [vmem:[%s5330_s8 + $0x38] sm:$0xff] }
 0xc7c   :  { %v1533_v54 = vpop.permute.xlu1 %1532 }
 0xc7d   :  { %v1537_v35 = vmul.f32 %v1533_v54, %v1527_v48  ;;  %1544 = vrot.lane.b32.xlu0 %v1540_v45, %s3755_s5 }
 0xc7f   :  { %v1541_v20 = vadd.f32 %v1539_v41, %v1537_v35 }
 0xc81   :  { %1546 = vrot.lane.b32.xlu1 %v1541_v20, %s3755_s5 }
 0xcef   :  { %v1545_v33 = vpop.permute.xlu0 %1544 }
 0xcf0   :  { %1550 = vst.msk [vmem:[#allocation3 + $0x50] sm:$0xff] %vm430_vm0, %v1545_v33  ;;  %3308 = vmatmul.mubr.msk.f32.vlgmr.msra.gmra.mxu1 %vm641_vm2, %v1545_v33 }
 0xcf1   :  { %1552 = vst.msk [vmem:[#allocation3 + $0x20] sm:$0xff] %vm836_vm8, %v1545_v33  ;;  %1640 = vmatprep.mubr.f32.mxu1 %v5335_v1  ;;  %v1698_v33 = vld [vmem:[#allocation2 + $0xe8] sm:$0xff] }
 0xcf3   :  { %v1547_v4 = vpop.permute.xlu1 %1546 }
 0xcf4   :  { %1551 = vst.msk [vmem:[#allocation3 + $0x58] sm:$0xff] %vm430_vm0, %v1547_v4  ;;  %3309 = vmatmul.mubr.msk.f32.gmra.mxu1 %vm641_vm2, %v1547_v4 }
 0xcf5   :  { %1553 = vst.msk [vmem:[#allocation3 + $0x28] sm:$0xff] %vm836_vm8, %v1547_v4  ;;  %1996 = vmatprep.mubr.f32.mxu1 %v5335_v1 }
 0xdb0   :  { %v1636_v53 = vpop.f32.mrf.mxu1 }
 0xdb1   :  { %v1647_v46 = vadd.f32 %v1636_v53, %v1562_v51  ;;  %v1702_v53 = vld [vmem:[#allocation2 + $0x8] sm:$0xff] }
 0xdb2   :  { %v1638_v23 = vpop.f32.mrf.mxu1 }
 0xdb3   :  { %v3310_v49 = vmul.f32 -1.442695, %v1647_v46  ;;  %v1661_v3 = vadd.f32 %v4205_v43, %v1638_v23  ;;  %v1707_v23 = vsel %vm92_vm3, %v1702_v53, %v1698_v33 }
 0xdb4   :  { %v1642_v28 = vpop.f32.mrf.mxu1 }
 0xdb5   :  { %3509 = vpow2.f32 %v3310_v49  ;;  %v1648_v5 = vadd.f32 %v1642_v28, %v1563_v42 }
 0xdb6   :  { %v1644_v12 = vpop.f32.mrf.mxu1 }
 0xdb7   :  { %v3311_v6 = vmul.f32 -1.442695, %v1648_v5  ;;  %v1662_v15 = vadd.f32 %v4205_v43, %v1644_v12  ;;  %v1704_v5 = vld [vmem:[#allocation2 + $0x18] sm:$0xff]  ;;  %v1867_v12 = vld [vmem:[#allocation9 + $0x58] sm:$0xff] }
 0xdb9   :  { %3511 = vpow2.f32 %v3311_v6 }
 0xdc2   :  { %v3510_v7 = vpop.eup %3509 }
 0xdc3   :  { %v1655_v8 = vadd.f32 1.0, %v3510_v7  ;;  %v1708_v7 = vsel %vm92_vm3, %v1704_v5, %v1700_v2  ;;  %v1847_v2 = vld [vmem:[#allocation3 + $0x38] sm:$0xff]  ;;  %v1850_v5 = vld [vmem:[#allocation3 + $0x50] sm:$0xff] }
 0xdc5   :  { %3513 = vrcp.f32 %v1655_v8 }
 0xdc6   :  { %v3512_v9 = vpop.eup %3511 }
 0xdc7   :  { %v1656_v10 = vadd.f32 1.0, %v3512_v9  ;;  %v1871_v9 = vld [vmem:[#allocation9 + $0x78] sm:$0xff] }
 0xdc8   :  { %1948 = vmatprep.subr.mxu1 %v1871_v9 }
 0xdc9   :  { %3515 = vrcp.f32 %v1656_v10  ;;  %v1870_v10 = vld [vmem:[#allocation9 + $0x70] sm:$0xff] }
 0xdca   :  { %1949 = vmatpush1.msra.mxu1 %v1870_v10 }
 0xdd2   :  { %v3514_v11 = vpop.eup %3513 }
 0xdd3   :  { %v1663_v13 = vmul.f32 %v3514_v11, %v1661_v3  ;;  %v1669_v52 = vsub.f32 1.0, %v3514_v11  ;;  %v1681_v25 = vmul.f32 %v3514_v11, %v1540_v45  ;;  %v1869_v3 = vld [vmem:[#allocation9 + $0x68] sm:$0xff]  ;;  %v1868_v11 = vld [vmem:[#allocation9 + $0x60] sm:$0xff] }
 0xdd4   :  { %1950 = vmatprep.subr.mxu1 %v1869_v3  ;;  %v1872_v3 = vld [vmem:[%s5329_s7] sm:$0x3] }
 0xdd5   :  { %v1665_v14 = vadd.f32 %v1663_v13, %v1564_v26  ;;  %v1866_v13 = vld [vmem:[#allocation9 + $0x50] sm:$0xff]  ;;  %1951 = vmatpush1.msra.mxu1 %v1868_v11  ;;  %v5343_v11 = vsub.s32 0, %v4052_v38 }
 0xdd6   :  { %v3516_v16 = vpop.eup %3515  ;;  %1952 = vmatprep.subr.mxu1 %v1867_v12 }
 0xdd7   :  { %3517 = vtanh.f32 %v1665_v14  ;;  %v1664_v17 = vmul.f32 %v3516_v16, %v1662_v15  ;;  %v1670_v50 = vsub.f32 1.0, %v3516_v16  ;;  %v1682_v36 = vmul.f32 %v3516_v16, %v1541_v20  ;;  %v1864_v14 = vld [vmem:[#allocation9 + $0x40] sm:$0xff]  ;;  %1953 = vmatpush1.msra.mxu1 %v1866_v13  ;;  %v1863_v16 = vld [vmem:[#allocation9 + $0x38] sm:$0xff] }
 0xdd8   :  { %v4737_v12 = vrot.slane %v1872_v3, %v5343_v11  ;;  %v5344_v13 = vsub.s32 1, %v4052_v38 }
 0xdd9   :  { %v1666_v19 = vadd.f32 %v1664_v17, %v1565_v18  ;;  %v1862_v17 = vld [vmem:[#allocation9 + $0x30] sm:$0xff]  ;;  %v1861_v18 = vld [vmem:[#allocation9 + $0x28] sm:$0xff] }
 0xddb   :  { %3519 = vtanh.f32 %v1666_v19  ;;  %v1860_v19 = vld [vmem:[#allocation9 + $0x20] sm:$0xff] }
 0xde4   :  { %v3518_v39 = vpop.eup %3517 }
 0xde5   :  { %1673 = vrot.lane.b32.xlu0 %v3518_v39, %s3755_s5  ;;  %v1859_v39 = vld [vmem:[#allocation9 + $0x18] sm:$0xff] }
 0xde8   :  { %v3520_v21 = vpop.eup %3519 }
 0xde9   :  { %1675 = vrot.lane.b32.xlu1 %v3520_v21, %s3755_s5  ;;  %v1858_v21 = vld [vmem:[#allocation9 + $0x10] sm:$0xff] }
 0xe57   :  { %v1674_v61 = vpop.permute.xlu0 %1673 }
 0xe58   :  { %v1679_v32 = vmul.f32 %v1674_v61, %v1669_v52  ;;  %v1857_v52 = vld [vmem:[#allocation9 + $0x8] sm:$0xff]  ;;  %v1856_v61 = vld [vmem:[#allocation9] sm:$0xff] }
 0xe5a   :  { %v4530_v60 = vadd.f32 %v1681_v25, %v1679_v32 }
 0xe5b   :  { %v1676_v55 = vpop.permute.xlu1 %1675 }
 0xe5c   :  { %v1680_v40 = vmul.f32 %v1676_v55, %v1670_v50  ;;  %1687 = vrot.lane.b32.xlu0 %v4530_v60, %s3755_s5 }
 0xe5e   :  { %v4534_v22 = vadd.f32 %v1682_v36, %v1680_v40 }
 0xe60   :  { %1689 = vrot.lane.b32.xlu1 %v4534_v22, %s3755_s5 }
 0xece   :  { %v1688_v27 = vpop.permute.xlu0 %1687 }
 0xecf   :  { %1693 = vst.msk [vmem:[#allocation3 + $0x60] sm:$0xff] %vm430_vm0, %v1688_v27  ;;  %3312 = vmatmul.mubr.msk.f32.vlgmr.msra.gmra.mxu0 %vm641_vm2, %v1688_v27 }
 0xed0   :  { %1695 = vst.msk [vmem:[#allocation3 + $0x10] sm:$0xff] %vm836_vm8, %v1688_v27  ;;  %1783 = vmatprep.mubr.f32.mxu0 %v5335_v1 }
 0xed2   :  { %v1690_v0 = vpop.permute.xlu1 %1689 }
 0xed3   :  { %1694 = vst.msk [vmem:[#allocation3 + $0x68] sm:$0xff] %vm430_vm0, %v1690_v0  ;;  %3313 = vmatmul.mubr.msk.f32.gmra.mxu0 %vm641_vm2, %v1690_v0 }
 0xed4   :  { %1696 = vst.msk [vmem:[#allocation3 + $0x18] sm:$0xff] %vm836_vm8, %v1690_v0  ;;  %2224 = vmatprep.mubr.f32.mxu0 %v5335_v1 }
 0xedb   :  { %v1843_v53 = vld [vmem:[#allocation3 + $0x18] sm:$0xff] }
 0xf8f   :  { %v1779_v24 = vpop.f32.mrf.mxu0 }
 0xf90   :  { %v1790_v62 = vadd.f32 %v1779_v24, %v1705_v47  ;;  %v4565_v47 = vld [vmem:[%s5330_s8 + $0x78] sm:$0xff]  ;;  %v4584_v24 = vld [vmem:[%s5330_s8 + $0x60] sm:$0xff] }
 0xf91   :  { %v1781_v57 = vpop.f32.mrf.mxu0  ;;  %2176 = vmatprep.subr.mxu0 %v4565_v47 }
 0xf92   :  { %v3314_v59 = vmul.f32 -1.442695, %v1790_v62  ;;  %v1804_v4 = vadd.f32 %v4205_v43, %v1781_v57  ;;  %v4590_v62 = vld [vmem:[%s5330_s8 + $0x58] sm:$0xff]  ;;  %v4602_v57 = vld [vmem:[%s5330_s8 + $0x48] sm:$0xff] }
 0xf93   :  { %v1785_v44 = vpop.f32.mrf.mxu0 }
 0xf94   :  { %3521 = vpow2.f32 %v3314_v59  ;;  %v1791_v45 = vadd.f32 %v1785_v44, %v1706_v30  ;;  %v4608_v59 = vld [vmem:[%s5330_s8 + $0x40] sm:$0xff]  ;;  %v4620_v30 = vld [vmem:[%s5330_s8 + $0x30] sm:$0xff]  ;;  %v4626_v44 = vld [vmem:[%s5330_s8 + $0x28] sm:$0xff] }
 0xf95   :  { %v1787_v51 = vpop.f32.mrf.mxu0 }
 0xf96   :  { %v3315_v48 = vmul.f32 -1.442695, %v1791_v45  ;;  %v1805_v42 = vadd.f32 %v4205_v43, %v1787_v51  ;;  %v1865_v43 = vld [vmem:[#allocation9 + $0x48] sm:$0xff]  ;;  %v1842_v51 = vld [vmem:[#allocation3 + $0x10] sm:$0xff] }
 0xf97   :  { %1954 = vmatprep.subr.mxu1 %v1865_v43  ;;  %v4632_v45 = vld [vmem:[%s5330_s8 + $0x20] sm:$0xff] }
 0xf98   :  { %3523 = vpow2.f32 %v3315_v48  ;;  %1955 = vmatpush1.msra.mxu1 %v1864_v14  ;;  %v4638_v48 = vld [vmem:[%s5330_s8 + $0x18] sm:$0xff] }
 0xf99   :  { %1956 = vmatprep.subr.mxu1 %v1863_v16 }
 0xf9a   :  { %1957 = vmatpush1.msra.mxu1 %v1862_v17 }
 0xf9b   :  { %1958 = vmatprep.subr.mxu1 %v1861_v18 }
 0xf9c   :  { %1959 = vmatpush1.msra.mxu1 %v1860_v19 }
 0xf9d   :  { %1960 = vmatprep.subr.mxu1 %v1859_v39 }
 0xf9e   :  { %1961 = vmatpush1.msra.mxu1 %v1858_v21 }
 0xf9f   :  { %1962 = vmatprep.subr.mxu1 %v1857_v52 }
 0xfa0   :  { %1963 = vmatpush1.msra.mxu1 %v1856_v61 }
 0xfa1   :  { %v3522_v54 = vpop.eup %3521  ;;  %2724 = vmatprep.subr.mxu1 %v4565_v47 }
 0xfa2   :  { %v1798_v41 = vadd.f32 1.0, %v3522_v54  ;;  %v4644_v54 = vld [vmem:[%s5330_s8 + $0x10] sm:$0xff] }
 0xfa4   :  { %3525 = vrcp.f32 %v1798_v41  ;;  %v4650_v41 = vld [vmem:[%s5330_s8 + $0x8] sm:$0xff] }
 0xfa5   :  { %v3524_v35 = vpop.eup %3523 }
 0xfa6   :  { %v1799_v20 = vadd.f32 1.0, %v3524_v35  ;;  %v4656_v35 = vld [vmem:[%s5330_s8] sm:$0xff] }
 0xfa8   :  { %3527 = vrcp.f32 %v1799_v20 }
 0xfb1   :  { %v3526_v37 = vpop.eup %3525 }
 0xfb2   :  { %v1806_v46 = vmul.f32 %v3526_v37, %v1804_v4  ;;  %v1812_v25 = vsub.f32 1.0, %v3526_v37  ;;  %v1824_v50 = vmul.f32 %v3526_v37, %v4530_v60  ;;  %v4571_v60 = vld [vmem:[%s5330_s8 + $0x70] sm:$0xff] }
 0xfb3   :  { %2177 = vmatpush1.msra.mxu0 %v4571_v60 }
 0xfb4   :  { %v1808_v49 = vadd.f32 %v1806_v46, %v1707_v23  ;;  %v1844_v46 = vld [vmem:[#allocation3 + $0x20] sm:$0xff]  ;;  %v1845_v23 = vld [vmem:[#allocation3 + $0x28] sm:$0xff] }
 0xfb5   :  { %v3528_v28 = vpop.eup %3527 }
 0xfb6   :  { %3529 = vtanh.f32 %v1808_v49  ;;  %v1807_v6 = vmul.f32 %v3528_v28, %v1805_v42  ;;  %v1813_v40 = vsub.f32 1.0, %v3528_v28  ;;  %v1825_v0 = vmul.f32 %v3528_v28, %v4534_v22  ;;  %v4578_v22 = vld [vmem:[%s5330_s8 + $0x68] sm:$0xff]  ;;  %v1846_v49 = vld [vmem:[#allocation3 + $0x30] sm:$0xff]  ;;  %v1848_v42 = vld [vmem:[#allocation3 + $0x40] sm:$0xff] }
 0xfb7   :  { %2178 = vmatprep.subr.mxu0 %v4578_v22  ;;  %v1849_v28 = vld [vmem:[#allocation3 + $0x48] sm:$0xff] }
 0xfb8   :  { %v1809_v8 = vadd.f32 %v1807_v6, %v1708_v7  ;;  %2179 = vmatpush1.msra.mxu0 %v4584_v24  ;;  %v1851_v6 = vld [vmem:[#allocation3 + $0x58] sm:$0xff]  ;;  %v1852_v7 = vld [vmem:[#allocation3 + $0x60] sm:$0xff] }
 0xfb9   :  { %2180 = vmatprep.subr.mxu0 %v4590_v62 }
 0xfba   :  { %3531 = vtanh.f32 %v1809_v8  ;;  %2181 = vmatpush1.msra.mxu0 %v4596_v56  ;;  %v1853_v8 = vld [vmem:[#allocation3 + $0x68] sm:$0xff] }
 0xfbb   :  { %2182 = vmatprep.subr.mxu0 %v4602_v57 }
 0xfbc   :  { %2183 = vmatpush1.msra.mxu0 %v4608_v59 }
 0xfbd   :  { %2184 = vmatprep.subr.mxu0 %v4614_v34 }
 0xfbe   :  { %2185 = vmatpush1.msra.mxu0 %v4620_v30 }
 0xfbf   :  { %2186 = vmatprep.subr.mxu0 %v4626_v44 }
 0xfc0   :  { %2187 = vmatpush1.msra.mxu0 %v4632_v45 }
 0xfc1   :  { %2188 = vmatprep.subr.mxu0 %v4638_v48 }
 0xfc2   :  { %2189 = vmatpush1.msra.mxu0 %v4644_v54 }
 0xfc3   :  { %v3530_v26 = vpop.eup %3529  ;;  %2190 = vmatprep.subr.mxu0 %v4650_v41 }
 0xfc4   :  { %1816 = vrot.lane.b32.xlu0 %v3530_v26, %s3755_s5  ;;  %2191 = vmatpush1.msra.mxu0 %v4656_v35  ;;  %v4741_v26 = vrot.slane %v1872_v3, %v5344_v13 }
 0xfc5   :  { %2225 = vmatmul.mubr.f32.vlgmr.msra.gmra.mxu0 %v5335_v1  ;;  %2315 = vmatprep.subr.mxu0 %v4565_v47 }
 0xfc6   :  { %2230 = vmatprep.mubr.f32.mxu0 %v5335_v1  ;;  %2316 = vmatpush1.msra.mxu0 %v4571_v60 }
 0xfc7   :  { %v3532_v15 = vpop.eup %3531  ;;  %2317 = vmatprep.subr.mxu0 %v4578_v22 }
 0xfc8   :  { %1818 = vrot.lane.b32.xlu1 %v3532_v15, %s3755_s5  ;;  %2318 = vmatpush1.msra.mxu0 %v4584_v24 }
 0xfc9   :  { %2231 = vmatmul.mubr.f32.gmra.mxu0 %v5335_v1  ;;  %2319 = vmatprep.subr.mxu0 %v4590_v62 }
 0xfca   :  { %2320 = vmatpush1.msra.mxu0 %v4596_v56  ;;  %2363 = vmatprep.mubr.f32.mxu0 %v5335_v1 }
 0xfcb   :  { %2321 = vmatprep.subr.mxu0 %v4602_v57 }
 0xfcc   :  { %2322 = vmatpush1.msra.mxu0 %v4608_v59 }
 0xfcd   :  { %2323 = vmatprep.subr.mxu0 %v4614_v34 }
 0xfce   :  { %2324 = vmatpush1.msra.mxu0 %v4620_v30 }
 0xfcf   :  { %2325 = vmatprep.subr.mxu0 %v4626_v44 }
 0xfd0   :  { %2326 = vmatpush1.msra.mxu0 %v4632_v45 }
 0xfd1   :  { %2327 = vmatprep.subr.mxu0 %v4638_v48 }
 0xfd2   :  { %2328 = vmatpush1.msra.mxu0 %v4644_v54 }
 0xfd3   :  { %2329 = vmatprep.subr.mxu0 %v4650_v41 }
 0xfd4   :  { %2330 = vmatpush1.msra.mxu0 %v4656_v35 }
 0xfd5   :  { %2454 = vmatprep.subr.mxu0 %v4565_v47 }
0x1036   :  { %v1817_v32 = vpop.permute.xlu0 %1816 }
0x1037   :  { %v1822_v55 = vmul.f32 %v1817_v32, %v1812_v25 }
0x1039   :  { %v1826_v36 = vadd.f32 %v1824_v50, %v1822_v55 }
0x103a   :  { %v1819_v27 = vpop.permute.xlu1 %1818 }
0x103b   :  { %v1823_v58 = vmul.f32 %v1819_v27, %v1813_v40  ;;  %1830 = vrot.lane.b32.xlu0 %v1826_v36, %s3755_s5 }
0x103d   :  { %v1827_v63 = vadd.f32 %v1825_v0, %v1823_v58 }
0x103f   :  { %1832 = vrot.lane.b32.xlu1 %v1827_v63, %s3755_s5 }
0x10ad   :  { %v1831_v20 = vpop.permute.xlu0 %1830 }
0x10ae   :  { %1836 = vst.msk [vmem:[#allocation3 + $0x70] sm:$0xff] %vm430_vm0, %v1831_v20 }
0x10af   :  { %1838 = vst.msk [vmem:[#allocation3] sm:$0xff] %vm836_vm8, %v1831_v20 }
0x10b1   :  { %v1833_v33 = vpop.permute.xlu1 %1832 }
0x10b2   :  { %1837 = vst.msk [vmem:[#allocation3 + $0x78] sm:$0xff] %vm430_vm0, %v1833_v33 }
0x10b3   :  { %1839 = vst.msk [vmem:[#allocation3 + $0x8] sm:$0xff] %vm836_vm8, %v1833_v33 }
0x10b5   :  { %v1854_v9 = vld [vmem:[#allocation3 + $0x70] sm:$0xff] }
0x10b6   :  { %v1840_v4 = vld [vmem:[#allocation3] sm:$0xff] }
0x10b7   :  { %3316 = vmatmul.mubr.msk.f32.vlgmr.msra.gmra.mxu1 %vm641_vm2, %v1840_v4 }
0x10b8   :  { %2002 = vmatprep.mubr.f32.mxu1 %v5335_v1  ;;  %2725 = vmatpush1.msra.mxu1 %v4571_v60 }
0x10b9   :  { %2726 = vmatprep.subr.mxu1 %v4578_v22  ;;  %v1855_v10 = vld [vmem:[#allocation3 + $0x78] sm:$0xff] }
0x10ba   :  { %v1841_v37 = vld [vmem:[#allocation3 + $0x8] sm:$0xff]  ;;  %2727 = vmatpush1.msra.mxu1 %v4584_v24 }
0x10bb   :  { %3317 = vmatmul.mubr.msk.f32.gmra.mxu1 %vm641_vm2, %v1841_v37  ;;  %2728 = vmatprep.subr.mxu1 %v4590_v62 }
0x10bc   :  { %2008 = vmatprep.mubr.f32.mxu1 %v5335_v1  ;;  %2729 = vmatpush1.msra.mxu1 %v4596_v56 }
0x10bd   :  { %2730 = vmatprep.subr.mxu1 %v4602_v57 }
0x10be   :  { %2731 = vmatpush1.msra.mxu1 %v4608_v59 }
0x10bf   :  { %3318 = vmatmul.mubr.msk.f32.gmra.mxu1 %vm641_vm2, %v1842_v51  ;;  %2732 = vmatprep.subr.mxu1 %v4614_v34 }
0x10c0   :  { %2014 = vmatprep.mubr.f32.mxu1 %v5335_v1  ;;  %2733 = vmatpush1.msra.mxu1 %v4620_v30 }
0x10c1   :  { %2734 = vmatprep.subr.mxu1 %v4626_v44 }
0x10c2   :  { %2735 = vmatpush1.msra.mxu1 %v4632_v45 }
0x10c3   :  { %3319 = vmatmul.mubr.msk.f32.gmra.mxu1 %vm641_vm2, %v1843_v53  ;;  %2736 = vmatprep.subr.mxu1 %v4638_v48 }
0x10c4   :  { %2020 = vmatprep.mubr.f32.mxu1 %v5335_v1  ;;  %2737 = vmatpush1.msra.mxu1 %v4644_v54 }
0x10c5   :  { %2738 = vmatprep.subr.mxu1 %v4650_v41 }
0x10c6   :  { %2739 = vmatpush1.msra.mxu1 %v4656_v35 }
0x10c7   :  { %3320 = vmatmul.mubr.msk.f32.gmra.mxu1 %vm641_vm2, %v1844_v46  ;;  %2986 = vmatprep.subr.mxu1 %v4565_v47 }
0x10c8   :  { %2026 = vmatprep.mubr.f32.mxu1 %v5335_v1 }
0x10cb   :  { %3321 = vmatmul.mubr.msk.f32.gmra.mxu1 %vm641_vm2, %v1845_v23 }
0x10cc   :  { %2032 = vmatprep.mubr.f32.mxu1 %v5335_v1 }
0x10cf   :  { %3322 = vmatmul.mubr.msk.f32.gmra.mxu1 %vm641_vm2, %v1846_v49 }
0x10d0   :  { %2038 = vmatprep.mubr.f32.mxu1 %v5335_v1 }
0x10d3   :  { %3323 = vmatmul.mubr.msk.f32.gmra.mxu1 %vm641_vm2, %v1847_v2 }
0x10d4   :  { %2044 = vmatprep.mubr.f32.mxu1 %v5335_v1 }
0x10d7   :  { %3324 = vmatmul.mubr.msk.f32.gmra.mxu1 %vm641_vm2, %v1848_v42 }
0x10d8   :  { %2050 = vmatprep.mubr.f32.mxu1 %v5335_v1 }
0x10db   :  { %3325 = vmatmul.mubr.msk.f32.gmra.mxu1 %vm641_vm2, %v1849_v28 }
0x10dc   :  { %2056 = vmatprep.mubr.f32.mxu1 %v5335_v1 }
0x10df   :  { %3326 = vmatmul.mubr.msk.f32.gmra.mxu1 %vm641_vm2, %v1850_v5 }
0x10e0   :  { %2062 = vmatprep.mubr.f32.mxu1 %v5335_v1 }
0x10e3   :  { %3327 = vmatmul.mubr.msk.f32.gmra.mxu1 %vm641_vm2, %v1851_v6 }
0x10e4   :  { %2068 = vmatprep.mubr.f32.mxu1 %v5335_v1 }
0x10e7   :  { %3328 = vmatmul.mubr.msk.f32.gmra.mxu1 %vm641_vm2, %v1852_v7 }
0x10e8   :  { %2074 = vmatprep.mubr.f32.mxu1 %v5335_v1 }
0x10eb   :  { %3329 = vmatmul.mubr.msk.f32.gmra.mxu1 %vm641_vm2, %v1853_v8 }
0x10ec   :  { %2080 = vmatprep.mubr.f32.mxu1 %v5335_v1 }
0x10ef   :  { %3330 = vmatmul.mubr.msk.f32.gmra.mxu1 %vm641_vm2, %v1854_v9 }
0x10f0   :  { %2086 = vmatprep.mubr.f32.mxu1 %v5335_v1 }
0x10f3   :  { %3331 = vmatmul.mubr.msk.f32.gmra.mxu1 %vm641_vm2, %v1855_v10 }
0x10f4   :  { %2772 = vmatprep.mubr.f32.mxu1 %v5335_v1 }
0x1177   :  { %v1998_v43 = vpop.f32.mrf.mxu1 }
0x1178   :  { %v4744_v14 = vadd.f32 %v1998_v43, %v4737_v12 }
0x1179   :  { %v2000_v15 = vpop.f32.mrf.mxu1 }
0x117a   :  { %5345 = vst [vmem:[#allocation14_spill] sm:$0xff] %v4744_v14  ;;  %2093 = vst [vmem:[#allocation2] sm:$0xff] %v4744_v14  ;;  %v2001_v16 = vadd.f32 %v2000_v15, %v4741_v26 }
0x117b   :  { %v2004_v17 = vpop.f32.mrf.mxu1 }
0x117c   :  { %2094 = vst.msk [vmem:[#allocation2 + $0x8] sm:$0xff] %vm641_vm2, %v2001_v16  ;;  %v4750_v18 = vadd.f32 %v2004_v17, %v4737_v12 }
0x117d   :  { %v2006_v19 = vpop.f32.mrf.mxu1 }
0x117e   :  { %5346 = vst [vmem:[#allocation15_spill] sm:$0xff] %v4750_v18  ;;  %2095 = vst [vmem:[#allocation2 + $0x10] sm:$0xff] %v4750_v18  ;;  %v2007_v38 = vadd.f32 %v2006_v19, %v4741_v26 }
0x117f   :  { %v2010_v39 = vpop.f32.mrf.mxu1 }
0x1180   :  { %2096 = vst.msk [vmem:[#allocation2 + $0x18] sm:$0xff] %vm641_vm2, %v2007_v38  ;;  %v4756_v21 = vadd.f32 %v2010_v39, %v4737_v12 }
0x1181   :  { %v2012_v52 = vpop.f32.mrf.mxu1 }
0x1182   :  { %2097 = vst [vmem:[#allocation2 + $0x20] sm:$0xff] %v4756_v21  ;;  %v2013_v61 = vadd.f32 %v2012_v52, %v4741_v26 }
0x1183   :  { %v2016_v25 = vpop.f32.mrf.mxu1  ;;  %v2149_v38 = vld [vmem:[#allocation2 + $0x8] sm:$0xff] }
0x1184   :  { %2098 = vst.msk [vmem:[#allocation2 + $0x28] sm:$0xff] %vm641_vm2, %v2013_v61  ;;  %v4762_v32 = vadd.f32 %v2016_v25, %v4737_v12 }
0x1185   :  { %v2018_v50 = vpop.f32.mrf.mxu1 }
0x1186   :  { %2099 = vst [vmem:[#allocation2 + $0x30] sm:$0xff] %v4762_v32  ;;  %v2019_v55 = vadd.f32 %v2018_v50, %v4741_v26 }
0x1187   :  { %v2022_v36 = vpop.f32.mrf.mxu1 }
0x1188   :  { %2100 = vst.msk [vmem:[#allocation2 + $0x38] sm:$0xff] %vm641_vm2, %v2019_v55  ;;  %v4768_v40 = vadd.f32 %v2022_v36, %v4737_v12 }
0x1189   :  { %v2024_v27 = vpop.f32.mrf.mxu1 }
0x118a   :  { %v2025_v0 = vadd.f32 %v2024_v27, %v4741_v26 }
0x118b   :  { %v2028_v58 = vpop.f32.mrf.mxu1  ;;  %v4918_v43 = vld [vmem:[#allocation2 + $0x28] sm:$0xff] }
0x118c   :  { %2102 = vst.msk [vmem:[#allocation2 + $0x48] sm:$0xff] %vm641_vm2, %v2025_v0  ;;  %v4773_v63 = vadd.f32 %v2028_v58, %v4737_v12 }
0x118d   :  { %v2030_v20 = vpop.f32.mrf.mxu1 }
0x118e   :  { %v2031_v33 = vadd.f32 %v2030_v20, %v4741_v26 }
0x118f   :  { %v2034_v4 = vpop.f32.mrf.mxu1 }
0x1190   :  { %2104 = vst.msk [vmem:[#allocation2 + $0x58] sm:$0xff] %vm641_vm2, %v2031_v33  ;;  %v4778_v37 = vadd.f32 %v2034_v4, %v4737_v12 }
0x1191   :  { %v2036_v51 = vpop.f32.mrf.mxu1 }
0x1192   :  { %v2037_v53 = vadd.f32 %v2036_v51, %v4741_v26 }
0x1193   :  { %v2040_v46 = vpop.f32.mrf.mxu1 }
0x1194   :  { %2106 = vst.msk [vmem:[#allocation2 + $0x68] sm:$0xff] %vm641_vm2, %v2037_v53  ;;  %v4783_v23 = vadd.f32 %v2040_v46, %v4737_v12 }
0x1195   :  { %v2042_v49 = vpop.f32.mrf.mxu1 }
0x1196   :  { %v2043_v2 = vadd.f32 %v2042_v49, %v4741_v26 }
0x1197   :  { %v2046_v42 = vpop.f32.mrf.mxu1 }
0x1198   :  { %2108 = vst.msk [vmem:[#allocation2 + $0x78] sm:$0xff] %vm641_vm2, %v2043_v2  ;;  %v4788_v28 = vadd.f32 %v2046_v42, %v4737_v12 }
0x1199   :  { %v2048_v5 = vpop.f32.mrf.mxu1 }
0x119a   :  { %v2049_v6 = vadd.f32 %v2048_v5, %v4741_v26 }
0x119b   :  { %v2052_v9 = vpop.f32.mrf.mxu1  ;;  %v4825_v61 = vld [vmem:[#allocation2 + $0x68] sm:$0xff] }
0x119c   :  { %2110 = vst.msk [vmem:[#allocation2 + $0x88] sm:$0xff] %vm641_vm2, %v2049_v6  ;;  %v4801_v10 = vadd.f32 %v2052_v9, %v4737_v12  ;;  %v4871_v6 = vld [vmem:[#allocation2 + $0x48] sm:$0xff] }
0x119d   :  { %v2054_v3 = vpop.f32.mrf.mxu1 }
0x119e   :  { %v2055_v11 = vadd.f32 %v2054_v3, %v4741_v26 }
0x119f   :  { %v2058_v15 = vpop.f32.mrf.mxu1  ;;  %v4848_v33 = vld [vmem:[#allocation2 + $0x78] sm:$0xff] }
0x11a0   :  { %2112 = vst.msk [vmem:[#allocation2 + $0x98] sm:$0xff] %vm641_vm2, %v2055_v11  ;;  %v4814_v16 = vadd.f32 %v2058_v15, %v4737_v12 }
0x11a1   :  { %v2060_v17 = vpop.f32.mrf.mxu1 }
0x11a2   :  { %v2061_v19 = vadd.f32 %v2060_v17, %v4741_v26 }
0x11a3   :  { %v2064_v52 = vpop.f32.mrf.mxu1  ;;  %v4827_v25 = vld [vmem:[#allocation2 + $0x88] sm:$0xff] }
0x11a4   :  { %2114 = vst.msk [vmem:[#allocation2 + $0xa8] sm:$0xff] %vm641_vm2, %v2061_v19  ;;  %v4831_v50 = vadd.f32 %v2064_v52, %v4737_v12  ;;  %v4837_v55 = vsel %vm92_vm3, %v4825_v61, %v4827_v25  ;;  %v2226_v19 = vpop.f32.mrf.mxu0 }
0x11a5   :  { %v2066_v36 = vpop.f32.mrf.mxu1 }
0x11a6   :  { %v2067_v27 = vadd.f32 %v2066_v36, %v4741_v26 }
0x11a7   :  { %v2070_v20 = vpop.f32.mrf.mxu1  ;;  %v4850_v4 = vld [vmem:[#allocation2 + $0x98] sm:$0xff] }
0x11a8   :  { %2116 = vst.msk [vmem:[#allocation2 + $0xb8] sm:$0xff] %vm641_vm2, %v2067_v27  ;;  %v4854_v51 = vadd.f32 %v2070_v20, %v4737_v12  ;;  %v4860_v53 = vsel %vm92_vm3, %v4848_v33, %v4850_v4  ;;  %v4894_v20 = vld [vmem:[#allocation2 + $0x58] sm:$0xff] }
0x11a9   :  { %v2072_v46 = vpop.f32.mrf.mxu1 }
0x11aa   :  { %v2073_v49 = vadd.f32 %v2072_v46, %v4741_v26 }
0x11ab   :  { %v2076_v5 = vpop.f32.mrf.mxu1  ;;  %v4873_v9 = vld [vmem:[#allocation2 + $0xa8] sm:$0xff] }
0x11ac   :  { %2118 = vst.msk [vmem:[#allocation2 + $0xc8] sm:$0xff] %vm641_vm2, %v2073_v49  ;;  %v4877_v3 = vadd.f32 %v2076_v5, %v4737_v12  ;;  %v4883_v11 = vsel %vm92_vm3, %v4871_v6, %v4873_v9 }
0x11ad   :  { %v2078_v15 = vpop.f32.mrf.mxu1 }
0x11ae   :  { %v2079_v17 = vadd.f32 %v2078_v15, %v4741_v26 }
0x11af   :  { %v2082_v27 = vpop.f32.mrf.mxu1  ;;  %v4896_v46 = vld [vmem:[#allocation2 + $0xb8] sm:$0xff] }
0x11b0   :  { %2120 = vst.msk [vmem:[#allocation2 + $0xd8] sm:$0xff] %vm641_vm2, %v2079_v17  ;;  %v4900_v49 = vadd.f32 %v2082_v27, %v4737_v12  ;;  %v4906_v5 = vsel %vm92_vm3, %v4894_v20, %v4896_v46  ;;  %v2228_v17 = vpop.f32.mrf.mxu0  ;;  %v4942_v27 = vld [vmem:[#allocation2 + $0x38] sm:$0xff] }
0x11b1   :  { %5348 = vst [vmem:[#allocation17_spill] sm:$0xff] %v4906_v5  ;;  %v2084_v15 = vpop.f32.mrf.mxu1 }
0x11b2   :  { %5347 = vst [vmem:[#allocation16_spill] sm:$0xff] %v4900_v49  ;;  %2121 = vst [vmem:[#allocation2 + $0xe0] sm:$0xff] %v4900_v49  ;;  %v2085_v36 = vadd.f32 %v2084_v15, %v4741_v26  ;;  %v2156_v42 = vsel %vm4115_vm7, %v4900_v49, %v4744_v14 }
0x11b3   :  { %v2088_v58 = vpop.f32.mrf.mxu1  ;;  %v2237_v39 = vadd.f32 %v2226_v19, %v2156_v42  ;;  %v4920_v8 = vld [vmem:[#allocation2 + $0xc8] sm:$0xff] }
0x11b4   :  { %2122 = vst.msk [vmem:[#allocation2 + $0xe8] sm:$0xff] %vm641_vm2, %v2085_v36  ;;  %v4924_v15 = vadd.f32 %v2088_v58, %v4737_v12  ;;  %v4930_v13 = vsel %vm92_vm3, %v4918_v43, %v4920_v8  ;;  %v2232_v36 = vpop.f32.mrf.mxu0 }
0x11b5   :  { %5350 = vst [vmem:[#allocation19_spill] sm:$0xff] %v4930_v13  ;;  %v2090_v7 = vpop.f32.mrf.mxu1  ;;  %v3333_v0 = vmul.f32 -1.442695, %v2237_v39 }
0x11b6   :  { %5349 = vst [vmem:[#allocation18_spill] sm:$0xff] %v4924_v15  ;;  %2123 = vst [vmem:[#allocation2 + $0xf0] sm:$0xff] %v4924_v15  ;;  %v2091_v42 = vadd.f32 %v2090_v7, %v4741_v26  ;;  %v2157_v19 = vsel %vm4115_vm7, %v4924_v15, %v4750_v18  ;;  %v2234_v18 = vpop.f32.mrf.mxu0 }
0x11b7   :  { %3533 = vpow2.f32 %v3333_v0  ;;  %v2238_v58 = vadd.f32 %v2232_v36, %v2157_v19  ;;  %v4944_v39 = vld [vmem:[#allocation2 + $0xd8] sm:$0xff] }
0x11b8   :  { %2124 = vst.msk [vmem:[#allocation2 + $0xf8] sm:$0xff] %vm641_vm2, %v2091_v42  ;;  %v4951_v26 = vsel %vm92_vm3, %v4942_v27, %v4944_v39  ;;  %v2151_v19 = vld [vmem:[#allocation2 + $0x18] sm:$0xff] }
0x11b9   :  { %5351 = vst [vmem:[#allocation20_spill] sm:$0xff] %v4951_v26  ;;  %v3334_v7 = vmul.f32 -1.442695, %v2238_v58  ;;  %v4964_v58 = vld [vmem:[%s5331_s9] ss:$0 sm:$0xff] }
0x11bb   :  { %v2153_v52 = vld [vmem:[#allocation2 + $0xe8] sm:$0xff]  ;;  %3535 = vpow2.f32 %v3334_v7  ;;  %v2251_v7 = vadd.f32 %v4964_v58, %v2228_v17 }
0x11bc   :  { %v4955_v0 = vsel %vm92_vm3, %v2149_v38, %v2153_v52  ;;  %v2158_v14 = vsel %vm92_vm3, %v2153_v52, %v2149_v38 }
0x11bd   :  { %5352 = vst [vmem:[#allocation21_spill] sm:$0xff] %v4955_v0 }
0x11bf   :  { %v2155_v36 = vld [vmem:[#allocation2 + $0xf8] sm:$0xff] }
0x11c0   :  { %v4959_v12 = vsel %vm92_vm3, %v2151_v19, %v2155_v36 }
0x11c1   :  { %5353 = vst [vmem:[#allocation22_spill] sm:$0xff] %v4959_v12 }
0x11c4   :  { %v3534_v42 = vpop.eup %3533 }
0x11c5   :  { %v2245_v2 = vadd.f32 1.0, %v3534_v42  ;;  %v2252_v42 = vadd.f32 %v4964_v58, %v2234_v18 }
0x11c7   :  { %3537 = vrcp.f32 %v2245_v2 }
0x11c8   :  { %v3536_v1 = vpop.eup %3535 }
0x11c9   :  { %v2246_v15 = vadd.f32 1.0, %v3536_v1 }
0x11cb   :  { %3539 = vrcp.f32 %v2246_v15  ;;  %v2159_v15 = vsel %vm92_vm3, %v2155_v36, %v2151_v19  ;;  %v5354_v19 = vmov 0.0   ;;  %v5355_v36 = vsel %vm4115_vm7, %v4854_v51, %v4756_v21 }
0x11d4   :  { %v3538_v0 = vpop.eup %3537 }
0x11d5   :  { %v2253_v49 = vmul.f32 %v3538_v0, %v2251_v7  ;;  %v2259_v7 = vsub.f32 1.0, %v3538_v0  ;;  %v2271_v38 = vmul.f32 0.0, %v3538_v0 }
0x11d7   :  { %v2255_v12 = vadd.f32 %v2253_v49, %v2158_v14 }
0x11d8   :  { %v3540_v2 = vpop.eup %3539 }
0x11d9   :  { %3541 = vtanh.f32 %v2255_v12  ;;  %v2254_v1 = vmul.f32 %v3540_v2, %v2252_v42  ;;  %v2260_v18 = vsub.f32 1.0, %v3540_v2  ;;  %v2272_v12 = vmul.f32 0.0, %v3540_v2 }
0x11db   :  { %v2256_v26 = vadd.f32 %v2254_v1, %v2159_v15 }
0x11dd   :  { %3543 = vtanh.f32 %v2256_v26 }
0x11e6   :  { %v3542_v13 = vpop.eup %3541 }
0x11e7   :  { %2263 = vrot.lane.b32.xlu0 %v3542_v13, %s3755_s5 }
0x11ea   :  { %v3544_v17 = vpop.eup %3543 }
0x11eb   :  { %2265 = vrot.lane.b32.xlu1 %v3544_v17, %s3755_s5 }
0x1259   :  { %v2264_v5 = vpop.permute.xlu0 %2263 }
0x125a   :  { %v2269_v14 = vmul.f32 %v2264_v5, %v2259_v7  ;;  %v5356_v7 = vsel %vm4115_vm7, %v4877_v3, %v4762_v32 }
0x125c   :  { %v4974_v52 = vadd.f32 %v2271_v38, %v2269_v14 }
0x125d   :  { %v2266_v49 = vpop.permute.xlu1 %2265 }
0x125e   :  { %v2270_v42 = vmul.f32 %v2266_v49, %v2260_v18  ;;  %2291 = vrot.lane.b32.xlu0 %v4974_v52, %s3755_s5 }
0x1260   :  { %v4978_v26 = vadd.f32 %v2272_v12, %v2270_v42 }
0x1262   :  { %2293 = vrot.lane.b32.xlu1 %v4978_v26, %s3755_s5 }
0x12d0   :  { %v2292_v13 = vpop.permute.xlu0 %2291 }
0x12d1   :  { %3335 = vmatmul.mubr.msk.f32.vlgmr.msra.gmra.mxu0 %vm641_vm2, %v2292_v13 }
0x12d2   :  { %2369 = vmatprep.mubr.f32.mxu0 %v5354_v19  ;;  %2455 = vmatpush1.msra.mxu0 %v4571_v60 }
0x12d3   :  { %2456 = vmatprep.subr.mxu0 %v4578_v22 }
0x12d4   :  { %v2294_v5 = vpop.permute.xlu1 %2293  ;;  %2457 = vmatpush1.msra.mxu0 %v4584_v24 }
0x12d5   :  { %3336 = vmatmul.mubr.msk.f32.gmra.mxu0 %vm641_vm2, %v2294_v5  ;;  %2458 = vmatprep.subr.mxu0 %v4590_v62 }
0x12d6   :  { %2459 = vmatpush1.msra.mxu0 %v4596_v56  ;;  %2502 = vmatprep.mubr.f32.mxu0 %v5354_v19 }
0x12d7   :  { %2460 = vmatprep.subr.mxu0 %v4602_v57 }
0x12d8   :  { %2461 = vmatpush1.msra.mxu0 %v4608_v59 }
0x12d9   :  { %2462 = vmatprep.subr.mxu0 %v4614_v34 }
0x12da   :  { %2463 = vmatpush1.msra.mxu0 %v4620_v30 }
0x12db   :  { %2464 = vmatprep.subr.mxu0 %v4626_v44 }
0x12dc   :  { %2465 = vmatpush1.msra.mxu0 %v4632_v45 }
0x12dd   :  { %2466 = vmatprep.subr.mxu0 %v4638_v48 }
0x12de   :  { %2467 = vmatpush1.msra.mxu0 %v4644_v54 }
0x12df   :  { %2468 = vmatprep.subr.mxu0 %v4650_v41 }
0x12e0   :  { %2469 = vmatpush1.msra.mxu0 %v4656_v35 }
0x12e1   :  { %2593 = vmatprep.subr.mxu0 %v4565_v47 }
0x1391   :  { %v2365_v0 = vpop.f32.mrf.mxu0 }
0x1392   :  { %v2376_v2 = vadd.f32 %v2365_v0, %v5355_v36 }
0x1393   :  { %v2367_v1 = vpop.f32.mrf.mxu0 }
0x1394   :  { %v3337_v15 = vmul.f32 -1.442695, %v2376_v2  ;;  %v2390_v13 = vadd.f32 %v4964_v58, %v2367_v1  ;;  %v2287_v2 = vsel %vm92_vm3, %v4920_v8, %v4918_v43 }
0x1395   :  { %v2371_v17 = vpop.f32.mrf.mxu0 }
0x1396   :  { %3545 = vpow2.f32 %v3337_v15  ;;  %v2377_v38 = vadd.f32 %v2371_v17, %v5356_v7 }
0x1397   :  { %v2373_v0 = vpop.f32.mrf.mxu0 }
0x1398   :  { %v3338_v14 = vmul.f32 -1.442695, %v2377_v38  ;;  %v2391_v17 = vadd.f32 %v4964_v58, %v2373_v0 }
0x139a   :  { %3547 = vpow2.f32 %v3338_v14  ;;  %v2288_v14 = vsel %vm92_vm3, %v4944_v39, %v4942_v27 }
0x13a3   :  { %v3546_v18 = vpop.eup %3545 }
0x13a4   :  { %v2384_v49 = vadd.f32 1.0, %v3546_v18 }
0x13a6   :  { %3549 = vrcp.f32 %v2384_v49 }
0x13a7   :  { %v3548_v12 = vpop.eup %3547 }
0x13a8   :  { %v2385_v42 = vadd.f32 1.0, %v3548_v12 }
0x13aa   :  { %3551 = vrcp.f32 %v2385_v42 }
0x13b3   :  { %v3550_v5 = vpop.eup %3549 }
0x13b4   :  { %v2392_v36 = vmul.f32 %v3550_v5, %v2390_v13  ;;  %v2398_v8 = vsub.f32 1.0, %v3550_v5  ;;  %v2410_v12 = vmul.f32 %v3550_v5, %v4974_v52 }
0x13b6   :  { %v2394_v15 = vadd.f32 %v2392_v36, %v2287_v2 }
0x13b7   :  { %v3552_v7 = vpop.eup %3551 }
0x13b8   :  { %3553 = vtanh.f32 %v2394_v15  ;;  %v2393_v38 = vmul.f32 %v3552_v7, %v2391_v17  ;;  %v2399_v0 = vsub.f32 1.0, %v3552_v7  ;;  %v2411_v2 = vmul.f32 %v3552_v7, %v4978_v26 }
0x13b9   :  { %v5357_v7 = vsel %vm4115_vm7, %v4814_v16, %v4768_v40 }
0x13ba   :  { %v2395_v1 = vadd.f32 %v2393_v38, %v2288_v14 }
0x13bc   :  { %3555 = vtanh.f32 %v2395_v1 }
0x13c5   :  { %v3554_v18 = vpop.eup %3553 }
0x13c6   :  { %2402 = vrot.lane.b32.xlu0 %v3554_v18, %s3755_s5 }
0x13c9   :  { %v3556_v49 = vpop.eup %3555 }
0x13ca   :  { %2404 = vrot.lane.b32.xlu1 %v3556_v49, %s3755_s5  ;;  %v5358_v49 = vsel %vm4115_vm7, %v4831_v50, %v4773_v63 }
0x1438   :  { %v2403_v43 = vpop.permute.xlu0 %2402 }
0x1439   :  { %v2408_v42 = vmul.f32 %v2403_v43, %v2398_v8 }
0x143b   :  { %v5025_v13 = vadd.f32 %v2410_v12, %v2408_v42 }
0x143c   :  { %v2405_v36 = vpop.permute.xlu1 %2404 }
0x143d   :  { %v2409_v27 = vmul.f32 %v2405_v36, %v2399_v0  ;;  %2430 = vrot.lane.b32.xlu0 %v5025_v13, %s3755_s5 }
0x143f   :  { %v5030_v39 = vadd.f32 %v2411_v2, %v2409_v27 }
0x1441   :  { %2432 = vrot.lane.b32.xlu1 %v5030_v39, %s3755_s5 }
0x14af   :  { %v2431_v15 = vpop.permute.xlu0 %2430 }
0x14b0   :  { %3339 = vmatmul.mubr.msk.f32.vlgmr.msra.gmra.mxu0 %vm641_vm2, %v2431_v15 }
0x14b1   :  { %2508 = vmatprep.mubr.f32.mxu0 %v5354_v19  ;;  %2594 = vmatpush1.msra.mxu0 %v4571_v60 }
0x14b2   :  { %2595 = vmatprep.subr.mxu0 %v4578_v22 }
0x14b3   :  { %v2433_v5 = vpop.permute.xlu1 %2432  ;;  %2596 = vmatpush1.msra.mxu0 %v4584_v24 }
0x14b4   :  { %3340 = vmatmul.mubr.msk.f32.gmra.mxu0 %vm641_vm2, %v2433_v5  ;;  %2597 = vmatprep.subr.mxu0 %v4590_v62 }
0x14b5   :  { %2598 = vmatpush1.msra.mxu0 %v4596_v56  ;;  %2641 = vmatprep.mubr.f32.mxu0 %v5354_v19 }
0x14b6   :  { %2599 = vmatprep.subr.mxu0 %v4602_v57 }
0x14b7   :  { %2600 = vmatpush1.msra.mxu0 %v4608_v59 }
0x14b8   :  { %2601 = vmatprep.subr.mxu0 %v4614_v34 }
0x14b9   :  { %2602 = vmatpush1.msra.mxu0 %v4620_v30 }
0x14ba   :  { %2603 = vmatprep.subr.mxu0 %v4626_v44 }
0x14bb   :  { %2604 = vmatpush1.msra.mxu0 %v4632_v45 }
0x14bc   :  { %2605 = vmatprep.subr.mxu0 %v4638_v48 }
0x14bd   :  { %2606 = vmatpush1.msra.mxu0 %v4644_v54 }
0x14be   :  { %2607 = vmatprep.subr.mxu0 %v4650_v41 }
0x14bf   :  { %2608 = vmatpush1.msra.mxu0 %v4656_v35 }
0x14c0   :  { %2855 = vmatprep.subr.mxu0 %v4565_v47 }
0x1570   :  { %v2504_v17 = vpop.f32.mrf.mxu0 }
0x1571   :  { %v2515_v38 = vadd.f32 %v2504_v17, %v5357_v7  ;;  %v2426_v17 = vsel %vm92_vm3, %v4873_v9, %v4871_v6 }
0x1572   :  { %v2506_v14 = vpop.f32.mrf.mxu0 }
0x1573   :  { %v3341_v1 = vmul.f32 -1.442695, %v2515_v38  ;;  %v2529_v2 = vadd.f32 %v4964_v58, %v2506_v14 }
0x1574   :  { %v2510_v18 = vpop.f32.mrf.mxu0 }
0x1575   :  { %3557 = vpow2.f32 %v3341_v1  ;;  %v2516_v8 = vadd.f32 %v2510_v18, %v5358_v49  ;;  %v2427_v49 = vsel %vm92_vm3, %v4896_v46, %v4894_v20 }
0x1576   :  { %v2512_v15 = vpop.f32.mrf.mxu0 }
0x1577   :  { %v3342_v43 = vmul.f32 -1.442695, %v2516_v8  ;;  %v2530_v38 = vadd.f32 %v4964_v58, %v2512_v15 }
0x1579   :  { %3559 = vpow2.f32 %v3342_v43 }
0x1582   :  { %v3558_v12 = vpop.eup %3557 }
0x1583   :  { %v2523_v42 = vadd.f32 1.0, %v3558_v12 }
0x1585   :  { %3561 = vrcp.f32 %v2523_v42 }
0x1586   :  { %v3560_v0 = vpop.eup %3559 }
0x1587   :  { %v2524_v36 = vadd.f32 1.0, %v3560_v0 }
0x1589   :  { %3563 = vrcp.f32 %v2524_v36 }
0x1592   :  { %v3562_v27 = vpop.eup %3561 }
0x1593   :  { %v2531_v5 = vmul.f32 %v3562_v27, %v2529_v2  ;;  %v2537_v6 = vsub.f32 1.0, %v3562_v27  ;;  %v2549_v12 = vmul.f32 %v3562_v27, %v5025_v13 }
0x1595   :  { %v2533_v7 = vadd.f32 %v2531_v5, %v2426_v17 }
0x1596   :  { %v3564_v1 = vpop.eup %3563 }
0x1597   :  { %3565 = vtanh.f32 %v2533_v7  ;;  %v2532_v18 = vmul.f32 %v3564_v1, %v2530_v38  ;;  %v2538_v36 = vsub.f32 1.0, %v3564_v1  ;;  %v2550_v15 = vmul.f32 %v3564_v1, %v5030_v39 }
0x1598   :  { %v5359_v7 = vsel %vm4115_vm7, %v4788_v28, %v4778_v37 }
0x1599   :  { %v2534_v14 = vadd.f32 %v2532_v18, %v2427_v49 }
0x159b   :  { %3567 = vtanh.f32 %v2534_v14  ;;  %v5360_v14 = vsel %vm4115_vm7, %v4801_v10, %v4783_v23 }
0x15a4   :  { %v3566_v8 = vpop.eup %3565 }
0x15a5   :  { %2541 = vrot.lane.b32.xlu0 %v3566_v8, %s3755_s5 }
0x15a8   :  { %v3568_v43 = vpop.eup %3567 }
0x15a9   :  { %2543 = vrot.lane.b32.xlu1 %v3568_v43, %s3755_s5 }
0x1617   :  { %v2542_v9 = vpop.permute.xlu0 %2541 }
0x1618   :  { %v2547_v42 = vmul.f32 %v2542_v9, %v2537_v6 }
0x161a   :  { %v5077_v0 = vadd.f32 %v2549_v12, %v2547_v42 }
0x161b   :  { %v2544_v2 = vpop.permute.xlu1 %2543 }
0x161c   :  { %v2548_v20 = vmul.f32 %v2544_v2, %v2538_v36  ;;  %2569 = vrot.lane.b32.xlu0 %v5077_v0, %s3755_s5 }
0x161e   :  { %v5082_v46 = vadd.f32 %v2550_v15, %v2548_v20  ;;  %v2565_v20 = vsel %vm92_vm3, %v4827_v25, %v4825_v61 }
0x1620   :  { %2571 = vrot.lane.b32.xlu1 %v5082_v46, %s3755_s5 }
0x168e   :  { %v2570_v5 = vpop.permute.xlu0 %2569 }
0x168f   :  { %3343 = vmatmul.mubr.msk.f32.vlgmr.msra.gmra.mxu0 %vm641_vm2, %v2570_v5 }
0x1690   :  { %2647 = vmatprep.mubr.f32.mxu0 %v5354_v19  ;;  %2856 = vmatpush1.msra.mxu0 %v4571_v60 }
0x1691   :  { %2857 = vmatprep.subr.mxu0 %v4578_v22 }
0x1692   :  { %v2572_v27 = vpop.permute.xlu1 %2571  ;;  %2858 = vmatpush1.msra.mxu0 %v4584_v24 }
0x1693   :  { %3344 = vmatmul.mubr.msk.f32.gmra.mxu0 %vm641_vm2, %v2572_v27  ;;  %2859 = vmatprep.subr.mxu0 %v4590_v62 }
0x1694   :  { %2860 = vmatpush1.msra.mxu0 %v4596_v56  ;;  %2903 = vmatprep.mubr.f32.mxu0 %v5354_v19 }
0x1695   :  { %2861 = vmatprep.subr.mxu0 %v4602_v57 }
0x1696   :  { %2862 = vmatpush1.msra.mxu0 %v4608_v59 }
0x1697   :  { %2863 = vmatprep.subr.mxu0 %v4614_v34 }
0x1698   :  { %2864 = vmatpush1.msra.mxu0 %v4620_v30 }
0x1699   :  { %2865 = vmatprep.subr.mxu0 %v4626_v44 }
0x169a   :  { %2866 = vmatpush1.msra.mxu0 %v4632_v45 }
0x169b   :  { %2867 = vmatprep.subr.mxu0 %v4638_v48 }
0x169c   :  { %2868 = vmatpush1.msra.mxu0 %v4644_v54 }
0x169d   :  { %2869 = vmatprep.subr.mxu0 %v4650_v41 }
0x169e   :  { %2870 = vmatpush1.msra.mxu0 %v4656_v35 }
0x169f   :  { %3117 = vmatprep.subr.mxu0 %v4565_v47 }
0x174f   :  { %v2643_v17 = vpop.f32.mrf.mxu0 }
0x1750   :  { %v2654_v38 = vadd.f32 %v2643_v17, %v5359_v7 }
0x1751   :  { %v2645_v1 = vpop.f32.mrf.mxu0 }
0x1752   :  { %v3345_v18 = vmul.f32 -1.442695, %v2654_v38  ;;  %v2668_v42 = vadd.f32 %v4964_v58, %v2645_v1  ;;  %v2566_v38 = vsel %vm92_vm3, %v4850_v4, %v4848_v33 }
0x1753   :  { %v2649_v49 = vpop.f32.mrf.mxu0 }
0x1754   :  { %3569 = vpow2.f32 %v3345_v18  ;;  %v2655_v8 = vadd.f32 %v2649_v49, %v5360_v14 }
0x1755   :  { %v2651_v2 = vpop.f32.mrf.mxu0 }
0x1756   :  { %v3346_v43 = vmul.f32 -1.442695, %v2655_v8  ;;  %v2669_v27 = vadd.f32 %v4964_v58, %v2651_v2 }
0x1758   :  { %3571 = vpow2.f32 %v3346_v43 }
0x1761   :  { %v3570_v47 = vpop.eup %3569 }
0x1762   :  { %v2662_v6 = vadd.f32 1.0, %v3570_v47 }
0x1764   :  { %3573 = vrcp.f32 %v2662_v6 }
0x1765   :  { %v3572_v9 = vpop.eup %3571 }
0x1766   :  { %v2663_v12 = vadd.f32 1.0, %v3572_v9 }
0x1768   :  { %3575 = vrcp.f32 %v2663_v12 }
0x1771   :  { %v3574_v36 = vpop.eup %3573 }
0x1772   :  { %v2670_v15 = vmul.f32 %v3574_v36, %v2668_v42  ;;  %v2676_v61 = vsub.f32 1.0, %v3574_v36  ;;  %v2688_v14 = vmul.f32 %v3574_v36, %v5077_v0 }
0x1774   :  { %v2672_v5 = vadd.f32 %v2670_v15, %v2565_v20 }
0x1775   :  { %v3576_v17 = vpop.eup %3575 }
0x1776   :  { %3577 = vtanh.f32 %v2672_v5  ;;  %v2671_v7 = vmul.f32 %v3576_v17, %v2669_v27  ;;  %v2677_v47 = vsub.f32 1.0, %v3576_v17  ;;  %v2689_v31 = vmul.f32 %v3576_v17, %v5082_v46 }
0x1778   :  { %v2673_v1 = vadd.f32 %v2671_v7, %v2566_v38 }
0x177a   :  { %3579 = vtanh.f32 %v2673_v1 }
0x1783   :  { %v3578_v18 = vpop.eup %3577 }
0x1784   :  { %2680 = vrot.lane.b32.xlu0 %v3578_v18, %s3755_s5 }
0x1787   :  { %v3580_v49 = vpop.eup %3579 }
0x1788   :  { %2682 = vrot.lane.b32.xlu1 %v3580_v49, %s3755_s5 }
0x17f6   :  { %v2681_v25 = vpop.permute.xlu0 %2680 }
0x17f7   :  { %v2686_v8 = vmul.f32 %v2681_v25, %v2676_v61  ;;  %v3644_v25 = vld [vmem:[%s5330_s8 + $0x70] sm:$0xff] }
0x17f9   :  { %v5129_v43 = vadd.f32 %v2688_v14, %v2686_v8  ;;  %v3645_v14 = vld [vmem:[%s5330_s8 + $0x68] sm:$0xff] }
0x17fa   :  { %v2683_v6 = vpop.permute.xlu1 %2682 }
0x17fb   :  { %v2687_v33 = vmul.f32 %v2683_v6, %v2677_v47  ;;  %2700 = vrot.lane.b32.xlu0 %v5129_v43, %s3755_s5  ;;  %v3646_v47 = vld [vmem:[%s5330_s8 + $0x60] sm:$0xff]  ;;  %v3647_v6 = vld [vmem:[%s5330_s8 + $0x58] sm:$0xff] }
0x17fd   :  { %v5134_v4 = vadd.f32 %v2689_v31, %v2687_v33  ;;  %v3648_v31 = vld [vmem:[%s5330_s8 + $0x50] sm:$0xff]  ;;  %v3649_v33 = vld [vmem:[%s5330_s8 + $0x48] sm:$0xff] }
0x17ff   :  { %2702 = vrot.lane.b32.xlu1 %v5134_v4, %s3755_s5 }
0x186d   :  { %v2701_v9 = vpop.permute.xlu0 %2700 }
0x186e   :  { %3347 = vmatmul.mubr.msk.f32.vlgmr.msra.gmra.mxu1 %vm641_vm2, %v2701_v9  ;;  %v3650_v9 = vld [vmem:[%s5330_s8 + $0x40] sm:$0xff] }
0x186f   :  { %2778 = vmatprep.mubr.f32.mxu1 %v5354_v19  ;;  %2987 = vmatpush1.msra.mxu1 %v4571_v60 }
0x1870   :  { %2988 = vmatprep.subr.mxu1 %v4578_v22  ;;  %v5361_v22 = vsel %vm4115_vm7, %v4778_v37, %v4788_v28 }
0x1871   :  { %v2703_v12 = vpop.permute.xlu1 %2702  ;;  %2989 = vmatpush1.msra.mxu1 %v4584_v24 }
0x1872   :  { %3348 = vmatmul.mubr.msk.f32.gmra.mxu1 %vm641_vm2, %v2703_v12  ;;  %2990 = vmatprep.subr.mxu1 %v4590_v62  ;;  %v3651_v12 = vld [vmem:[%s5330_s8 + $0x38] sm:$0xff] }
0x1873   :  { %2991 = vmatpush1.msra.mxu1 %v4596_v56  ;;  %3034 = vmatprep.mubr.f32.mxu1 %v5354_v19 }
0x1874   :  { %2992 = vmatprep.subr.mxu1 %v4602_v57 }
0x1875   :  { %2993 = vmatpush1.msra.mxu1 %v4608_v59  ;;  %v5362_v59 = vsel %vm4115_vm7, %v4783_v23, %v4801_v10 }
0x1876   :  { %2994 = vmatprep.subr.mxu1 %v4614_v34 }
0x1877   :  { %2995 = vmatpush1.msra.mxu1 %v4620_v30 }
0x1878   :  { %2996 = vmatprep.subr.mxu1 %v4626_v44 }
0x1879   :  { %2997 = vmatpush1.msra.mxu1 %v4632_v45 }
0x187a   :  { %2998 = vmatprep.subr.mxu1 %v4638_v48 }
0x187b   :  { %2999 = vmatpush1.msra.mxu1 %v4644_v54 }
0x187c   :  { %3000 = vmatprep.subr.mxu1 %v4650_v41 }
0x187d   :  { %3001 = vmatpush1.msra.mxu1 %v4656_v35 }
0x192e   :  { %v2774_v60 = vpop.f32.mrf.mxu1 }
0x192f   :  { %v2785_v24 = vadd.f32 %v2774_v60, %v5361_v22  ;;  %v3652_v60 = vld [vmem:[%s5330_s8 + $0x30] sm:$0xff]  ;;  %v3653_v22 = vld [vmem:[%s5330_s8 + $0x28] sm:$0xff] }
0x1930   :  { %v2776_v62 = vpop.f32.mrf.mxu1 }
0x1931   :  { %v3349_v56 = vmul.f32 -1.442695, %v2785_v24  ;;  %v2799_v41 = vadd.f32 %v4964_v58, %v2776_v62  ;;  %v3654_v24 = vld [vmem:[%s5330_s8 + $0x20] sm:$0xff]  ;;  %v3655_v62 = vld [vmem:[%s5330_s8 + $0x18] sm:$0xff] }
0x1932   :  { %v2780_v57 = vpop.f32.mrf.mxu1 }
0x1933   :  { %3581 = vpow2.f32 %v3349_v56  ;;  %v2786_v34 = vadd.f32 %v2780_v57, %v5362_v59  ;;  %v3656_v56 = vld [vmem:[%s5330_s8 + $0x10] sm:$0xff]  ;;  %v3657_v57 = vld [vmem:[%s5330_s8 + $0x8] sm:$0xff]  ;;  %v3658_v59 = vld [vmem:[%s5330_s8] sm:$0xff] }
0x1934   :  { %v2782_v37 = vpop.f32.mrf.mxu1 }
0x1935   :  { %v3350_v30 = vmul.f32 -1.442695, %v2786_v34  ;;  %v2800_v36 = vadd.f32 %v4964_v58, %v2782_v37 }
0x1937   :  { %3583 = vpow2.f32 %v3350_v30  ;;  %v5363_v30 = vsel %vm4115_vm7, %v4768_v40, %v4814_v16 }
0x1940   :  { %v3582_v44 = vpop.eup %3581 }
0x1941   :  { %v2793_v45 = vadd.f32 1.0, %v3582_v44 }
0x1943   :  { %3585 = vrcp.f32 %v2793_v45 }
0x1944   :  { %v3584_v48 = vpop.eup %3583 }
0x1945   :  { %v2794_v54 = vadd.f32 1.0, %v3584_v48 }
0x1947   :  { %3587 = vrcp.f32 %v2794_v54 }
0x1950   :  { %v3586_v35 = vpop.eup %3585 }
0x1951   :  { %v2801_v28 = vmul.f32 %v3586_v35, %v2799_v41  ;;  %v2807_v5 = vsub.f32 1.0, %v3586_v35  ;;  %v2819_v17 = vmul.f32 %v3586_v35, %v5129_v43  ;;  %v5364_v41 = vsel %vm4115_vm7, %v4773_v63, %v4831_v50  ;;  %v5365_v50 = vld [vmem:[#allocation17_spill] sm:$0xff] }
0x1953   :  { %v2803_v42 = vadd.f32 %v2801_v28, %v4837_v55 }
0x1954   :  { %v3588_v2 = vpop.eup %3587 }
0x1955   :  { %3589 = vtanh.f32 %v2803_v42  ;;  %v2802_v23 = vmul.f32 %v3588_v2, %v2800_v36  ;;  %v2808_v38 = vsub.f32 1.0, %v3588_v2  ;;  %v2820_v18 = vmul.f32 %v3588_v2, %v5134_v4 }
0x1957   :  { %v2804_v10 = vadd.f32 %v2802_v23, %v4860_v53 }
0x1959   :  { %3591 = vtanh.f32 %v2804_v10 }
0x1962   :  { %v3590_v15 = vpop.eup %3589 }
0x1963   :  { %2811 = vrot.lane.b32.xlu0 %v3590_v15, %s3755_s5 }
0x1966   :  { %v3592_v20 = vpop.eup %3591 }
0x1967   :  { %2813 = vrot.lane.b32.xlu1 %v3592_v20, %s3755_s5 }
0x19d5   :  { %v2812_v27 = vpop.permute.xlu0 %2811 }
0x19d6   :  { %v2817_v7 = vmul.f32 %v2812_v27, %v2807_v5 }
0x19d8   :  { %v5174_v55 = vadd.f32 %v2819_v17, %v2817_v7 }
0x19d9   :  { %v2814_v1 = vpop.permute.xlu1 %2813 }
0x19da   :  { %v2818_v49 = vmul.f32 %v2814_v1, %v2808_v38  ;;  %2831 = vrot.lane.b32.xlu0 %v5174_v55, %s3755_s5 }
0x19dc   :  { %v5179_v53 = vadd.f32 %v2820_v18, %v2818_v49 }
0x19de   :  { %2833 = vrot.lane.b32.xlu1 %v5179_v53, %s3755_s5 }
0x1a4c   :  { %v2832_v61 = vpop.permute.xlu0 %2831 }
0x1a4d   :  { %3351 = vmatmul.mubr.msk.f32.vlgmr.msra.gmra.mxu0 %vm641_vm2, %v2832_v61 }
0x1a4e   :  { %2909 = vmatprep.mubr.f32.mxu0 %v5354_v19  ;;  %3118 = vmatpush1.msra.mxu0 %v3644_v25 }
0x1a4f   :  { %3119 = vmatprep.subr.mxu0 %v3645_v14 }
0x1a50   :  { %v2834_v8 = vpop.permute.xlu1 %2833  ;;  %3120 = vmatpush1.msra.mxu0 %v3646_v47 }
0x1a51   :  { %3352 = vmatmul.mubr.msk.f32.gmra.mxu0 %vm641_vm2, %v2834_v8  ;;  %3121 = vmatprep.subr.mxu0 %v3647_v6 }
0x1a52   :  { %3122 = vmatpush1.msra.mxu0 %v3648_v31  ;;  %3165 = vmatprep.mubr.f32.mxu0 %v5354_v19 }
0x1a53   :  { %3123 = vmatprep.subr.mxu0 %v3649_v33 }
0x1a54   :  { %3124 = vmatpush1.msra.mxu0 %v3650_v9  ;;  %v5366_v9 = vsel %vm4115_vm7, %v4756_v21, %v4854_v51 }
0x1a55   :  { %3125 = vmatprep.subr.mxu0 %v3651_v12 }
0x1a56   :  { %3126 = vmatpush1.msra.mxu0 %v3652_v60 }
0x1a57   :  { %3127 = vmatprep.subr.mxu0 %v3653_v22 }
0x1a58   :  { %3128 = vmatpush1.msra.mxu0 %v3654_v24 }
0x1a59   :  { %3129 = vmatprep.subr.mxu0 %v3655_v62  ;;  %v5367_v62 = vsel %vm4115_vm7, %v4762_v32, %v4877_v3  ;;  %v5369_v3 = vld [vmem:[#allocation20_spill] sm:$0xff] }
0x1a5a   :  { %3130 = vmatpush1.msra.mxu0 %v3656_v56 }
0x1a5b   :  { %3131 = vmatprep.subr.mxu0 %v3657_v57 }
0x1a5c   :  { %3132 = vmatpush1.msra.mxu0 %v3658_v59 }
0x1b0d   :  { %v2905_v34 = vpop.f32.mrf.mxu0 }
0x1b0e   :  { %v2916_v44 = vadd.f32 %v2905_v34, %v5363_v30 }
0x1b0f   :  { %v2907_v45 = vpop.f32.mrf.mxu0 }
0x1b10   :  { %v3353_v48 = vmul.f32 -1.442695, %v2916_v44  ;;  %v2930_v40 = vadd.f32 %v4964_v58, %v2907_v45 }
0x1b11   :  { %v2911_v54 = vpop.f32.mrf.mxu0 }
0x1b12   :  { %3593 = vpow2.f32 %v3353_v48  ;;  %v2917_v35 = vadd.f32 %v2911_v54, %v5364_v41  ;;  %v5368_v54 = vld [vmem:[#allocation19_spill] sm:$0xff] }
0x1b13   :  { %v2913_v23 = vpop.f32.mrf.mxu0 }
0x1b14   :  { %v3354_v37 = vmul.f32 -1.442695, %v2917_v35  ;;  %v2931_v20 = vadd.f32 %v4964_v58, %v2913_v23 }
0x1b16   :  { %3595 = vpow2.f32 %v3354_v37 }
0x1b1f   :  { %v3594_v28 = vpop.eup %3593 }
0x1b20   :  { %v2924_v42 = vadd.f32 1.0, %v3594_v28 }
0x1b22   :  { %3597 = vrcp.f32 %v2924_v42 }
0x1b23   :  { %v3596_v36 = vpop.eup %3595 }
0x1b24   :  { %v2925_v2 = vadd.f32 1.0, %v3596_v36 }
0x1b26   :  { %3599 = vrcp.f32 %v2925_v2 }
0x1b2f   :  { %v3598_v16 = vpop.eup %3597 }
0x1b30   :  { %v2932_v10 = vmul.f32 %v3598_v16, %v2930_v40  ;;  %v2938_v38 = vsub.f32 1.0, %v3598_v16  ;;  %v2950_v18 = vmul.f32 %v3598_v16, %v5174_v55 }
0x1b32   :  { %v2934_v15 = vadd.f32 %v2932_v10, %v4883_v11 }
0x1b33   :  { %v3600_v5 = vpop.eup %3599 }
0x1b34   :  { %3601 = vtanh.f32 %v2934_v15  ;;  %v2933_v63 = vmul.f32 %v3600_v5, %v2931_v20  ;;  %v2939_v61 = vsub.f32 1.0, %v3600_v5  ;;  %v2951_v14 = vmul.f32 %v3600_v5, %v5179_v53 }
0x1b36   :  { %v2935_v27 = vadd.f32 %v2933_v63, %v5365_v50 }
0x1b38   :  { %3603 = vtanh.f32 %v2935_v27 }
0x1b41   :  { %v3602_v17 = vpop.eup %3601 }
0x1b42   :  { %2942 = vrot.lane.b32.xlu0 %v3602_v17, %s3755_s5 }
0x1b45   :  { %v3604_v7 = vpop.eup %3603 }
0x1b46   :  { %2944 = vrot.lane.b32.xlu1 %v3604_v7, %s3755_s5 }
0x1bb4   :  { %v2943_v1 = vpop.permute.xlu0 %2942 }
0x1bb5   :  { %v2948_v49 = vmul.f32 %v2943_v1, %v2938_v38  ;;  %v5370_v38 = vld [vmem:[#allocation14_spill] sm:$0xff]  ;;  %v5371_v1 = vld [vmem:[#allocation16_spill] sm:$0xff] }
0x1bb7   :  { %v5249_v11 = vadd.f32 %v2950_v18, %v2948_v49  ;;  %v5372_v18 = vsel %vm4115_vm7, %v5370_v38, %v5371_v1 }
0x1bb8   :  { %v2945_v25 = vpop.permute.xlu1 %2944 }
0x1bb9   :  { %v2949_v8 = vmul.f32 %v2945_v25, %v2939_v61  ;;  %2962 = vrot.lane.b32.xlu0 %v5249_v11, %s3755_s5 }
0x1bbb   :  { %v5254_v47 = vadd.f32 %v2951_v14, %v2949_v8  ;;  %v5373_v8 = vld [vmem:[#allocation15_spill] sm:$0xff] }
0x1bbd   :  { %2964 = vrot.lane.b32.xlu1 %v5254_v47, %s3755_s5 }
0x1c2b   :  { %v2963_v6 = vpop.permute.xlu0 %2962 }
0x1c2c   :  { %3355 = vmatmul.mubr.msk.f32.vlgmr.msra.gmra.mxu1 %vm641_vm2, %v2963_v6  ;;  %v5374_v6 = vld [vmem:[#allocation18_spill] sm:$0xff] }
0x1c2d   :  { %3040 = vmatprep.mubr.f32.mxu1 %v5354_v19 }
0x1c2f   :  { %v2965_v31 = vpop.permute.xlu1 %2964 }
0x1c30   :  { %3356 = vmatmul.mubr.msk.f32.gmra.mxu1 %vm641_vm2, %v2965_v31  ;;  %v5375_v31 = vsel %vm4115_vm7, %v5373_v8, %v5374_v6 }
0x1cec   :  { %v3036_v33 = vpop.f32.mrf.mxu1 }
0x1ced   :  { %v3047_v12 = vadd.f32 %v3036_v33, %v5366_v9 }
0x1cee   :  { %v3038_v60 = vpop.f32.mrf.mxu1 }
0x1cef   :  { %v3357_v22 = vmul.f32 -1.442695, %v3047_v12  ;;  %v3061_v21 = vadd.f32 %v4964_v58, %v3038_v60 }
0x1cf0   :  { %v3042_v24 = vpop.f32.mrf.mxu1 }
0x1cf1   :  { %3605 = vpow2.f32 %v3357_v22  ;;  %v3048_v56 = vadd.f32 %v3042_v24, %v5367_v62 }
0x1cf2   :  { %v3044_v45 = vpop.f32.mrf.mxu1 }
0x1cf3   :  { %v3358_v57 = vmul.f32 -1.442695, %v3048_v56  ;;  %v3062_v35 = vadd.f32 %v4964_v58, %v3044_v45 }
0x1cf5   :  { %3607 = vpow2.f32 %v3358_v57 }
0x1cfe   :  { %v3606_v59 = vpop.eup %3605 }
0x1cff   :  { %v3055_v34 = vadd.f32 1.0, %v3606_v59  ;;  %v5376_v59 = vld [vmem:[#allocation21_spill] sm:$0xff] }
0x1d01   :  { %3609 = vrcp.f32 %v3055_v34 }
0x1d02   :  { %v3608_v30 = vpop.eup %3607 }
0x1d03   :  { %v3056_v44 = vadd.f32 1.0, %v3608_v30 }
0x1d05   :  { %3611 = vrcp.f32 %v3056_v44 }
0x1d0e   :  { %v3610_v51 = vpop.eup %3609 }
0x1d0f   :  { %v3063_v48 = vmul.f32 %v3610_v51, %v3061_v21  ;;  %v3069_v2 = vsub.f32 1.0, %v3610_v51  ;;  %v3081_v16 = vmul.f32 %v3610_v51, %v5249_v11  ;;  %v5377_v21 = vld [vmem:[#allocation22_spill] sm:$0xff] }
0x1d11   :  { %v3065_v41 = vadd.f32 %v3063_v48, %v5368_v54  ;;  %v2414_v54 = vadd.f32 %v5025_v13, %v4974_v52 }
0x1d12   :  { %v3612_v37 = vpop.eup %3611 }
0x1d13   :  { %3613 = vtanh.f32 %v3065_v41  ;;  %v3064_v32 = vmul.f32 %v3612_v37, %v3062_v35  ;;  %v3070_v15 = vsub.f32 1.0, %v3612_v37  ;;  %v3082_v5 = vmul.f32 %v3612_v37, %v5254_v47 }
0x1d14   :  { %v2553_v41 = vadd.f32 %v5077_v0, %v2414_v54 }
0x1d15   :  { %v3066_v28 = vadd.f32 %v3064_v32, %v5369_v3 }
0x1d16   :  { %v2692_v35 = vadd.f32 %v5129_v43, %v2553_v41 }
0x1d17   :  { %3615 = vtanh.f32 %v3066_v28 }
0x1d18   :  { %v2823_v32 = vadd.f32 %v5174_v55, %v2692_v35 }
0x1d20   :  { %v3614_v42 = vpop.eup %3613 }
0x1d21   :  { %3073 = vrot.lane.b32.xlu0 %v3614_v42, %s3755_s5 }
0x1d24   :  { %v3616_v36 = vpop.eup %3615 }
0x1d25   :  { %3075 = vrot.lane.b32.xlu1 %v3616_v36, %s3755_s5  ;;  %v2954_v36 = vadd.f32 %v5249_v11, %v2823_v32 }
0x1d93   :  { %v3074_v40 = vpop.permute.xlu0 %3073 }
0x1d94   :  { %v3079_v23 = vmul.f32 %v3074_v40, %v3069_v2 }
0x1d96   :  { %v3083_v10 = vadd.f32 %v3081_v16, %v3079_v23 }
0x1d97   :  { %v3076_v20 = vpop.permute.xlu1 %3075 }
0x1d98   :  { %v3080_v63 = vmul.f32 %v3076_v20, %v3070_v15  ;;  %3093 = vrot.lane.b32.xlu0 %v3083_v10, %s3755_s5  ;;  %v3085_v16 = vadd.f32 %v3083_v10, %v2954_v36 }
0x1d9a   :  { %v3084_v50 = vadd.f32 %v3082_v5, %v3080_v63 }
0x1d9c   :  { %3095 = vrot.lane.b32.xlu1 %v3084_v50, %s3755_s5 }
0x1e0a   :  { %v3094_v27 = vpop.permute.xlu0 %3093 }
0x1e0b   :  { %3359 = vmatmul.mubr.msk.f32.vlgmr.msra.gmra.mxu0 %vm641_vm2, %v3094_v27 }
0x1e0c   :  { %3171 = vmatprep.mubr.f32.mxu0 %v5354_v19 }
0x1e0e   :  { %v3096_v17 = vpop.permute.xlu1 %3095 }
0x1e0f   :  { %3360 = vmatmul.mubr.msk.f32.gmra.mxu0 %vm641_vm2, %v3096_v17 }
0x1ecb   :  { %v3167_v7 = vpop.f32.mrf.mxu0 }
0x1ecc   :  { %v3178_v49 = vadd.f32 %v3167_v7, %v5372_v18 }
0x1ecd   :  { %v3169_v61 = vpop.f32.mrf.mxu0 }
0x1ece   :  { %v3361_v25 = vmul.f32 -1.442695, %v3178_v49  ;;  %v3192_v24 = vadd.f32 %v4964_v58, %v3169_v61 }
0x1ecf   :  { %v3173_v14 = vpop.f32.mrf.mxu0 }
0x1ed0   :  { %3617 = vpow2.f32 %v3361_v25  ;;  %v3179_v19 = vadd.f32 %v3173_v14, %v5375_v31 }
0x1ed1   :  { %v3175_v56 = vpop.f32.mrf.mxu0 }
0x1ed2   :  { %v3362_v33 = vmul.f32 -1.442695, %v3179_v19  ;;  %v3193_v29 = vadd.f32 %v4964_v58, %v3175_v56  ;;  %v2415_v58 = vadd.f32 %v5030_v39, %v4978_v26 }
0x1ed4   :  { %3619 = vpow2.f32 %v3362_v33  ;;  %v2554_v37 = vadd.f32 %v5082_v46, %v2415_v58 }
0x1ed6   :  { %v2693_v42 = vadd.f32 %v5134_v4, %v2554_v37 }
0x1ed8   :  { %v2824_v52 = vadd.f32 %v5179_v53, %v2693_v42 }
0x1eda   :  { %v2955_v39 = vadd.f32 %v5254_v47, %v2824_v52 }
0x1edc   :  { %v3086_v20 = vadd.f32 %v3084_v50, %v2955_v39 }
0x1edd   :  { %v3618_v9 = vpop.eup %3617 }
0x1ede   :  { %v3186_v12 = vadd.f32 1.0, %v3618_v9 }
0x1ee0   :  { %3621 = vrcp.f32 %v3186_v12 }
0x1ee1   :  { %v3620_v60 = vpop.eup %3619 }
0x1ee2   :  { %v3187_v22 = vadd.f32 1.0, %v3620_v60 }
0x1ee4   :  { %3623 = vrcp.f32 %v3187_v22 }
0x1eed   :  { %v3622_v62 = vpop.eup %3621 }
0x1eee   :  { %v3194_v57 = vmul.f32 %v3622_v62, %v3192_v24  ;;  %v3200_v3 = vsub.f32 1.0, %v3622_v62  ;;  %v3212_v2 = vmul.f32 %v3622_v62, %v3083_v10 }
0x1ef0   :  { %v3196_v34 = vadd.f32 %v3194_v57, %v5376_v59 }
0x1ef1   :  { %v3624_v30 = vpop.eup %3623 }
0x1ef2   :  { %3625 = vtanh.f32 %v3196_v34  ;;  %v3195_v44 = vmul.f32 %v3624_v30, %v3193_v29  ;;  %v3201_v0 = vsub.f32 1.0, %v3624_v30  ;;  %v3213_v43 = vmul.f32 %v3624_v30, %v3084_v50 }
0x1ef4   :  { %v3197_v51 = vadd.f32 %v3195_v44, %v5377_v21 }
0x1ef6   :  { %3627 = vtanh.f32 %v3197_v51 }
0x1eff   :  { %v3626_v45 = vpop.eup %3625 }
0x1f00   :  { %3204 = vrot.lane.b32.xlu0 %v3626_v45, %s3755_s5 }
0x1f03   :  { %v3628_v48 = vpop.eup %3627 }
0x1f04   :  { %3206 = vrot.lane.b32.xlu1 %v3628_v48, %s3755_s5 }
0x1f72   :  { %v3205_v28 = vpop.permute.xlu0 %3204 }
0x1f73   :  { %v3210_v40 = vmul.f32 %v3205_v28, %v3200_v3 }
0x1f75   :  { %v3214_v13 = vadd.f32 %v3212_v2, %v3210_v40 }
0x1f76   :  { %v3207_v26 = vpop.permute.xlu1 %3206 }
0x1f77   :  { %v3211_v46 = vmul.f32 %v3207_v26, %v3201_v0  ;;  %v3216_v23 = vadd.f32 %v3214_v13, %v3085_v16 }
0x1f79   :  { %v3215_v55 = vadd.f32 %v3213_v43, %v3211_v46  ;;  %v3218_v15 = vmul.f32 0.125, %v3216_v23 }
0x1f7b   :  { %3222 = vrot.lane.b32.xlu0 %v3218_v15, %s3755_s5  ;;  %v3217_v4 = vadd.f32 %v3215_v55, %v3086_v20 }
0x1f7d   :  { %v3219_v11 = vmul.f32 0.125, %v3217_v4 }
0x1f7f   :  { %3224 = vrot.lane.b32.xlu1 %v3219_v11, %s3755_s5 }
0x1fed   :  { %v3223_v5 = vpop.permute.xlu0 %3222 }
0x1fee   :  { %3228 = vst.msk [vmem:[%s5332_s10] sm:$0xff] %vm641_vm2, %v3223_v5 }
0x1ff1   :  { %v3225_v53 = vpop.permute.xlu1 %3224 }
0x1ff2   :  { %3229 = vst.msk [vmem:[%s5332_s10 + $0x8] sm:$0xff] %vm641_vm2, %v3225_v53 }
0x1ff3   :  { %3234 = vsyncpa [#allocation5], 1 }
0x1ff4   :  { %3235 = vsyncpa [#allocation7], 1 }
0x1ff5   :  { %3236 = vsyncpa [#allocation10], 1 }

</bundles_post_ra>
